<compile_context>
chip_gen: v6e
topology: v6e:2x2x1
jax: 0.10.0
libtpu: 0.0.40
codegen_flags: <defaults>
</compile_context>

<pallas_src>
import functools

import numpy as np
import jax
import jax.numpy as jnp
from jax import lax
from jax.experimental import pallas as pl
from jax.experimental.pallas import tpu as pltpu

SOFTPLUS_THRESHOLD = 20.0  # matches torch.nn.Softplus(beta=1, threshold=20)


def _softplus(x):
    return jnp.where(x > SOFTPLUS_THRESHOLD, x,
                     jnp.log(1.0 + jnp.exp(jnp.minimum(x, SOFTPLUS_THRESHOLD))))


def _round_up(x, m):
    return (x + m - 1) // m * m


def _mosaic_params(block_bytes, semantics):
    # Generation-safe VMEM budget: double-buffered blocks + headroom, kept well
    # under v7x's 64 MiB physical VMEM (v5e/v6e have 128 MiB; v5e scoped
    # default is only 16 MiB, so an explicit limit is load-bearing there).
    limit = int(min(max(2 * block_bytes + (8 << 20), 16 << 20), 48 << 20))
    return pltpu.CompilerParams(dimension_semantics=semantics,
                                vmem_limit_bytes=limit)


# ----------------------------------------------------------------------------
# Kernel A: per-pair sensitivity + pre-contraction against w_int.
#   pre[p, m] = sum_s sense[p, s] * sum_f gathered[p, f] * w_int[s, f, m]
# Built with one real matmul (gathered @ w_big) plus two constant 0/1
# structural matmuls (sensitivity lane replication and the s-reduction), so
# every intermediate stays 2-D and lane-dense.
# ----------------------------------------------------------------------------
def _pair_kernel(dist_ref, gath_ref, mu_ref, sig_ref, wbig_ref, rmat_ref,
                 red_ref, pre_ref, *, dist_hard_max):
    d = dist_ref[...]                                     # (tile_p, 1) f32
    inv_d = 1.0 / jnp.maximum(d, 1e-6)                    # guard degenerate r
    mu = mu_ref[...]                                      # (1, S)
    sig = sig_ref[...]                                    # (1, S)
    nondim = -((inv_d - mu) ** 2) / (2.0 * sig * sig)     # (tile_p, S)
    cut = jnp.where(d < dist_hard_max,
                    jnp.cos((jnp.pi / 2.0) * (d / dist_hard_max)) ** 2,
                    0.0)                                  # (tile_p, 1)
    sense = jnp.exp(nondim) * cut                         # (tile_p, S)

    # big[p, s*M + m] = sum_f gathered[p, f] * w_int[s, f, m]
    big = jnp.dot(gath_ref[...], wbig_ref[...],
                  preferred_element_type=jnp.float32)     # (tile_p, S*M)
    # sense_rep[p, s*M + m] = sense[p, s]
    sense_rep = jnp.dot(sense, rmat_ref[...],
                        preferred_element_type=jnp.float32)
    # pre[p, m] = sum_s sense_rep * big
    pre_ref[...] = jnp.dot(sense_rep * big, red_ref[...],
                           preferred_element_type=jnp.float32)


def pair_precontract_call(dist_col, gathered, interact, dist_hard_max, tile_p):
    n_pairs_pad, nf_in = gathered.shape
    n_sens = interact["mu"].shape[1]
    nf_mid = interact["w_self"].shape[1]

    # w_big[f, s*M + m] = w_int[s, f, m]    (host-side layout prep)
    w_big = jnp.transpose(interact["w_int"], (1, 0, 2)).reshape(
        nf_in, n_sens * nf_mid)
    rmat = jnp.asarray(np.repeat(np.eye(n_sens, dtype=np.float32), nf_mid,
                                 axis=1))                  # (S, S*M)
    red = jnp.asarray(np.tile(np.eye(nf_mid, dtype=np.float32),
                              (n_sens, 1)))                # (S*M, M)

    grid = (n_pairs_pad // tile_p,)

    def whole(shape):
        nd = len(shape)
        return pl.BlockSpec(tuple(shape), lambda p, _nd=nd: (0,) * _nd)

    in_specs = [pl.BlockSpec((tile_p, 1), lambda p: (p, 0)),
                pl.BlockSpec((tile_p, nf_in), lambda p: (p, 0)),
                whole(interact["mu"].shape), whole(interact["sigma"].shape),
                whole(w_big.shape), whole(rmat.shape), whole(red.shape)]

    block_bytes = 4 * (tile_p * (1 + nf_in + nf_mid + 2 * n_sens * nf_mid)
                       + int(w_big.size) + int(rmat.size) + int(red.size)
                       + 2 * n_sens)

    return pl.pallas_call(
        functools.partial(_pair_kernel, dist_hard_max=float(dist_hard_max)),
        out_shape=jax.ShapeDtypeStruct((n_pairs_pad, nf_mid), jnp.float32),
        grid_spec=pltpu.PrefetchScalarGridSpec(
            num_scalar_prefetch=0,
            grid=grid,
            in_specs=in_specs,
            out_specs=pl.BlockSpec((tile_p, nf_mid), lambda p: (p, 0))),
        compiler_params=_mosaic_params(block_bytes, ("parallel",)),
    )(dist_col, gathered, interact["mu"], interact["sigma"], w_big, rmat, red)


# ----------------------------------------------------------------------------
# Kernel B: envsum scatter over pair_first + interaction tail + ResNet + all
# atom layers, with a VMEM-resident (tile_a, nf_mid) accumulator.
# ----------------------------------------------------------------------------
def _atom_kernel(pf_ref, pre_ref, feat_ref, wself_ref, bself_ref, wres_ref,
                 bres_ref, *rest, has_adjuster, n_atom_layers, tile_a):
    rest = list(rest)
    wadj_ref = rest.pop(0) if has_adjuster else None
    if n_atom_layers > 0:
        w1_ref, b1_ref, w2_ref, b2_ref = rest[:4]
        rest = rest[4:]
    out_ref, env_ref = rest

    a_idx = pl.program_id(0)
    p_idx = pl.program_id(1)
    n_p_tiles = pl.num_programs(1)
    tile_p = pre_ref.shape[0]

    # ---- zero the accumulator at the first pair tile ----
    @pl.when(p_idx == 0)
    def _zero():
        env_ref[...] = jnp.zeros_like(env_ref)

    # ---- scatter-add over pair_first for this atom tile: ONE matmul ----
    rows = lax.broadcasted_iota(jnp.int32, (tile_a, tile_p), 0) + a_idx * tile_a
    p1t = (pf_ref[...] == rows).astype(jnp.float32)        # (tile_a, tile_p)
    env_ref[...] += jnp.dot(p1t, pre_ref[...],
                            preferred_element_type=jnp.float32)

    # ---- finalize on the last pair tile ----
    @pl.when(p_idx == n_p_tiles - 1)
    def _finalize():
        feat_tile = feat_ref[...]                          # (tile_a, nf_in)
        acc = (env_ref[...]
               + jnp.dot(feat_tile, wself_ref[...],
                         preferred_element_type=jnp.float32)
               + bself_ref[...])
        h = _softplus(acc)
        h = jnp.dot(h, wres_ref[...],
                    preferred_element_type=jnp.float32) + bres_ref[...]
        if has_adjuster:
            skip = jnp.dot(feat_tile, wadj_ref[...],
                           preferred_element_type=jnp.float32)
        else:
            skip = feat_tile
        x = h + skip
        # ResNet-wrapped atom (Linear) layers, activations stay in VMEM.
        for j in range(n_atom_layers):
            h2 = jnp.dot(x, w1_ref[j], preferred_element_type=jnp.float32) + b1_ref[j]
            h2 = _softplus(h2)
            h2 = jnp.dot(h2, w2_ref[j], preferred_element_type=jnp.float32) + b2_ref[j]
            x = x + h2
        out_ref[...] = x


def atom_scatter_call(pf_row, pre, feats_pad, block, tile_a, tile_p):
    interact = block["interact"]
    atom_layers = block["atom_layers"]
    n_atoms_pad, nf_in = feats_pad.shape
    n_pairs_pad = pre.shape[0]
    nf_mid = interact["w_self"].shape[1]
    nf_out = interact["w_res"].shape[1]
    has_adjuster = "w_adj" in interact
    n_atom_layers = len(atom_layers)

    grid = (n_atoms_pad // tile_a, n_pairs_pad // tile_p)

    def whole(shape):
        nd = len(shape)
        return pl.BlockSpec(tuple(shape), lambda a, p, _nd=nd: (0,) * _nd)

    inputs = [pf_row, pre, feats_pad,
              interact["w_self"], interact["b_self"],
              interact["w_res"], interact["b_res"]]
    in_specs = [pl.BlockSpec((1, tile_p), lambda a, p: (0, p)),
                pl.BlockSpec((tile_p, nf_mid), lambda a, p: (p, 0)),
                pl.BlockSpec((tile_a, nf_in), lambda a, p: (a, 0)),
                whole(interact["w_self"].shape), whole(interact["b_self"].shape),
                whole(interact["w_res"].shape), whole(interact["b_res"].shape)]
    if has_adjuster:
        inputs.append(interact["w_adj"])
        in_specs.append(whole(interact["w_adj"].shape))
    if n_atom_layers > 0:
        w1 = jnp.stack([l["w1"] for l in atom_layers])
        b1 = jnp.stack([l["b1"] for l in atom_layers])
        w2 = jnp.stack([l["w2"] for l in atom_layers])
        b2 = jnp.stack([l["b2"] for l in atom_layers])
        inputs += [w1, b1, w2, b2]
        in_specs += [whole(w1.shape), whole(b1.shape),
                     whole(w2.shape), whole(b2.shape)]

    kernel = functools.partial(
        _atom_kernel, has_adjuster=has_adjuster,
        n_atom_layers=n_atom_layers, tile_a=tile_a)

    weight_bytes = sum(int(np.prod(x.shape)) * 4 for x in inputs[3:])
    block_bytes = 4 * (tile_p + tile_p * nf_mid + tile_a * nf_in
                       + tile_a * nf_out + tile_a * nf_mid
                       + tile_a * tile_p) + weight_bytes

    return pl.pallas_call(
        kernel,
        out_shape=jax.ShapeDtypeStruct((n_atoms_pad, nf_out), jnp.float32),
        grid_spec=pltpu.PrefetchScalarGridSpec(
            num_scalar_prefetch=0,
            grid=grid,
            in_specs=in_specs,
            out_specs=pl.BlockSpec((tile_a, nf_out), lambda a, p: (a, 0)),
            scratch_shapes=[pltpu.VMEM((tile_a, nf_mid), jnp.float32)]),
        compiler_params=_mosaic_params(block_bytes, ("parallel", "arbitrary")),
    )(*inputs)


# ----------------------------------------------------------------------------
# Hipnn forward (glue) — returns [input_features, block1_out, block2_out, ...]
# ----------------------------------------------------------------------------
def hipnn_forward(params, features, pair_first, pair_second, pair_dist,
                  dist_hard_max):
    features = features.astype(jnp.float32)        # features.to(pair_dist.dtype)
    if pair_dist.ndim == 2:                        # squeeze(dim=1)
        pair_dist = pair_dist[:, 0]
    n_atoms = features.shape[0]
    n_pairs = pair_dist.shape[0]

    # ---- generation-aware tiling / padding ----
    tile_p = min(2048, _round_up(max(n_pairs, 1), 128))
    n_pairs_pad = _round_up(max(n_pairs, 1), tile_p)
    a_pad8 = _round_up(n_atoms, 8)
    if a_pad8 >= 16:
        # >= 2 atom tiles so the "parallel" atom axis can feed both v7x
        # TensorCores; cap tile_a to keep per-step VMEM small.
        tile_a = min(256, _round_up((a_pad8 + 1) // 2, 8))
    else:
        tile_a = a_pad8
    n_atoms_pad = _round_up(n_atoms, tile_a)

    # Padded pairs: pf = -1 (matches no atom row), dist >= hard cutoff (sense=0).
    pf_row = jnp.full((1, n_pairs_pad), -1, jnp.int32)
    pf_row = pf_row.at[0, :n_pairs].set(pair_first.astype(jnp.int32))
    ps_idx = jnp.zeros((n_pairs_pad,), jnp.int32)
    ps_idx = ps_idx.at[:n_pairs].set(pair_second.astype(jnp.int32))
    dist_col = jnp.full((n_pairs_pad, 1), 2.0 * float(dist_hard_max), jnp.float32)
    dist_col = dist_col.at[:n_pairs, 0].set(pair_dist.astype(jnp.float32))
    feats_pad = jnp.zeros((n_atoms_pad, features.shape[1]), jnp.float32)
    feats_pad = feats_pad.at[:n_atoms].set(features)

    outputs = [features]
    for block in params["blocks"]:
        # Real gather (native XLA) of features[pair_second]; replaces the
        # in-kernel one-hot gather (O(tile_p * n_atoms) compares + temporary).
        # TODO(synk): for huge systems, a scalar-prefetched in-kernel DMA row
        # gather would avoid this extra HBM round trip.
        gathered = jnp.take(feats_pad, ps_idx, axis=0)
        pre = pair_precontract_call(dist_col, gathered, block["interact"],
                                    dist_hard_max, tile_p)
        feats_pad = atom_scatter_call(pf_row, pre, feats_pad, block,
                                      tile_a, tile_p)
        outputs.append(feats_pad[:n_atoms])
    return outputs


# ----------------------------------------------------------------------------
# Pure-JAX reference (same math) for verification.
# ----------------------------------------------------------------------------
def reference_forward(params, features, pair_first, pair_second, pair_dist,
                      dist_hard_max):
    feats = features.astype(jnp.float32)
    n_atoms = feats.shape[0]
    d = pair_dist.astype(jnp.float32)[:, None]
    outs = [feats]
    for block in params["blocks"]:
        p = block["interact"]
        sense = jnp.exp(-((1.0 / d - p["mu"]) ** 2) / (2.0 * p["sigma"] ** 2))
        sense = sense * jnp.where(d < dist_hard_max,
                                  jnp.cos((jnp.pi / 2.0) * d / dist_hard_max) ** 2,
                                  0.0)
        gathered = feats[pair_second]                         # (n_pairs, nf_in)
        pair_env = sense[:, :, None] * gathered[:, None, :]   # (n_pairs, S, F)
        env = jax.ops.segment_sum(pair_env, pair_first, num_segments=n_atoms)
        nf_mid = p["w_self"].shape[1]
        t = env.reshape(n_atoms, -1) @ p["w_int"].reshape(-1, nf_mid) \
            + feats @ p["w_self"] + p["b_self"]
        h = jax.nn.softplus(t) @ p["w_res"] + p["b_res"]
        skip = feats @ p["w_adj"] if "w_adj" in p else feats
        feats = h + skip
        for lay in block["atom_layers"]:
            h2 = jax.nn.softplus(feats @ lay["w1"] + lay["b1"]) @ lay["w2"] + lay["b2"]
            feats = h2 + feats
        outs.append(feats)
    return outs


# ----------------------------------------------------------------------------
# Deterministic synthetic parameter init (shapes from Hipnn.__init__).
# ----------------------------------------------------------------------------
def xavier_normal(key, shape, fan_in, fan_out):
    std = float(np.sqrt(2.0 / (fan_in + fan_out)))
    return std * jax.random.normal(key, shape, dtype=jnp.float32)


def init_params(key, nf_in, nf, n_sens, n_interaction_layers, n_atom_layers,
                dist_soft_min, dist_soft_max):
    feature_sizes = (nf_in,) + (nf,) * n_interaction_layers
    mu = jnp.linspace(1.0 / dist_soft_max, 1.0 / dist_soft_min, n_sens,
                      dtype=jnp.float32).reshape(1, n_sens)
    sigma = jnp.full((1, n_sens),
                     (1.0 / dist_soft_min - 1.0 / dist_soft_max) / n_sens,
                     dtype=jnp.float32)
    blocks = []
    for fin, fout in zip(feature_sizes[:-1], feature_sizes[1:]):
        fmid = fout  # resnet=True -> nf_middle = feature_sizes[1:]
        key, k_int, k_self, k_bs, k_res, k_br, k_adj = jax.random.split(key, 7)
        interact = {
            "mu": mu,
            "sigma": sigma,
            "w_int": xavier_normal(k_int, (n_sens, fin, fmid), n_sens * fin, fmid),
            "w_self": xavier_normal(k_self, (fin, fmid), fin, fmid),
            "b_self": (jax.random.uniform(k_bs, (1, fmid), jnp.float32) - 0.5)
                      / np.sqrt(fin),
            "w_res": xavier_normal(k_res, (fmid, fout), fmid, fout),
            "b_res": (jax.random.uniform(k_br, (1, fout), jnp.float32) - 0.5)
                     / np.sqrt(fmid),
        }
        if fin != fout:
            interact["w_adj"] = xavier_normal(k_adj, (fin, fout), fin, fout)
        atom_layers = []
        for _ in range(n_atom_layers):
            key, k1, kb1, k2, kb2 = jax.random.split(key, 5)
            atom_layers.append({
                "w1": xavier_normal(k1, (fout, fmid), fout, fmid),
                "b1": (jax.random.uniform(kb1, (1, fmid), jnp.float32) - 0.5)
                      / np.sqrt(fout),
                "w2": xavier_normal(k2, (fmid, fout), fmid, fout),
                "b2": (jax.random.uniform(kb2, (1, fout), jnp.float32) - 0.5)
                      / np.sqrt(fmid),
            })
        blocks.append({"interact": interact, "atom_layers": atom_layers})
    return {"blocks": blocks}


if __name__ == "__main__":
    # Hipnn(n_features=16, n_sensitivities=8, dist_soft_min=0.85, dist_soft_max=5.0,
    #       dist_hard_max=6.0, n_atom_layers=2, n_interaction_layers=2,
    #       n_input_features=4, resnet=True, activation=torch.nn.Softplus)
    n_atoms, n_pairs = 8, 32
    nf_in, nf, n_sens = 4, 16, 8
    n_interaction_layers, n_atom_layers = 2, 2
    dist_soft_min, dist_soft_max, dist_hard_max = 0.85, 5.0, 6.0

    key = jax.random.PRNGKey(0)
    key, kp, kf, k1, k2, kd = jax.random.split(key, 6)
    params = init_params(kp, nf_in, nf, n_sens, n_interaction_layers,
                         n_atom_layers, dist_soft_min, dist_soft_max)
    features = jax.random.normal(kf, (n_atoms, nf_in), jnp.float32)
    pair_first = jax.random.randint(k1, (n_pairs,), 0, n_atoms, jnp.int32)
    pair_second = jax.random.randint(k2, (n_pairs,), 0, n_atoms, jnp.int32)
    pair_dist = jax.random.uniform(kd, (n_pairs,), jnp.float32, 0.9, 7.0)

    outs = hipnn_forward(params, features, pair_first, pair_second, pair_dist,
                         dist_hard_max)
    outs = [jax.block_until_ready(o) for o in outs]

    refs = reference_forward(params, features, pair_first, pair_second,
                             pair_dist, dist_hard_max)
    for o, r in zip(outs, refs):
        np.testing.assert_allclose(np.asarray(o), np.asarray(r),
                                   rtol=1e-4, atol=1e-4)

    print("KERNEL_OK")
</pallas_src>

<mosaic_0001>
module attributes {stable_mosaic.version = 11 : i64} {
  func.func @_pair_kernel(%arg0: i32, %arg1: memref<128x1xf32, #tpu.memory_space<vmem>>, %arg2: memref<128x4xf32, #tpu.memory_space<vmem>>, %arg3: memref<1x8xf32, #tpu.memory_space<vmem>>, %arg4: memref<1x8xf32, #tpu.memory_space<vmem>>, %arg5: memref<4x128xf32, #tpu.memory_space<vmem>>, %arg6: memref<8x128xf32, #tpu.memory_space<vmem>>, %arg7: memref<128x16xf32, #tpu.memory_space<vmem>>, %arg8: memref<128x16xf32, #tpu.memory_space<vmem>>) attributes {dimension_semantics = [#tpu.dimension_semantics<parallel>], iteration_bounds = array<i64: 1>, scalar_prefetch = 0 : i64, scratch_operands = 0 : i64, tpu.core_type = #tpu.core_type<tc>, window_params = [{transform_indices = @transform_0, window_bounds = array<i64: 128, 1>}, {transform_indices = @transform_1, window_bounds = array<i64: 128, 4>}, {pipeline_mode = #tpu.pipeline_mode<synchronous>, transform_indices = @transform_2, window_bounds = array<i64: 1, 8>}, {pipeline_mode = #tpu.pipeline_mode<synchronous>, transform_indices = @transform_3, window_bounds = array<i64: 1, 8>}, {pipeline_mode = #tpu.pipeline_mode<synchronous>, transform_indices = @transform_4, window_bounds = array<i64: 4, 128>}, {pipeline_mode = #tpu.pipeline_mode<synchronous>, transform_indices = @transform_5, window_bounds = array<i64: 8, 128>}, {pipeline_mode = #tpu.pipeline_mode<synchronous>, transform_indices = @transform_6, window_bounds = array<i64: 128, 16>}, {transform_indices = @transform_7, window_bounds = array<i64: 128, 16>}]} {
    %c0 = arith.constant 0 : index
    %c0_0 = arith.constant 0 : index
    %0 = vector.load %arg1[%c0, %c0_0] : memref<128x1xf32, #tpu.memory_space<vmem>>, vector<128x1xf32>
    %cst = arith.constant 9.99999997E-7 : f32
    %1 = vector.broadcast %cst : f32 to vector<128x1xf32>
    %2 = arith.maximumf %0, %1 : vector<128x1xf32>
    %cst_1 = arith.constant 1.000000e+00 : f32
    %3 = vector.broadcast %cst_1 : f32 to vector<128x1xf32>
    %4 = arith.divf %3, %2 : vector<128x1xf32>
    %c0_2 = arith.constant 0 : index
    %c0_3 = arith.constant 0 : index
    %5 = vector.load %arg3[%c0_2, %c0_3] : memref<1x8xf32, #tpu.memory_space<vmem>>, vector<1x8xf32>
    %c0_4 = arith.constant 0 : index
    %c0_5 = arith.constant 0 : index
    %6 = vector.load %arg4[%c0_4, %c0_5] : memref<1x8xf32, #tpu.memory_space<vmem>>, vector<1x8xf32>
    %7 = vector.broadcast %4 : vector<128x1xf32> to vector<128x8xf32>
    %8 = vector.broadcast %5 : vector<1x8xf32> to vector<128x8xf32>
    %9 = arith.subf %7, %8 : vector<128x8xf32>
    %10 = arith.mulf %9, %9 : vector<128x8xf32>
    %cst_6 = arith.constant 0.000000e+00 : f32
    %11 = vector.broadcast %cst_6 : f32 to vector<128x8xf32>
    %12 = arith.subf %11, %10 : vector<128x8xf32>
    %cst_7 = arith.constant 2.000000e+00 : f32
    %13 = vector.broadcast %cst_7 : f32 to vector<1x8xf32>
    %14 = arith.mulf %13, %6 : vector<1x8xf32>
    %15 = arith.mulf %14, %6 : vector<1x8xf32>
    %16 = vector.broadcast %15 : vector<1x8xf32> to vector<128x8xf32>
    %17 = arith.divf %12, %16 : vector<128x8xf32>
    %cst_8 = arith.constant 6.000000e+00 : f32
    %18 = vector.broadcast %cst_8 : f32 to vector<128x1xf32>
    %19 = arith.cmpf olt, %0, %18 : vector<128x1xf32>
    %cst_9 = arith.constant 6.000000e+00 : f32
    %20 = vector.broadcast %cst_9 : f32 to vector<128x1xf32>
    %21 = arith.divf %0, %20 : vector<128x1xf32>
    %cst_10 = arith.constant 1.57079637 : f32
    %22 = vector.broadcast %cst_10 : f32 to vector<128x1xf32>
    %23 = arith.mulf %22, %21 : vector<128x1xf32>
    %24 = math.cos %23 : vector<128x1xf32>
    %25 = arith.mulf %24, %24 : vector<128x1xf32>
    %cst_11 = arith.constant 0.000000e+00 : f32
    %26 = vector.broadcast %cst_11 : f32 to vector<128x1xf32>
    %27 = arith.select %19, %25, %26 : vector<128x1xi1>, vector<128x1xf32>
    %28 = math.exp %17 : vector<128x8xf32>
    %29 = vector.broadcast %27 : vector<128x1xf32> to vector<128x8xf32>
    %30 = arith.mulf %28, %29 : vector<128x8xf32>
    %c0_12 = arith.constant 0 : index
    %c0_13 = arith.constant 0 : index
    %31 = vector.load %arg2[%c0_12, %c0_13] : memref<128x4xf32, #tpu.memory_space<vmem>>, vector<128x4xf32>
    %c0_14 = arith.constant 0 : index
    %c0_15 = arith.constant 0 : index
    %32 = vector.load %arg5[%c0_14, %c0_15] : memref<4x128xf32, #tpu.memory_space<vmem>>, vector<4x128xf32>
    %cst_16 = arith.constant dense<0.000000e+00> : vector<128x128xf32>
    %33 = tpu.matmul %31, %32, %cst_16 {dimension_numbers = #tpu.dot_dimension_numbers<[1], [0], [0], [1], [0, 0, 1, 1], [], []>} : vector<128x4xf32>, vector<4x128xf32>, vector<128x128xf32> -> vector<128x128xf32>
    %c0_17 = arith.constant 0 : index
    %c0_18 = arith.constant 0 : index
    %34 = vector.load %arg6[%c0_17, %c0_18] : memref<8x128xf32, #tpu.memory_space<vmem>>, vector<8x128xf32>
    %cst_19 = arith.constant dense<0.000000e+00> : vector<128x128xf32>
    %35 = tpu.matmul %30, %34, %cst_19 {dimension_numbers = #tpu.dot_dimension_numbers<[1], [0], [0], [1], [0, 0, 1, 1], [], []>} : vector<128x8xf32>, vector<8x128xf32>, vector<128x128xf32> -> vector<128x128xf32>
    %36 = arith.mulf %35, %33 : vector<128x128xf32>
    %c0_20 = arith.constant 0 : index
    %c0_21 = arith.constant 0 : index
    %37 = vector.load %arg7[%c0_20, %c0_21] : memref<128x16xf32, #tpu.memory_space<vmem>>, vector<128x16xf32>
    %cst_22 = arith.constant dense<0.000000e+00> : vector<128x16xf32>
    %38 = tpu.matmul %36, %37, %cst_22 {dimension_numbers = #tpu.dot_dimension_numbers<[1], [0], [0], [1], [0, 0, 1, 1], [], []>} : vector<128x128xf32>, vector<128x16xf32>, vector<128x16xf32> -> vector<128x16xf32>
    %c0_23 = arith.constant 0 : index
    %c0_24 = arith.constant 0 : index
    %39 = vector.load %arg8[%c0_23, %c0_24] : memref<128x16xf32, #tpu.memory_space<vmem>>, vector<128x16xf32>
    tpu.vector_store %arg8[%c0_23, %c0_24], %38 {strides = array<i32>} : memref<128x16xf32, #tpu.memory_space<vmem>>, vector<128x16xf32>,
    return
  }
  func.func @transform_0(%arg0: i32) -> (i32, i32) {
    %c0_i32 = arith.constant 0 : i32
    %c0_i32_0 = arith.constant 0 : i32
    return %arg0, %c0_i32 : i32, i32
  }
  func.func @transform_1(%arg0: i32) -> (i32, i32) {
    %c0_i32 = arith.constant 0 : i32
    %c0_i32_0 = arith.constant 0 : i32
    return %arg0, %c0_i32 : i32, i32
  }
  func.func @transform_2(%arg0: i32) -> (i32, i32) {
    %c0_i32 = arith.constant 0 : i32
    %c0_i32_0 = arith.constant 0 : i32
    %c0_i32_1 = arith.constant 0 : i32
    return %c0_i32, %c0_i32_0 : i32, i32
  }
  func.func @transform_3(%arg0: i32) -> (i32, i32) {
    %c0_i32 = arith.constant 0 : i32
    %c0_i32_0 = arith.constant 0 : i32
    %c0_i32_1 = arith.constant 0 : i32
    return %c0_i32, %c0_i32_0 : i32, i32
  }
  func.func @transform_4(%arg0: i32) -> (i32, i32) {
    %c0_i32 = arith.constant 0 : i32
    %c0_i32_0 = arith.constant 0 : i32
    %c0_i32_1 = arith.constant 0 : i32
    return %c0_i32, %c0_i32_0 : i32, i32
  }
  func.func @transform_5(%arg0: i32) -> (i32, i32) {
    %c0_i32 = arith.constant 0 : i32
    %c0_i32_0 = arith.constant 0 : i32
    %c0_i32_1 = arith.constant 0 : i32
    return %c0_i32, %c0_i32_0 : i32, i32
  }
  func.func @transform_6(%arg0: i32) -> (i32, i32) {
    %c0_i32 = arith.constant 0 : i32
    %c0_i32_0 = arith.constant 0 : i32
    %c0_i32_1 = arith.constant 0 : i32
    return %c0_i32, %c0_i32_0 : i32, i32
  }
  func.func @transform_7(%arg0: i32) -> (i32, i32) {
    %c0_i32 = arith.constant 0 : i32
    %c0_i32_0 = arith.constant 0 : i32
    return %arg0, %c0_i32 : i32, i32
  }
}

</mosaic_0001>

<bundles_post_ra>
// kernel: tpu_custom_call.1
= control target key start
LH: loop header
LB: loop body
LE: loop exit
PB: predicated region body
PF: predicated region fallthrough
CT: control target
= control target key end

     0   :  { %v3238_v0 = vmov 0   ;;  %v3239_v56 = vmov 683565275   ;;  %v3240_v58 = vmov 2475754826   ;;  %s5081_s0 = inlined_call_operand.vmem [shape: f32[128,1], index: 0, kind: input, shape index: {}]   ;;  %s5082_s5 = inlined_call_operand.vmem [shape: f32[8,128], index: 5, kind: input, shape index: {}]   ;;  %s5083_s3 = inlined_call_operand.vmem [shape: f32[1,8], index: 3, kind: input, shape index: {}]   ;;  %s5084_s2 = inlined_call_operand.vmem [shape: f32[1,8], index: 2, kind: input, shape index: {}]   ;;  %s5085_s4 = inlined_call_operand.vmem [shape: f32[4,128], index: 4, kind: input, shape index: {}]   ;;  %s5086_s1 = inlined_call_operand.vmem [shape: f32[128,4], index: 1, kind: input, shape index: {}]   ;;  %s5087_s6 = inlined_call_operand.vmem [shape: f32[128,16], index: 6, kind: input, shape index: {}]   ;;  %s5088_s7 = inlined_call_operand.vmem [shape: f32[128,16], index: 7, kind: output, shape index: {}]  }
   0x1   :  { %3091 = vset.pattern.permute.xlu0 %v3238_v0  ;;  %v3288_v1 = vld [vmem:[%s5081_s0] sm:$0xff]  ;;  %v27_v2 = vld [vmem:[%s5081_s0 + $0x8] sm:$0xff]  ;;  %3092 = vset.pattern.permute.xlu1 %v3238_v0  ;;  %v3298_v6 = vld [vmem:[%s5081_s0 + $0x10] sm:$0xff]  ;;  %v3241_v60 = vmov 2131351028  }
   0x2   :  { %v42_v3 = vmax.f32 %v3288_v1, 1e-06  ;;  %v43_v4 = vmax.f32 %v27_v2, 1e-06  ;;  %v268_v5 = vmul.f32 0.16666667, %v3288_v1 }
   0x3   :  { %v3303_v7 = vld [vmem:[%s5081_s0 + $0x20] sm:$0xff]  ;;  %v44_v8 = vmax.f32 %v3298_v6, 1e-06  ;;  %v29_v11 = vld [vmem:[%s5081_s0 + $0x18] sm:$0xff]  ;;  %v3316_v14 = vld [vmem:[%s5081_s0 + $0x30] sm:$0xff] }
   0x4   :  { %3093 = vrcp.f32 %v42_v3  ;;  %v3306_v9 = vmul.f32 1.5707964, %v268_v5  ;;  %v46_v10 = vmax.f32 %v3303_v7, 1e-06  ;;  %v45_v12 = vmax.f32 %v29_v11, 1e-06 }
   0x5   :  { %3095 = vrcp.f32 %v43_v4  ;;  %v48_v15 = vmax.f32 %v3316_v14, 1e-06  ;;  %v3322_v16 = vld [vmem:[%s5081_s0 + $0x40] sm:$0xff]  ;;  %v36_v19 = vld [vmem:[%s5081_s0 + $0x50] sm:$0xff]  ;;  %v31_v21 = vld [vmem:[%s5081_s0 + $0x28] sm:$0xff] }
   0x6   :  { %v300_v13 = vand.u32 2147483647, %v3306_v9  ;;  %3097 = vrcp.f32 %v44_v8  ;;  %v303_v17 = vand.u32 2139095040, %v3306_v9  ;;  %v50_v18 = vmax.f32 %v3322_v16, 1e-06  ;;  %v38_v20 = vld [vmem:[%s5081_s0 + $0x60] sm:$0xff] }
   0x7   :  { %3099 = vrcp.f32 %v46_v10  ;;  %v47_v22 = vmax.f32 %v31_v21, 1e-06  ;;  %v3338_v23 = vld [vmem:[%s5081_s0 + $0x68] sm:$0xff]  ;;  %v52_v26 = vmax.f32 %v36_v19, 1e-06  ;;  %v33_v29 = vld [vmem:[%s5081_s0 + $0x38] sm:$0xff] }
   0x8   :  { %3101 = vrcp.f32 %v45_v12  ;;  %v304_v24 = vshrl.u32 %v303_v17, 23  ;;  %v307_v25 = vand.u32 8388607, %v300_v13  ;;  %v54_v27 = vmax.f32 %v38_v20, 1e-06  ;;  %v3349_v30 = vld [vmem:[%s5081_s0 + $0x70] sm:$0xff] }
   0x9   :  { %v55_v28 = vmax.f32 %v3338_v23, 1e-06  ;;  %3103 = vrcp.f32 %v48_v15  ;;  %v35_v31 = vld [vmem:[%s5081_s0 + $0x48] sm:$0xff]  ;;  %v272_v33 = vmul.f32 0.16666667, %v3303_v7  ;;  %v3359_v37 = vld [vmem:[%s5081_s0 + $0x78] sm:$0xff] }
   0xa   :  { %v2717_v32 = vadd.s32 4294967169, %v304_v24  ;;  %3105 = vrcp.f32 %v50_v18  ;;  %v49_v34 = vmax.f32 %v33_v29, 1e-06  ;;  %v56_v35 = vmax.f32 %v3349_v30, 1e-06  ;;  %v37_v42 = vld [vmem:[%s5081_s0 + $0x58] sm:$0xff] }
   0xb   :  { %v51_v36 = vmax.f32 %v35_v31, 1e-06  ;;  %3107 = vrcp.f32 %v47_v22  ;;  %v308_v38 = vor.u32 8388608, %v307_v25  ;;  %v3361_v40 = vmul.f32 1.5707964, %v272_v33 }
   0xc   :  { %v310_v39 = vadd.s32 1, %v2717_v32  ;;  %3109 = vrcp.f32 %v52_v26  ;;  %v57_v41 = vmax.f32 %v3359_v37, 1e-06  ;;  %v269_v43 = vmul.f32 0.16666667, %v27_v2 }
   0xd   :  { %3111 = vrcp.f32 %v54_v27  ;;  %v53_v45 = vmax.f32 %v37_v42, 1e-06  ;;  %v712_v47 = vand.u32 2147483647, %v3361_v40  ;;  %v715_v48 = vand.u32 2139095040, %v3361_v40 }
   0xe   :  { %vm311_vm0 = vcmp.gt.s32.totalorder %v310_v39, 0  ;;  %3113 = vrcp.f32 %v49_v34  ;;  %v3369_v51 = vshll.u32 %v308_v38, 8  ;;  %v3371_v54 = vmul.f32 1.5707964, %v269_v43 }
   0xf   :  { %v312_v46 = vsel %vm311_vm0, %v310_v39, 0  ;;  %3115 = vrcp.f32 %v51_v36  ;;  %v716_v53 = vshrl.u32 %v715_v48, 23  ;;  %v3242_v63 = vmov 2102212464  }
  0x10   :  { %v314_v50 = vand.u32 31, %v312_v46  ;;  %v313_v52 = vshrl.u32 %v312_v46, 5  ;;  %3117 = vrcp.f32 %v53_v45  ;;  %v3243_v2 = vmov 920167782  }
  0x11   :  { %v3094_v44 = vpop.eup %3093  ;;  %v719_v4 = vand.u32 8388607, %v712_v47  ;;  %v3244_v18 = vmov 1326507024   ;;  %v2733_v24 = vadd.s32 4294967169, %v716_v53  ;;  %3119 = vrcp.f32 %v55_v28 }
  0x12   :  { %94 = vperm.xlu0 %3091, %v3094_v44   ;;  %v3096_v49 = vpop.eup %3095  ;;  %v315_v55 = vsub.s32 32, %v314_v50  ;;  %v317_v57 = vshll.u32 %v3239_v56, %v314_v50  ;;  %v320_v59 = vshll.u32 %v3240_v58, %v314_v50  ;;  %v323_v61 = vshll.u32 %v3241_v60, %v314_v50 }
  0x13   :  { %v3098_v62 = vpop.eup %3097  ;;  %v326_v0 = vshll.u32 %v3242_v63, %v314_v50  ;;  %v329_v3 = vshll.u32 %v3243_v2, %v314_v50  ;;  %vm332_vm1 = vcmp.lt.s32.totalorder %v313_v52, 1  ;;  %vm335_vm2 = vcmp.lt.s32.totalorder %v313_v52, 4 }
  0x14   :  { %v3100_v5 = vpop.eup %3099  ;;  %104 = vperm.xlu1 %3092, %v3098_v62   ;;  %v316_v8 = vshrl.u32 %v3239_v56, %v315_v55  ;;  %v318_v10 = vshrl.u32 %v3240_v58, %v315_v55  ;;  %v321_v11 = vshrl.u32 %v3241_v60, %v315_v55  ;;  %v324_v12 = vshrl.u32 %v3242_v63, %v315_v55 }
  0x15   :  { %v3102_v15 = vpop.eup %3101  ;;  %v327_v17 = vshrl.u32 %v3243_v2, %v315_v55  ;;  %v330_v19 = vshrl.u32 %v3244_v18, %v315_v55  ;;  %vm333_vm3 = vcmp.lt.s32.totalorder %v313_v52, 2  ;;  %vm334_vm4 = vcmp.lt.s32.totalorder %v313_v52, 3 }
  0x16   :  { %99 = vperm.xlu0 %3091, %v3096_v49   ;;  %v319_v20 = vor.u32 %v318_v10, %v317_v57  ;;  %v322_v21 = vor.u32 %v321_v11, %v320_v59  ;;  %v325_v22 = vor.u32 %v324_v12, %v323_v61  ;;  %v3104_v25 = vpop.eup %3103  ;;  %v722_v43 = vadd.s32 1, %v2733_v24 }
  0x17   :  { %v328_v26 = vor.u32 %v327_v17, %v326_v0  ;;  %v331_v27 = vor.u32 %v330_v19, %v329_v3  ;;  %v3106_v29 = vpop.eup %3105  ;;  %v720_v48 = vor.u32 8388608, %v719_v4  ;;  %3121 = vrcp.f32 %v56_v35 }
  0x18   :  { %109 = vperm.xlu1 %3092, %v3102_v15   ;;  %v336_v31 = vsel %vm332_vm1, %v316_v8, %v319_v20  ;;  %v337_v32 = vsel %vm335_vm2, %v325_v22, 2102212464  ;;  %v340_v33 = vsel %vm332_vm1, %v319_v20, %v322_v21  ;;  %v344_v34 = vsel %vm332_vm1, %v322_v21, %v325_v22  ;;  %v3108_v36 = vpop.eup %3107 }
  0x19   :  { %v338_v38 = vsel %vm334_vm4, %v322_v21, %v337_v32  ;;  %v341_v39 = vsel %vm335_vm2, %v328_v26, 920167782  ;;  %v345_v42 = vsel %vm335_vm2, %v331_v27, 1326507024  ;;  %v3110_v44 = vpop.eup %3109  ;;  %vm723_vm5 = vcmp.gt.s32.totalorder %v722_v43, 0 }
  0x1a   :  { %114 = vperm.xlu0 %3091, %v3100_v5   ;;  %v342_v45 = vsel %vm334_vm4, %v325_v22, %v341_v39  ;;  %v346_v46 = vsel %vm334_vm4, %v328_v26, %v345_v42  ;;  %v3112_v49 = vpop.eup %3111  ;;  %v339_v50 = vsel %vm333_vm3, %v336_v31, %v338_v38  ;;  %v724_v62 = vsel %vm723_vm5, %v722_v43, 0 }
  0x1b   :  { %v343_v53 = vsel %vm333_vm3, %v340_v33, %v342_v45  ;;  %v347_v55 = vsel %vm333_vm3, %v344_v34, %v346_v46  ;;  %v3114_v61 = vpop.eup %3113  ;;  %v406_v0 = vand.u32 2139095040, %v3371_v54  ;;  %3123 = vrcp.f32 %v57_v41 }
  0x1c   :  { %119 = vperm.xlu1 %3092, %v3108_v36   ;;  %v3398_v57 = vmul.u32.u64.low %v3369_v51, %v347_v55  ;;  %v3399_v59 = vmul.u32.u64.high %v3369_v51, %v347_v55, %v3398_v57  ;;  %v3402_v23 = vmul.u32.u64.low %v3369_v51, %v343_v53  ;;  %v3403_v28 = vmul.u32.u64.high %v3369_v51, %v343_v53, %v3402_v23  ;;  %v3116_v52 = vpop.eup %3115 }
  0x1d   :  { %v726_v3 = vand.u32 31, %v724_v62  ;;  %v355_v4 = vmul.u32 %v3369_v51, %v339_v50  ;;  %v725_v5 = vshrl.u32 %v724_v62, 5  ;;  %v3412_v8 = vshll.u32 %v720_v48, 8  ;;  %v3118_v11 = vpop.eup %3117 }
  0x1e   :  { %124 = vperm.xlu0 %3091, %v3104_v25   ;;  %v403_v10 = vand.u32 2147483647, %v3371_v54  ;;  %vm357_vm6 = vc.u32 %v3399_v59, %v3402_v23  ;;  %v358_v30 = vadd.s32 1, %v3403_v28  ;;  %v407_v12 = vshrl.u32 %v406_v0, 23  ;;  %v3120_v39 = vpop.eup %3119 }
  0x1f   :  { %v727_v35 = vsub.s32 32, %v726_v3  ;;  %v729_v37 = vshll.u32 %v3239_v56, %v726_v3  ;;  %v732_v41 = vshll.u32 %v3240_v58, %v726_v3  ;;  %v735_v51 = vshll.u32 %v3241_v60, %v726_v3 }
  0x20   :  { %129 = vperm.xlu1 %3092, %v3114_v61   ;;  %v738_v15 = vshll.u32 %v3242_v63, %v726_v3  ;;  %v359_v17 = vsel %vm357_vm6, %v358_v30, %v3403_v28  ;;  %v741_v26 = vshll.u32 %v3243_v2, %v726_v3  ;;  %vm744_vm7 = vcmp.lt.s32.totalorder %v725_v5, 1 }
  0x21   :  { %v728_v19 = vshrl.u32 %v3239_v56, %v727_v35  ;;  %v730_v20 = vshrl.u32 %v3240_v58, %v727_v35  ;;  %v733_v21 = vshrl.u32 %v3241_v60, %v727_v35  ;;  %v360_v22 = vadd.s32 %v359_v17, %v355_v4 }
  0x22   :  { %134 = vperm.xlu0 %3091, %v3106_v29   ;;  %v736_v24 = vshrl.u32 %v3242_v63, %v727_v35  ;;  %v739_v25 = vshrl.u32 %v3243_v2, %v727_v35  ;;  %v742_v31 = vshrl.u32 %v3244_v18, %v727_v35  ;;  %vm745_vm8 = vcmp.lt.s32.totalorder %v725_v5, 2 }
  0x23   :  { %v731_v27 = vor.u32 %v730_v20, %v729_v37  ;;  %v734_v29 = vor.u32 %v733_v21, %v732_v41  ;;  %v361_v32 = vadd.s32 536870912, %v360_v22  ;;  %vm746_vm9 = vcmp.lt.s32.totalorder %v725_v5, 3 }
  0x24   :  { %139 = vperm.xlu1 %3092, %v3116_v52   ;;  %v737_v33 = vor.u32 %v736_v24, %v735_v51  ;;  %v740_v34 = vor.u32 %v739_v25, %v738_v15  ;;  %v743_v36 = vor.u32 %v742_v31, %v741_v26  ;;  %vm747_vm10 = vcmp.lt.s32.totalorder %v725_v5, 4  ;;  %v3122_v61 = vpop.eup %3121 }
  0x25   :  { %v748_v38 = vsel %vm744_vm7, %v728_v19, %v731_v27  ;;  %v362_v42 = vshrl.u32 %v361_v32, 30  ;;  %v274_v28 = vmul.f32 0.16666667, %v3316_v14  ;;  %v2721_v30 = vadd.s32 4294967169, %v407_v12 }
  0x26   :  { %144 = vperm.xlu0 %3091, %v3110_v44   ;;  %v749_v43 = vsel %vm747_vm10, %v737_v33, 2102212464  ;;  %v752_v44 = vsel %vm744_vm7, %v731_v27, %v734_v29  ;;  %v753_v45 = vsel %vm747_vm10, %v740_v34, 920167782  ;;  %v756_v50 = vsel %vm744_vm7, %v734_v29, %v737_v33 }
  0x27   :  { %v750_v46 = vsel %vm746_vm9, %v734_v29, %v749_v43  ;;  %v754_v48 = vsel %vm746_vm9, %v737_v33, %v753_v45  ;;  %v757_v53 = vsel %vm747_vm10, %v743_v36, 1326507024  ;;  %v363_v55 = vshll.u32 %v362_v42, 30 }
  0x28   :  { %149 = vperm.xlu1 %3092, %v3118_v11   ;;  %v755_v57 = vsel %vm745_vm8, %v752_v44, %v754_v48  ;;  %v3124_v52 = vpop.eup %3123  ;;  %v751_v4 = vsel %vm745_vm8, %v748_v38, %v750_v46  ;;  %v386_v35 = vsub.s32 4, %v362_v42  ;;  %v410_v14 = vand.u32 8388607, %v403_v10 }
  0x29   :  { %v3439_v62 = vmul.u32.u64.low %v3412_v8, %v755_v57  ;;  %v3440_v0 = vmul.u32.u64.high %v3412_v8, %v755_v57, %v3439_v62  ;;  %v364_v3 = vsub.s32 %v360_v22, %v363_v55  ;;  %v413_v15 = vadd.s32 1, %v2721_v30 }
  0x2a   :  { %154 = vperm.xlu0 %3091, %v3112_v49   ;;  %v758_v49 = vsel %vm746_vm9, %v740_v34, %v757_v53  ;;  %v3450_v17 = vmul.f32 1.5707964, %v274_v28  ;;  %v767_v19 = vmul.u32 %v3412_v8, %v751_v4  ;;  %vm302_vm11 = vcmp.lt.s32.totalorder %v3306_v9, 0 }
  0x2b   :  { %v759_v11 = vsel %vm745_vm8, %v756_v50, %v758_v49  ;;  %v366_v51 = vsub.s32 0, %v364_v3  ;;  %v770_v20 = vadd.s32 1, %v3440_v0  ;;  %v3457_v12 = vsel %vm302_vm11, %v386_v35, %v362_v42 }
  0x2c   :  { %v3445_v37 = vmul.u32.u64.low %v3412_v8, %v759_v11  ;;  %v3446_v41 = vmul.u32.u64.high %v3412_v8, %v759_v11, %v3445_v37  ;;  %v411_v21 = vor.u32 8388608, %v410_v14  ;;  %vm414_vm13 = vcmp.gt.s32.totalorder %v413_v15, 0 }
  0x2d   :  { %v2718_v5 = vmin.u32 %v366_v51, %v364_v3  ;;  %v415_v25 = vsel %vm414_vm13, %v413_v15, 0  ;;  %v921_v8 = vand.u32 2139095040, %v3450_v17  ;;  %vm3464_vm14 = vcmp.le.f32.partialorder %v300_v13, 0.7853982 }
  0x2e   :  { %159 = vperm.xlu0 %3091, %v3120_v39   ;;  %vm769_vm12 = vc.u32 %v3446_v41, %v3439_v62  ;;  %v417_v29 = vand.u32 31, %v415_v25  ;;  %v356_v31 = vadd.s32 %v3402_v23, %v3399_v59  ;;  %v389_v33 = vsel %vm3464_vm14, 0, %v3457_v12 }
  0x2f   :  { %v368_v22 = vclz %v2718_v5  ;;  %v771_v24 = vsel %vm769_vm12, %v770_v20, %v3440_v0  ;;  %v3474_v34 = vmul.f32 0.16666667, %v3298_v6  ;;  %v3476_v13 = vshll.u32 %v411_v21, 8 }
  0x30   :  { %v772_v27 = vadd.s32 %v771_v24, %v767_v19  ;;  %v418_v38 = vsub.s32 32, %v417_v29  ;;  %v918_v39 = vand.u32 2147483647, %v3450_v17  ;;  %v3479_v42 = vshrl.u32 %v415_v25, 5 }
  0x31   :  { %v2719_v32 = vadd.s32 4294967294, %v368_v22  ;;  %v420_v43 = vshll.u32 %v3239_v56, %v417_v29  ;;  %v922_v59 = vshrl.u32 %v921_v8, 23  ;;  %v423_v46 = vshll.u32 %v3240_v58, %v417_v29 }
  0x32   :  { %164 = vperm.xlu0 %3091, %v3122_v61   ;;  %v773_v36 = vadd.s32 536870912, %v772_v27  ;;  %v421_v45 = vshrl.u32 %v3240_v58, %v418_v38  ;;  %v424_v53 = vshrl.u32 %v3241_v60, %v418_v38  ;;  %v426_v57 = vshll.u32 %v3241_v60, %v417_v29 }
  0x33   :  { %vm2720_vm15 = vcmp.lt.s32.totalorder %v2719_v32, 0  ;;  %v427_v28 = vshrl.u32 %v3242_v63, %v418_v38  ;;  %v429_v61 = vshll.u32 %v3242_v63, %v417_v29  ;;  %v432_v4 = vshll.u32 %v3243_v2, %v417_v29 }
  0x34   :  { %v371_v23 = vsel %vm2720_vm15, 0, %v2719_v32  ;;  %v774_v44 = vshrl.u32 %v773_v36, 30  ;;  %v768_v11 = vadd.s32 %v3439_v62, %v3446_v41  ;;  %v433_v35 = vshrl.u32 %v3244_v18, %v418_v38 }
  0x35   :  { %v372_v6 = vsub.s32 32, %v371_v23  ;;  %v373_v48 = vshll.u32 %v364_v3, %v371_v23  ;;  %v376_v50 = vsub.s32 4294967266, %v371_v23  ;;  %v419_v3 = vshrl.u32 %v3239_v56, %v418_v38 }
  0x36   :  { %169 = vperm.xlu0 %3091, %v3124_v52   ;;  %v775_v55 = vshll.u32 %v774_v44, 30  ;;  %v430_v52 = vshrl.u32 %v3243_v2, %v418_v38  ;;  %v422_v51 = vor.u32 %v421_v45, %v420_v43  ;;  %v425_v15 = vor.u32 %v424_v53, %v423_v46 }
  0x37   :  { %v374_v49 = vshrl.u32 %v356_v31, %v372_v6  ;;  %v377_v0 = vadd.s32 127, %v376_v50  ;;  %vm714_vm0 = vcmp.lt.s32.totalorder %v3361_v40, 0  ;;  %v428_v20 = vor.u32 %v427_v28, %v426_v57 }
  0x38   :  { %v3491_v30 = vsub.s32 %v772_v27, %v775_v55  ;;  %v431_v5 = vor.u32 %v430_v52, %v429_v61  ;;  %vm435_vm1 = vcmp.lt.s32.totalorder %v3479_v42, 1  ;;  %v434_v41 = vor.u32 %v433_v35, %v432_v4 }
  0x39   :  { %v375_v37 = vor.u32 %v374_v49, %v373_v48  ;;  %v378_v14 = vshll.u32 %v377_v0, 23  ;;  %v2741_v22 = vadd.s32 4294967169, %v922_v59  ;;  %v798_v25 = vsub.s32 4, %v774_v44 }
  0x3a   :  { %v778_v19 = vsub.s32 0, %v3491_v30  ;;  %vm436_vm2 = vcmp.lt.s32.totalorder %v3479_v42, 2  ;;  %vm437_vm3 = vcmp.lt.s32.totalorder %v3479_v42, 3  ;;  %vm438_vm4 = vcmp.lt.s32.totalorder %v3479_v42, 4 }
  0x3b   :  { %v379_v21 = vor.u32 4788187, %v378_v14  ;;  %v382_v62 = vcvt.s32.f32 %v375_v37  ;;  %v439_v27 = vsel %vm435_vm1, %v419_v3, %v422_v51  ;;  %v443_v29 = vsel %vm435_vm1, %v422_v51, %v425_v15 }
  0x3c   :  { %v2734_v24 = vmin.u32 %v778_v19, %v3491_v30  ;;  %v440_v32 = vsel %vm438_vm4, %v428_v20, 2102212464  ;;  %v444_v36 = vsel %vm438_vm4, %v431_v5, 920167782  ;;  %v447_v38 = vsel %vm435_vm1, %v425_v15, %v428_v20 }
  0x3d   :  { %v380_v8 = vand.u32 2147483647, %v379_v21  ;;  %vm3510_vm5 = vcmp.le.f32.partialorder %v712_v47, 0.7853982  ;;  %v441_v23 = vsel %vm437_vm3, %v425_v15, %v440_v32  ;;  %v445_v45 = vsel %vm437_vm3, %v428_v20, %v444_v36 }
  0x3e   :  { %v780_v31 = vclz %v2734_v24  ;;  %v448_v46 = vsel %vm438_vm4, %v434_v41, 1326507024  ;;  %v446_v48 = vsel %vm436_vm2, %v443_v29, %v445_v45  ;;  %v925_v47 = vand.u32 8388607, %v918_v39 }
  0x3f   :  { %v383_v43 = vmul.f32 %v382_v62, %v380_v8  ;;  %v449_v50 = vsel %vm437_vm3, %v431_v5, %v448_v46  ;;  %v3527_v57 = vmul.u32.u64.low %v3476_v13, %v446_v48  ;;  %v3528_v28 = vmul.u32.u64.high %v3476_v13, %v446_v48, %v3527_v57 }
  0x40   :  { %v2735_v6 = vadd.s32 4294967294, %v780_v31  ;;  %v450_v55 = vsel %vm436_vm2, %v447_v38, %v449_v50  ;;  %v442_v61 = vsel %vm436_vm2, %v439_v27, %v441_v23  ;;  %v799_v3 = vsel %vm714_vm0, %v798_v25, %v774_v44 }
  0x41   :  { %v384_v53 = vxor.u32 2147483648, %v383_v43  ;;  %v3533_v49 = vmul.u32.u64.low %v3476_v13, %v450_v55  ;;  %v3534_v0 = vmul.u32.u64.high %v3476_v13, %v450_v55, %v3533_v49  ;;  %v928_v35 = vadd.s32 1, %v2741_v22 }
  0x42   :  { %vm2736_vm6 = vcmp.lt.s32.totalorder %v2735_v6, 0  ;;  %v458_v15 = vmul.u32 %v3476_v13, %v442_v61  ;;  %v461_v19 = vadd.s32 1, %v3528_v28  ;;  %v3550_v44 = vand.u32 3, %v389_v33 }
  0x43   :  { %v385_v52 = vsel %vm302_vm11, %v384_v53, %v383_v43  ;;  %v783_v4 = vsel %vm2736_vm6, 0, %v2735_v6  ;;  %vm929_vm7 = vcmp.gt.s32.totalorder %v928_v35, 0  ;;  %vm460_vm8 = vc.u32 %v3534_v0, %v3527_v57 }
  0x44   :  { %v388_v37 = vsel %vm3464_vm14, %v3306_v9, %v385_v52  ;;  %v784_v14 = vsub.s32 32, %v783_v4  ;;  %v785_v42 = vshll.u32 %v3491_v30, %v783_v4  ;;  %v788_v51 = vsub.s32 4294967266, %v783_v4 }
  0x45   :  { %3125 = vcosq.f32 %v388_v37  ;;  %v926_v21 = vor.u32 8388608, %v925_v47  ;;  %v930_v30 = vsel %vm929_vm7, %v928_v35, 0  ;;  %v3554_v62 = vmul.f32 1.5707964, %v3474_v34 }
  0x46   :  { %3127 = vsinq.f32 %v388_v37  ;;  %v786_v20 = vshrl.u32 %v768_v11, %v784_v14  ;;  %v789_v5 = vadd.s32 127, %v788_v51  ;;  %v801_v22 = vsel %vm3510_vm5, 0, %v799_v3 }
  0x47   :  { %v462_v26 = vsel %vm460_vm8, %v461_v19, %v3528_v28  ;;  %v932_v12 = vand.u32 31, %v930_v30  ;;  %vm398_vm9 = vcmp.eq.s32.totalorder %v3550_v44, 2  ;;  %v506_v25 = vand.u32 2147483647, %v3554_v62 }
  0x48   :  { %v787_v13 = vor.u32 %v786_v20, %v785_v42  ;;  %v790_v41 = vshll.u32 %v789_v5, 23  ;;  %v463_v24 = vadd.s32 %v462_v26, %v458_v15  ;;  %vm395_vm10 = vcmp.eq.s32.totalorder %v3550_v44, 0 }
  0x49   :  { %v3562_v8 = vand.u32 3, %v801_v22  ;;  %v933_v27 = vsub.s32 32, %v932_v12  ;;  %v3564_v29 = vshll.u32 %v926_v21, 8  ;;  %vm394_vm11 = vcmp.lt.s32.totalorder %v3550_v44, 2 }
  0x4a   :  { %v791_v33 = vor.u32 4788187, %v790_v41  ;;  %v794_v11 = vcvt.s32.f32 %v787_v13  ;;  %v464_v34 = vadd.s32 536870912, %v463_v24  ;;  %v931_v32 = vshrl.u32 %v930_v30, 5 }
  0x4b   :  { %v935_v36 = vshll.u32 %v3239_v56, %v932_v12  ;;  %v941_v38 = vshll.u32 %v3241_v60, %v932_v12  ;;  %vm392_vm12 = vweird.f32 %v3306_v9  ;;  %v936_v23 = vshrl.u32 %v3240_v58, %v933_v27 }
  0x4c   :  { %v792_v31 = vand.u32 2147483647, %v791_v33  ;;  %v3570_v43 = vshrl.u32 %v464_v34, 30  ;;  %v938_v45 = vshll.u32 %v3240_v58, %v932_v12  ;;  %v944_v46 = vshll.u32 %v3242_v63, %v932_v12 }
  0x4d   :  { %v939_v48 = vshrl.u32 %v3241_v60, %v933_v27  ;;  %v942_v50 = vshrl.u32 %v3242_v63, %v933_v27  ;;  %v945_v47 = vshrl.u32 %v3243_v2, %v933_v27  ;;  %v3579_v53 = vadd.s32 %v3527_v57, %v3534_v0 }
  0x4e   :  { %v795_v6 = vmul.f32 %v794_v11, %v792_v31  ;;  %v466_v55 = vshll.u32 %v3570_v43, 30  ;;  %v947_v28 = vshll.u32 %v3243_v2, %v932_v12  ;;  %v948_v61 = vshrl.u32 %v3244_v18, %v933_v27 }
  0x4f   :  { %vm251_vm13 = vcmp.lt.f32.partialorder %v3288_v1, 6.0  ;;  %v934_v52 = vshrl.u32 %v3239_v56, %v933_v27  ;;  %v943_v4 = vor.u32 %v942_v50, %v941_v38  ;;  %v509_v3 = vand.u32 2139095040, %v3554_v62 }
  0x50   :  { %v796_v49 = vxor.u32 2147483648, %v795_v6  ;;  %v3587_v35 = vsub.s32 %v463_v24, %v466_v55  ;;  %v937_v37 = vor.u32 %v936_v23, %v935_v36  ;;  %vm950_vm14 = vcmp.lt.s32.totalorder %v931_v32, 1 }
  0x51   :  { %vm953_vm15 = vcmp.lt.s32.totalorder %v931_v32, 4  ;;  %v940_v14 = vor.u32 %v939_v48, %v938_v45  ;;  %v946_v42 = vor.u32 %v945_v47, %v944_v46  ;;  %v949_v21 = vor.u32 %v948_v61, %v947_v28 }
  0x52   :  { %v3126_v57 = vpop.eup %3125  ;;  %v797_v0 = vsel %vm714_vm0, %v796_v49, %v795_v6  ;;  %v955_v51 = vsel %vm953_vm15, %v943_v4, 2102212464  ;;  %v469_v5 = vsub.s32 0, %v3587_v35  ;;  %vm952_vm1 = vcmp.lt.s32.totalorder %v931_v32, 3 }
  0x53   :  { %v3128_v15 = vpop.eup %3127  ;;  %v399_v19 = vxor.u32 2147483648, %v3126_v57  ;;  %v800_v20 = vsel %vm3510_vm5, %v3361_v40, %v797_v0  ;;  %v954_v13 = vsel %vm950_vm14, %v934_v52, %v937_v37  ;;  %v956_v26 = vsel %vm952_vm1, %v940_v14, %v955_v51 }
  0x54   :  { %v396_v30 = vxor.u32 2147483648, %v3128_v15  ;;  %3129 = vcosq.f32 %v800_v20  ;;  %v2722_v22 = vmin.u32 %v469_v5, %v3587_v35  ;;  %vm951_vm0 = vcmp.lt.s32.totalorder %v931_v32, 2 }
  0x55   :  { %v400_v41 = vsel %vm398_vm9, %v399_v19, %v3128_v15  ;;  %3131 = vsinq.f32 %v800_v20  ;;  %v958_v24 = vsel %vm950_vm14, %v937_v37, %v940_v14  ;;  %v510_v12 = vshrl.u32 %v509_v3, 23 }
  0x56   :  { %v397_v59 = vsel %vm395_vm10, %v3126_v57, %v396_v30  ;;  %v471_v11 = vclz %v2722_v22  ;;  %v959_v34 = vsel %vm953_vm15, %v946_v42, 920167782  ;;  %v962_v27 = vsel %vm950_vm14, %v940_v14, %v943_v4 }
  0x57   :  { %v401_v33 = vsel %vm394_vm11, %v397_v59, %v400_v41  ;;  %v957_v36 = vsel %vm951_vm0, %v954_v13, %v956_v26  ;;  %v960_v38 = vsel %vm952_vm1, %v943_v4, %v959_v34  ;;  %v963_v23 = vsel %vm953_vm15, %v949_v21, 1326507024 }
  0x58   :  { %v402_v31 = vsel %vm392_vm12, nan, %v401_v33  ;;  %v2723_v46 = vadd.s32 4294967294, %v471_v11  ;;  %v961_v6 = vsel %vm951_vm0, %v958_v24, %v960_v38  ;;  %v964_v48 = vsel %vm952_vm1, %v946_v42, %v963_v23 }
  0x59   :  { %v1948_v45 = vmul.f32 %v402_v31, %v402_v31  ;;  %v965_v44 = vsel %vm951_vm0, %v962_v27, %v964_v48  ;;  %v3614_v50 = vmul.u32.u64.low %v3564_v29, %v961_v6  ;;  %v3615_v47 = vmul.u32.u64.high %v3564_v29, %v961_v6, %v3614_v50 }
  0x5a   :  { %v2725_v55 = vadd.s32 4294967169, %v510_v12  ;;  %vm2724_vm2 = vcmp.lt.s32.totalorder %v2723_v46, 0  ;;  %v3621_v28 = vmul.u32.u64.low %v3564_v29, %v965_v44  ;;  %v3622_v61 = vmul.u32.u64.high %v3564_v29, %v965_v44, %v3621_v28 }
  0x5b   :  { %v1964_v9 = vsel %vm251_vm13, %v1948_v45, 0.0  ;;  %v474_v49 = vsel %vm2724_vm2, 0, %v2723_v46  ;;  %v489_v32 = vsub.s32 4, %v3570_v43  ;;  %v513_v52 = vand.u32 8388607, %v506_v25 }
  0x5c   :  { %2014 = vperm.xlu1 %3092, %v1964_v9   ;;  %v516_v4 = vadd.s32 1, %v2725_v55  ;;  %v475_v3 = vsub.s32 32, %v474_v49  ;;  %v476_v37 = vshll.u32 %v3587_v35, %v474_v49  ;;  %v479_v57 = vsub.s32 4294967266, %v474_v49 }
  0x5d   :  { %v973_v1 = vmul.u32 %v3564_v29, %v957_v36  ;;  %vm804_vm3 = vweird.f32 %v3361_v40  ;;  %vm405_vm4 = vcmp.lt.s32.totalorder %v3371_v54, 0  ;;  %v976_v0 = vadd.s32 1, %v3615_v47 }
  0x5e   :  { %vm517_vm5 = vcmp.gt.s32.totalorder %v516_v4, 0  ;;  %vm255_vm6 = vcmp.lt.f32.partialorder %v3303_v7, 6.0  ;;  %vm3635_vm7 = vcmp.le.f32.partialorder %v403_v10, 0.7853982  ;;  %v477_v35 = vshrl.u32 %v3579_v53, %v475_v3 }
  0x5f   :  { %v480_v42 = vadd.s32 127, %v479_v57  ;;  %vm975_vm8 = vc.u32 %v3622_v61, %v3614_v50  ;;  %vm810_vm9 = vcmp.eq.s32.totalorder %v3562_v8, 2  ;;  %v3646_v29 = vsel %vm405_vm4, %v489_v32, %v3570_v43 }
  0x60   :  { %v977_v51 = vsel %vm975_vm8, %v976_v0, %v3615_v47  ;;  %v518_v15 = vsel %vm517_vm5, %v516_v4, 0  ;;  %v478_v19 = vor.u32 %v477_v35, %v476_v37  ;;  %v514_v21 = vor.u32 8388608, %v513_v52 }
  0x61   :  { %v3130_v10 = vpop.eup %3129  ;;  %v481_v20 = vshll.u32 %v480_v42, 23  ;;  %v978_v5 = vadd.s32 %v977_v51, %v973_v1  ;;  %vm806_vm10 = vcmp.lt.s32.totalorder %v3562_v8, 2  ;;  %vm807_vm11 = vcmp.eq.s32.totalorder %v3562_v8, 0 }
  0x62   :  { %v3132_v53 = vpop.eup %3131  ;;  %v811_v30 = vxor.u32 2147483648, %v3130_v10  ;;  %v520_v13 = vand.u32 31, %v518_v15  ;;  %v485_v26 = vcvt.s32.f32 %v478_v19  ;;  %v492_v24 = vsel %vm3635_vm7, 0, %v3646_v29 }
  0x63   :  { %v808_v41 = vxor.u32 2147483648, %v3132_v53  ;;  %v482_v22 = vor.u32 4788187, %v481_v20  ;;  %v979_v43 = vadd.s32 536870912, %v978_v5  ;;  %v276_v33 = vmul.f32 0.16666667, %v3322_v16 }
  0x64   :  { %v812_v59 = vsel %vm810_vm9, %v811_v30, %v3132_v53  ;;  %v521_v12 = vsub.s32 32, %v520_v13  ;;  %v3659_v31 = vshll.u32 %v514_v21, 8  ;;  %v523_v38 = vshll.u32 %v3239_v56, %v520_v13 }
  0x65   :  { %v809_v11 = vsel %vm807_vm11, %v3130_v10, %v808_v41  ;;  %v483_v34 = vand.u32 2147483647, %v482_v22  ;;  %v3657_v27 = vshrl.u32 %v979_v43, 30  ;;  %v526_v45 = vshll.u32 %v3240_v58, %v520_v13 }
  0x66   :  { %v813_v36 = vsel %vm806_vm10, %v809_v11, %v812_v59  ;;  %v524_v23 = vshrl.u32 %v3240_v58, %v521_v12  ;;  %v527_v48 = vshrl.u32 %v3241_v60, %v521_v12  ;;  %v529_v47 = vshll.u32 %v3241_v60, %v520_v13 }
  0x67   :  { %v814_v46 = vsel %vm804_vm3, nan, %v813_v36  ;;  %v486_v6 = vmul.f32 %v485_v26, %v483_v34  ;;  %v981_v16 = vshll.u32 %v3657_v27, 30  ;;  %v530_v8 = vshrl.u32 %v3242_v63, %v521_v12 }
  0x68   :  { %v1952_v44 = vmul.f32 %v814_v46, %v814_v46  ;;  %v3672_v55 = vmul.f32 1.5707964, %v276_v33  ;;  %v519_v49 = vshrl.u32 %v518_v15, 5  ;;  %v532_v32 = vshll.u32 %v3242_v63, %v520_v13 }
  0x69   :  { %v487_v9 = vxor.u32 2147483648, %v486_v6  ;;  %v3674_v28 = vsub.s32 %v978_v5, %v981_v16  ;;  %v522_v52 = vshrl.u32 %v3239_v56, %v521_v12  ;;  %v525_v4 = vor.u32 %v524_v23, %v523_v38 }
  0x6a   :  { %v1968_v40 = vsel %vm255_vm6, %v1952_v44, 0.0  ;;  %v533_v3 = vshrl.u32 %v3243_v2, %v521_v12  ;;  %v528_v1 = vor.u32 %v527_v48, %v526_v45  ;;  %v535_v0 = vshll.u32 %v3243_v2, %v520_v13 }
  0x6b   :  { %2034 = vperm.xlu0 %3091, %v1968_v40   ;;  %v488_v37 = vsel %vm405_vm4, %v487_v9, %v486_v6  ;;  %v984_v57 = vsub.s32 0, %v3674_v28  ;;  %v531_v7 = vor.u32 %v530_v8, %v529_v47  ;;  %v536_v51 = vshrl.u32 %v3244_v18, %v521_v12 }
  0x6c   :  { %v491_v35 = vsel %vm3635_vm7, %v3371_v54, %v488_v37  ;;  %v534_v42 = vor.u32 %v533_v3, %v532_v32  ;;  %v974_v15 = vadd.s32 %v3614_v50, %v3622_v61  ;;  %vm538_vm12 = vcmp.lt.s32.totalorder %v519_v49, 1 }
  0x6d   :  { %3133 = vcosq.f32 %v491_v35  ;;  %v2742_v10 = vmin.u32 %v984_v57, %v3674_v28  ;;  %v537_v19 = vor.u32 %v536_v51, %v535_v0  ;;  %vm539_vm13 = vcmp.lt.s32.totalorder %v519_v49, 2 }
  0x6e   :  { %3135 = vsinq.f32 %v491_v35  ;;  %v1127_v20 = vand.u32 2139095040, %v3672_v55  ;;  %vm540_vm14 = vcmp.lt.s32.totalorder %v519_v49, 3  ;;  %vm541_vm15 = vcmp.lt.s32.totalorder %v519_v49, 4 }
  0x6f   :  { %v986_v5 = vclz %v2742_v10  ;;  %v542_v21 = vsel %vm538_vm12, %v522_v52, %v525_v4  ;;  %v543_v53 = vsel %vm541_vm15, %v531_v7, 2102212464  ;;  %v546_v30 = vsel %vm538_vm12, %v525_v4, %v528_v1 }
  0x70   :  { %v547_v13 = vsel %vm541_vm15, %v534_v42, 920167782  ;;  %v550_v41 = vsel %vm538_vm12, %v528_v1, %v531_v7  ;;  %v544_v26 = vsel %vm540_vm14, %v528_v1, %v543_v53  ;;  %v551_v50 = vsel %vm541_vm15, %v537_v19, 1326507024 }
  0x71   :  { %v2743_v22 = vadd.s32 4294967294, %v986_v5  ;;  %v548_v43 = vsel %vm540_vm14, %v531_v7, %v547_v13  ;;  %v545_v61 = vsel %vm539_vm13, %v542_v21, %v544_v26  ;;  %v552_v12 = vsel %vm540_vm14, %v534_v42, %v551_v50 }
  0x72   :  { %v549_v59 = vsel %vm539_vm13, %v546_v30, %v548_v43  ;;  %v1128_v33 = vshrl.u32 %v1127_v20, 23  ;;  %v553_v11 = vsel %vm539_vm13, %v550_v41, %v552_v12  ;;  %v496_v38 = vand.u32 3, %v492_v24  ;;  %v3223_v24 = vld [vmem:[%s5081_s0 + $0x8] sm:$0xff] }
  0x73   :  { %vm2744_vm1 = vcmp.lt.s32.totalorder %v2743_v22, 0  ;;  %v3697_v34 = vmul.u32.u64.low %v3659_v31, %v549_v59  ;;  %v3698_v36 = vmul.u32.u64.high %v3659_v31, %v549_v59, %v3697_v34  ;;  %v1004_v47 = vsub.s32 4, %v3657_v27 }
  0x74   :  { %v989_v23 = vsel %vm2744_vm1, 0, %v2743_v22  ;;  %v3706_v45 = vmul.u32.u64.low %v3659_v31, %v553_v11  ;;  %v3707_v46 = vmul.u32.u64.high %v3659_v31, %v553_v11, %v3706_v45  ;;  %v2749_v44 = vadd.s32 4294967169, %v1128_v33 }
  0x75   :  { %v990_v6 = vsub.s32 32, %v989_v23  ;;  %v991_v16 = vshll.u32 %v3674_v28, %v989_v23  ;;  %v994_v48 = vsub.s32 4294967266, %v989_v23  ;;  %v561_v8 = vmul.u32 %v3659_v31, %v545_v61 }
  0x76   :  { %v564_v14 = vadd.s32 1, %v3698_v36  ;;  %v1134_v29 = vadd.s32 1, %v2749_v44  ;;  %vm252_vm0 = vcmp.lt.f32.partialorder %v3223_v24, 6.0  ;;  %vm501_vm2 = vcmp.eq.s32.totalorder %v496_v38, 2 }
  0x77   :  { %v992_v9 = vshrl.u32 %v974_v15, %v990_v6  ;;  %v995_v49 = vadd.s32 127, %v994_v48  ;;  %vm3718_vm3 = vcmp.le.f32.partialorder %v918_v39, 0.7853982  ;;  %vm920_vm4 = vcmp.lt.s32.totalorder %v3450_v17, 0 }
  0x78   :  { %vm563_vm5 = vc.u32 %v3707_v46, %v3697_v34  ;;  %vm1135_vm6 = vcmp.gt.s32.totalorder %v1134_v29, 0  ;;  %v3729_v4 = vsel %vm920_vm4, %v1004_v47, %v3657_v27  ;;  %v1124_v3 = vand.u32 2147483647, %v3672_v55 }
  0x79   :  { %v993_v31 = vor.u32 %v992_v9, %v991_v16  ;;  %v996_v32 = vshll.u32 %v995_v49, 23  ;;  %v565_v40 = vsel %vm563_vm5, %v564_v14, %v3698_v36  ;;  %v1136_v37 = vsel %vm1135_vm6, %v1134_v29, 0 }
  0x7a   :  { %v3134_v52 = vpop.eup %3133  ;;  %v566_v39 = vadd.s32 %v565_v40, %v561_v8  ;;  %vm498_vm7 = vcmp.eq.s32.totalorder %v496_v38, 0  ;;  %vm497_vm8 = vcmp.lt.s32.totalorder %v496_v38, 2  ;;  %v1138_v51 = vand.u32 31, %v1136_v37 }
  0x7b   :  { %v3136_v57 = vpop.eup %3135  ;;  %v502_v1 = vxor.u32 2147483648, %v3134_v52  ;;  %v997_v0 = vor.u32 4788187, %v996_v32  ;;  %v1000_v35 = vcvt.s32.f32 %v993_v31  ;;  %vm495_vm9 = vweird.f32 %v3371_v54  ;;  %v3746_v54 = vld [vmem:[%s5081_s0 + $0x18] sm:$0xff] }
  0x7c   :  { %v499_v7 = vxor.u32 2147483648, %v3136_v57  ;;  %v567_v42 = vadd.s32 536870912, %v566_v39  ;;  %v1007_v27 = vsel %vm3718_vm3, 0, %v3729_v4  ;;  %v1131_v5 = vand.u32 8388607, %v1124_v3 }
  0x7d   :  { %v503_v15 = vsel %vm501_vm2, %v502_v1, %v3136_v57  ;;  %v998_v10 = vand.u32 2147483647, %v997_v0  ;;  %v1139_v21 = vsub.s32 32, %v1138_v51  ;;  %v3741_v13 = vshrl.u32 %v1136_v37, 5 }
  0x7e   :  { %v500_v19 = vsel %vm498_vm7, %v3134_v52, %v499_v7  ;;  %v3737_v20 = vshrl.u32 %v567_v42, 30  ;;  %v271_v41 = vmul.f32 0.16666667, %v3746_v54  ;;  %v1141_v43 = vshll.u32 %v3239_v56, %v1138_v51 }
  0x7f   :  { %v504_v53 = vsel %vm497_vm8, %v500_v19, %v503_v15  ;;  %v1001_v30 = vmul.f32 %v1000_v35, %v998_v10  ;;  %v1144_v50 = vshll.u32 %v3240_v58, %v1138_v51  ;;  %v1142_v12 = vshrl.u32 %v3240_v58, %v1139_v21 }
  0x80   :  { %v505_v22 = vsel %vm495_vm9, nan, %v504_v53  ;;  %v569_v26 = vshll.u32 %v3737_v20, 30  ;;  %v1145_v33 = vshrl.u32 %v3241_v60, %v1139_v21  ;;  %v1132_v36 = vor.u32 8388608, %v1131_v5 }
  0x81   :  { %v1949_v61 = vmul.f32 %v505_v22, %v505_v22  ;;  %v1002_v59 = vxor.u32 2147483648, %v1001_v30  ;;  %v1147_v38 = vshll.u32 %v3241_v60, %v1138_v51  ;;  %v1148_v23 = vshrl.u32 %v3242_v63, %v1139_v21 }
  0x82   :  { %v3754_v11 = vsub.s32 %v566_v39, %v569_v26  ;;  %v1150_v16 = vshll.u32 %v3242_v63, %v1138_v51  ;;  %v3762_v48 = vmul.f32 1.5707964, %v271_v41  ;;  %v1143_v8 = vor.u32 %v1142_v12, %v1141_v43 }
  0x83   :  { %v1965_v45 = vsel %vm252_vm0, %v1949_v61, 0.0  ;;  %v1003_v6 = vsel %vm920_vm4, %v1002_v59, %v1001_v30  ;;  %v1146_v9 = vor.u32 %v1145_v33, %v1144_v50  ;;  %v1151_v49 = vshrl.u32 %v3243_v2, %v1139_v21 }
  0x84   :  { %2019 = vperm.xlu1 %3092, %v1965_v45   ;;  %v1006_v44 = vsel %vm3718_vm3, %v3450_v17, %v1003_v6  ;;  %v572_v47 = vsub.s32 0, %v3754_v11  ;;  %v1153_v14 = vshll.u32 %v3243_v2, %v1138_v51  ;;  %vm1156_vm10 = vcmp.lt.s32.totalorder %v3741_v13, 1 }
  0x85   :  { %3137 = vcosq.f32 %v1006_v44  ;;  %v1140_v24 = vshrl.u32 %v3239_v56, %v1139_v21  ;;  %v1149_v31 = vor.u32 %v1148_v23, %v1147_v38  ;;  %v1152_v32 = vor.u32 %v1151_v49, %v1150_v16 }
  0x86   :  { %3139 = vsinq.f32 %v1006_v44  ;;  %v2726_v29 = vmin.u32 %v572_v47, %v3754_v11  ;;  %v1154_v28 = vshrl.u32 %v3244_v18, %v1139_v21  ;;  %vm1158_vm11 = vcmp.lt.s32.totalorder %v3741_v13, 3 }
  0x87   :  { %v1172_v40 = vshll.u32 %v1132_v36, 8  ;;  %vm1157_vm12 = vcmp.lt.s32.totalorder %v3741_v13, 2  ;;  %vm1159_vm13 = vcmp.lt.s32.totalorder %v3741_v13, 4  ;;  %v1164_v4 = vsel %vm1156_vm10, %v1143_v8, %v1146_v9 }
  0x88   :  { %v574_v52 = vclz %v2726_v29  ;;  %v562_v39 = vadd.s32 %v3697_v34, %v3707_v46  ;;  %v1155_v37 = vor.u32 %v1154_v28, %v1153_v14  ;;  %v1161_v57 = vsel %vm1159_vm13, %v1149_v31, 2102212464  ;;  %v3225_v28 = vld [vmem:[%s5081_s0 + $0x30] sm:$0xff] }
  0x89   :  { %v1165_v1 = vsel %vm1159_vm13, %v1152_v32, 920167782  ;;  %v1160_v35 = vsel %vm1156_vm10, %v1140_v24, %v1143_v8  ;;  %v1168_v42 = vsel %vm1156_vm10, %v1146_v9, %v1149_v31  ;;  %v1162_v51 = vsel %vm1158_vm11, %v1146_v9, %v1161_v57 }
  0x8a   :  { %v2727_v0 = vadd.s32 4294967294, %v574_v52  ;;  %v1166_v7 = vsel %vm1158_vm11, %v1149_v31, %v1165_v1  ;;  %v1169_v34 = vsel %vm1159_vm13, %v1155_v37, 1326507024  ;;  %v612_v46 = vand.u32 2139095040, %v3762_v48 }
  0x8b   :  { %v1167_v15 = vsel %vm1157_vm12, %v1164_v4, %v1166_v7  ;;  %v1170_v10 = vsel %vm1158_vm11, %v1152_v32, %v1169_v34  ;;  %v1011_v21 = vand.u32 3, %v1007_v27  ;;  %v1163_v50 = vsel %vm1157_vm12, %v1160_v35, %v1162_v51 }
  0x8c   :  { %vm2728_vm14 = vcmp.lt.s32.totalorder %v2727_v0, 0  ;;  %v3794_v19 = vmul.u32.u64.low %v1172_v40, %v1167_v15  ;;  %v3795_v5 = vmul.u32.u64.high %v1172_v40, %v1167_v15, %v3794_v19  ;;  %v1171_v30 = vsel %vm1157_vm12, %v1168_v42, %v1170_v10 }
  0x8d   :  { %v577_v53 = vsel %vm2728_vm14, 0, %v2727_v0  ;;  %v613_v41 = vshrl.u32 %v612_v46, 23  ;;  %v3803_v61 = vmul.u32.u64.low %v1172_v40, %v1171_v30  ;;  %v3804_v59 = vmul.u32.u64.high %v1172_v40, %v1171_v30, %v3803_v61 }
  0x8e   :  { %v578_v22 = vsub.s32 32, %v577_v53  ;;  %v579_v26 = vshll.u32 %v3754_v11, %v577_v53  ;;  %v582_v43 = vsub.s32 4294967266, %v577_v53  ;;  %vm1010_vm15 = vweird.f32 %v3450_v17 }
  0x8f   :  { %v2729_v12 = vadd.s32 4294967169, %v613_v41  ;;  %v1182_v36 = vadd.s32 1, %v3795_v5  ;;  %vm1012_vm1 = vcmp.lt.s32.totalorder %v1011_v21, 2  ;;  %v1179_v38 = vmul.u32 %v1172_v40, %v1163_v50 }
  0x90   :  { %v580_v33 = vshrl.u32 %v562_v39, %v578_v22  ;;  %v583_v27 = vadd.s32 127, %v582_v43  ;;  %v609_v23 = vand.u32 2147483647, %v3762_v48  ;;  %vm1013_vm0 = vcmp.eq.s32.totalorder %v1011_v21, 0 }
  0x91   :  { %v619_v45 = vadd.s32 1, %v2729_v12  ;;  %vm1016_vm2 = vcmp.eq.s32.totalorder %v1011_v21, 2  ;;  %v592_v47 = vsub.s32 4, %v3737_v20  ;;  %vm1181_vm3 = vc.u32 %v3804_v59, %v3794_v19 }
  0x92   :  { %v3138_v11 = vpop.eup %3137  ;;  %v581_v13 = vor.u32 %v580_v33, %v579_v26  ;;  %v584_v6 = vshll.u32 %v583_v27, 23  ;;  %v1183_v14 = vsel %vm1181_vm3, %v1182_v36, %v3795_v5  ;;  %v616_v31 = vand.u32 8388607, %v609_v23  ;;  %v3848_v26 = vld [vmem:[%s5081_s0 + $0x50] sm:$0xff] }
  0x93   :  { %v3140_v16 = vpop.eup %3139  ;;  %v1017_v44 = vxor.u32 2147483648, %v3138_v11  ;;  %vm620_vm4 = vcmp.gt.s32.totalorder %v619_v45, 0  ;;  %v1184_v24 = vadd.s32 %v1183_v14, %v1179_v38  ;;  %vm257_vm5 = vcmp.lt.f32.partialorder %v3225_v28, 6.0 }
  0x94   :  { %v1014_v8 = vxor.u32 2147483648, %v3140_v16  ;;  %v585_v9 = vor.u32 4788187, %v584_v6  ;;  %v588_v49 = vcvt.s32.f32 %v581_v13  ;;  %v621_v32 = vsel %vm620_vm4, %v619_v45, 0 }
  0x95   :  { %v1018_v29 = vsel %vm1016_vm2, %v1017_v44, %v3140_v16  ;;  %v623_v4 = vand.u32 31, %v621_v32  ;;  %vm3822_vm6 = vcmp.le.f32.partialorder %v506_v25, 0.7853982  ;;  %vm508_vm7 = vcmp.lt.s32.totalorder %v3554_v62, 0 }
  0x96   :  { %v1015_v40 = vsel %vm1013_vm0, %v3138_v11, %v1014_v8  ;;  %v586_v52 = vand.u32 2147483647, %v585_v9  ;;  %v1185_v57 = vadd.s32 536870912, %v1184_v24  ;;  %v593_v35 = vsel %vm508_vm7, %v592_v47, %v3737_v20 }
  0x97   :  { %v1019_v39 = vsel %vm1012_vm1, %v1015_v40, %v1018_v29  ;;  %v624_v7 = vsub.s32 32, %v623_v4  ;;  %v617_v15 = vor.u32 8388608, %v616_v31  ;;  %v626_v25 = vshll.u32 %v3239_v56, %v623_v4 }
  0x98   :  { %v1020_v1 = vsel %vm1010_vm15, nan, %v1019_v39  ;;  %v589_v0 = vmul.f32 %v588_v49, %v586_v52  ;;  %v3832_v51 = vshrl.u32 %v1185_v57, 30  ;;  %v629_v10 = vshll.u32 %v3240_v58, %v623_v4 }
  0x99   :  { %v1954_v42 = vmul.f32 %v1020_v1, %v1020_v1  ;;  %v627_v46 = vshrl.u32 %v3240_v58, %v624_v7  ;;  %v630_v17 = vshrl.u32 %v3241_v60, %v624_v7  ;;  %v632_v20 = vshll.u32 %v3241_v60, %v623_v4 }
  0x9a   :  { %v590_v34 = vxor.u32 2147483648, %v589_v0  ;;  %v1187_v21 = vshll.u32 %v3832_v51, 30  ;;  %v633_v53 = vshrl.u32 %v3242_v63, %v624_v7  ;;  %v622_v41 = vshrl.u32 %v621_v32, 5 }
  0x9b   :  { %v1970_v5 = vsel %vm257_vm5, %v1954_v42, 0.0  ;;  %v635_v22 = vshll.u32 %v3242_v63, %v623_v4  ;;  %v278_v43 = vmul.f32 0.16666667, %v3848_v26  ;;  %v625_v12 = vshrl.u32 %v3239_v56, %v624_v7 }
  0x9c   :  { %2044 = vperm.xlu0 %3091, %v1970_v5   ;;  %v591_v30 = vsel %vm508_vm7, %v590_v34, %v589_v0  ;;  %v3854_v61 = vsub.s32 %v1184_v24, %v1187_v21  ;;  %v628_v33 = vor.u32 %v627_v46, %v626_v25  ;;  %v631_v27 = vor.u32 %v630_v17, %v629_v10 }
  0x9d   :  { %v594_v50 = vsel %vm3822_vm6, %v3554_v62, %v591_v30  ;;  %v636_v36 = vshrl.u32 %v3243_v2, %v624_v7  ;;  %v638_v38 = vshll.u32 %v3243_v2, %v623_v4  ;;  %v634_v11 = vor.u32 %v633_v53, %v632_v20 }
  0x9e   :  { %3141 = vcosq.f32 %v594_v50  ;;  %v1190_v45 = vsub.s32 0, %v3854_v61  ;;  %v639_v13 = vshrl.u32 %v3244_v18, %v624_v7  ;;  %v595_v6 = vsel %vm3822_vm6, 0, %v593_v35 }
  0x9f   :  { %3143 = vsinq.f32 %v594_v50  ;;  %v637_v16 = vor.u32 %v636_v36, %v635_v22  ;;  %vm641_vm8 = vcmp.lt.s32.totalorder %v622_v41, 1  ;;  %v657_v44 = vshll.u32 %v617_v15, 8  ;;  %v3896_v50 = vld [vmem:[%s5081_s0 + $0x28] sm:$0xff] }
  0xa0   :  { %v2750_v47 = vmin.u32 %v1190_v45, %v3854_v61  ;;  %vm642_vm9 = vcmp.lt.s32.totalorder %v622_v41, 2  ;;  %vm643_vm10 = vcmp.lt.s32.totalorder %v622_v41, 3  ;;  %v3864_v8 = vmul.f32 1.5707964, %v278_v43 }
  0xa1   :  { %v640_v9 = vor.u32 %v639_v13, %v638_v38  ;;  %vm644_vm11 = vcmp.lt.s32.totalorder %v622_v41, 4  ;;  %v645_v49 = vsel %vm641_vm8, %v625_v12, %v628_v33  ;;  %v649_v14 = vsel %vm641_vm8, %v628_v33, %v631_v27 }
  0xa2   :  { %vm1126_vm12 = vcmp.lt.s32.totalorder %v3672_v55, 0  ;;  %v1192_v29 = vclz %v2750_v47  ;;  %v646_v24 = vsel %vm644_vm11, %v634_v11, 2102212464  ;;  %v650_v31 = vsel %vm644_vm11, %v637_v16, 920167782 }
  0xa3   :  { %v653_v32 = vsel %vm641_vm8, %v631_v27, %v634_v11  ;;  %v599_v28 = vand.u32 3, %v595_v6  ;;  %v647_v40 = vsel %vm643_vm10, %v631_v27, %v646_v24  ;;  %v651_v52 = vsel %vm643_vm10, %v634_v11, %v650_v31 }
  0xa4   :  { %v654_v4 = vsel %vm644_vm11, %v640_v9, 1326507024  ;;  %v2751_v39 = vadd.s32 4294967294, %v1192_v29  ;;  %v648_v37 = vsel %vm642_vm9, %v645_v49, %v647_v40  ;;  %v652_v57 = vsel %vm642_vm9, %v649_v14, %v651_v52 }
  0xa5   :  { %v655_v1 = vsel %vm643_vm10, %v637_v16, %v654_v4  ;;  %vm598_vm13 = vweird.f32 %v3554_v62  ;;  %v1180_v0 = vadd.s32 %v3794_v19, %v3804_v59  ;;  %v1333_v34 = vand.u32 2139095040, %v3864_v8  ;;  %v3227_v19 = vld [vmem:[%s5081_s0 + $0x10] sm:$0xff] }
  0xa6   :  { %v656_v35 = vsel %vm642_vm9, %v653_v32, %v655_v1  ;;  %v3876_v7 = vmul.u32.u64.low %v657_v44, %v652_v57  ;;  %v3877_v42 = vmul.u32.u64.high %v657_v44, %v652_v57, %v3876_v7  ;;  %vm2752_vm14 = vcmp.lt.s32.totalorder %v2751_v39, 0 }
  0xa7   :  { %v3880_v15 = vmul.u32.u64.low %v657_v44, %v656_v35  ;;  %v3881_v25 = vmul.u32.u64.high %v657_v44, %v656_v35, %v3880_v15  ;;  %vm600_vm15 = vcmp.lt.s32.totalorder %v599_v28, 2  ;;  %v1195_v46 = vsel %vm2752_vm14, 0, %v2751_v39 }
  0xa8   :  { %v1210_v10 = vsub.s32 4, %v3832_v51  ;;  %v664_v17 = vmul.u32 %v657_v44, %v648_v37  ;;  %vm253_vm1 = vcmp.lt.f32.partialorder %v3227_v19, 6.0  ;;  %v1196_v59 = vsub.s32 32, %v1195_v46 }
  0xa9   :  { %v1197_v5 = vshll.u32 %v3854_v61, %v1195_v46  ;;  %v1200_v21 = vsub.s32 4294967266, %v1195_v46  ;;  %v1334_v20 = vshrl.u32 %v1333_v34, 23  ;;  %vm601_vm0 = vcmp.eq.s32.totalorder %v599_v28, 0 }
  0xaa   :  { %vm604_vm2 = vcmp.eq.s32.totalorder %v599_v28, 2  ;;  %v667_v53 = vadd.s32 1, %v3877_v42  ;;  %v1330_v30 = vand.u32 2147483647, %v3864_v8  ;;  %v1198_v22 = vshrl.u32 %v1180_v0, %v1196_v59 }
  0xab   :  { %v3142_v41 = vpop.eup %3141  ;;  %v1201_v43 = vadd.s32 127, %v1200_v21  ;;  %vm666_vm3 = vc.u32 %v3881_v25, %v3876_v7  ;;  %v273_v61 = vmul.f32 0.16666667, %v3896_v50  ;;  %v1211_v27 = vsel %vm1126_vm12, %v1210_v10, %v3832_v51 }
  0xac   :  { %v3144_v12 = vpop.eup %3143  ;;  %v605_v33 = vxor.u32 2147483648, %v3142_v41  ;;  %v668_v36 = vsel %vm666_vm3, %v667_v53, %v3877_v42  ;;  %v2757_v38 = vadd.s32 4294967169, %v1334_v20  ;;  %v1199_v11 = vor.u32 %v1198_v22, %v1197_v5 }
  0xad   :  { %v602_v45 = vxor.u32 2147483648, %v3144_v12  ;;  %v1202_v13 = vshll.u32 %v1201_v43, 23  ;;  %v669_v6 = vadd.s32 %v668_v36, %v664_v17  ;;  %vm3906_vm4 = vcmp.le.f32.partialorder %v1124_v3, 0.7853982 }
  0xae   :  { %v606_v16 = vsel %vm604_vm2, %v605_v33, %v3144_v12  ;;  %v1337_v47 = vand.u32 8388607, %v1330_v30  ;;  %v1340_v9 = vadd.s32 1, %v2757_v38  ;;  %v1206_v14 = vcvt.s32.f32 %v1199_v11 }
  0xaf   :  { %v603_v51 = vsel %vm601_vm0, %v3142_v41, %v602_v45  ;;  %v1203_v49 = vor.u32 4788187, %v1202_v13  ;;  %v670_v29 = vadd.s32 536870912, %v669_v6  ;;  %v1213_v31 = vsel %vm3906_vm4, 0, %v1211_v27 }
  0xb0   :  { %v607_v24 = vsel %vm600_vm15, %v603_v51, %v606_v16  ;;  %vm1341_vm5 = vcmp.gt.s32.totalorder %v1340_v9, 0  ;;  %v3916_v32 = vmul.f32 1.5707964, %v273_v61  ;;  %v3922_v1 = vand.u32 3, %v1213_v31 }
  0xb1   :  { %v608_v3 = vsel %vm598_vm13, nan, %v607_v24  ;;  %v1204_v40 = vand.u32 2147483647, %v1203_v49  ;;  %v3920_v52 = vshrl.u32 %v670_v29, 30  ;;  %v1342_v4 = vsel %vm1341_vm5, %v1340_v9, 0 }
  0xb2   :  { %v1950_v39 = vmul.f32 %v608_v3, %v608_v3  ;;  %v1344_v37 = vand.u32 31, %v1342_v4  ;;  %v1338_v0 = vor.u32 8388608, %v1337_v47  ;;  %v815_v15 = vand.u32 2147483647, %v3916_v32 }
  0xb3   :  { %v1207_v57 = vmul.f32 %v1206_v14, %v1204_v40  ;;  %v672_v28 = vshll.u32 %v3920_v52, 30  ;;  %v818_v62 = vand.u32 2139095040, %v3916_v32  ;;  %v665_v46 = vadd.s32 %v3876_v7, %v3881_v25 }
  0xb4   :  { %v1966_v35 = vsel %vm253_vm1, %v1950_v39, 0.0  ;;  %v1345_v42 = vsub.s32 32, %v1344_v37  ;;  %v1347_v17 = vshll.u32 %v3239_v56, %v1344_v37  ;;  %v1350_v5 = vshll.u32 %v3240_v58, %v1344_v37 }
  0xb5   :  { %2024 = vperm.xlu1 %3092, %v1966_v35   ;;  %v1208_v34 = vxor.u32 2147483648, %v1207_v57  ;;  %v3930_v10 = vsub.s32 %v669_v6, %v672_v28  ;;  %v1353_v21 = vshll.u32 %v3241_v60, %v1344_v37  ;;  %v1343_v41 = vshrl.u32 %v1342_v4, 5 }
  0xb6   :  { %v1348_v59 = vshrl.u32 %v3240_v58, %v1345_v42  ;;  %v1351_v19 = vshrl.u32 %v3241_v60, %v1345_v42  ;;  %v1354_v7 = vshrl.u32 %v3242_v63, %v1345_v42  ;;  %v1356_v22 = vshll.u32 %v3242_v63, %v1344_v37 }
  0xb7   :  { %v1209_v20 = vsel %vm1126_vm12, %v1208_v34, %v1207_v57  ;;  %v675_v53 = vsub.s32 0, %v3930_v10  ;;  %v3945_v43 = vshll.u32 %v1338_v0, 8  ;;  %v819_v61 = vshrl.u32 %v818_v62, 23 }
  0xb8   :  { %v1212_v25 = vsel %vm3906_vm4, %v3672_v55, %v1209_v20  ;;  %v1346_v33 = vshrl.u32 %v3239_v56, %v1345_v42  ;;  %v1349_v27 = vor.u32 %v1348_v59, %v1347_v17  ;;  %v1352_v36 = vor.u32 %v1351_v19, %v1350_v5 }
  0xb9   :  { %3145 = vcosq.f32 %v1212_v25  ;;  %v2730_v12 = vmin.u32 %v675_v53, %v3930_v10  ;;  %v1355_v38 = vor.u32 %v1354_v7, %v1353_v21  ;;  %v1357_v45 = vshrl.u32 %v3243_v2, %v1345_v42 }
  0xba   :  { %3147 = vsinq.f32 %v1212_v25  ;;  %v1359_v13 = vshll.u32 %v3243_v2, %v1344_v37  ;;  %v1360_v6 = vshrl.u32 %v3244_v18, %v1345_v42  ;;  %vm1362_vm6 = vcmp.lt.s32.totalorder %v1343_v41, 1 }
  0xbb   :  { %v677_v11 = vclz %v2730_v12  ;;  %v1358_v16 = vor.u32 %v1357_v45, %v1356_v22  ;;  %vm1363_vm7 = vcmp.lt.s32.totalorder %v1343_v41, 2  ;;  %vm1364_vm8 = vcmp.lt.s32.totalorder %v1343_v41, 3 }
  0xbc   :  { %vm1365_vm9 = vcmp.lt.s32.totalorder %v1343_v41, 4  ;;  %v1361_v47 = vor.u32 %v1360_v6, %v1359_v13  ;;  %v1366_v9 = vsel %vm1362_vm6, %v1346_v33, %v1349_v27  ;;  %v1370_v14 = vsel %vm1362_vm6, %v1349_v27, %v1352_v36 }
  0xbd   :  { %v2731_v44 = vadd.s32 4294967294, %v677_v11  ;;  %v1367_v51 = vsel %vm1365_vm9, %v1355_v38, 2102212464  ;;  %v1371_v29 = vsel %vm1365_vm9, %v1358_v16, 920167782  ;;  %v1374_v24 = vsel %vm1362_vm6, %v1352_v36, %v1355_v38 }
  0xbe   :  { %v1368_v49 = vsel %vm1364_vm8, %v1352_v36, %v1367_v51  ;;  %v1372_v31 = vsel %vm1364_vm8, %v1355_v38, %v1371_v29  ;;  %v1375_v3 = vsel %vm1365_vm9, %v1361_v47, 1326507024  ;;  %v2737_v40 = vadd.s32 4294967169, %v819_v61 }
  0xbf   :  { %vm2732_vm10 = vcmp.lt.s32.totalorder %v2731_v44, 0  ;;  %v1369_v39 = vsel %vm1363_vm7, %v1366_v9, %v1368_v49  ;;  %v1373_v37 = vsel %vm1363_vm7, %v1370_v14, %v1372_v31  ;;  %v1376_v57 = vsel %vm1364_vm8, %v1358_v16, %v1375_v3  ;;  %v4000_v49 = vld [vmem:[%s5081_s0 + $0x60] sm:$0xff] }
  0xc0   :  { %v680_v4 = vsel %vm2732_vm10, 0, %v2731_v44  ;;  %v1377_v42 = vsel %vm1363_vm7, %v1374_v24, %v1376_v57  ;;  %v3964_v17 = vmul.u32.u64.low %v3945_v43, %v1373_v37  ;;  %v3965_v59 = vmul.u32.u64.high %v3945_v43, %v1373_v37, %v3964_v17 }
  0xc1   :  { %v681_v28 = vsub.s32 32, %v680_v4  ;;  %v682_v0 = vshll.u32 %v3930_v10, %v680_v4  ;;  %v685_v35 = vsub.s32 4294967266, %v680_v4  ;;  %vm1216_vm11 = vweird.f32 %v3672_v55  ;;  %v3229_v10 = vld [vmem:[%s5081_s0 + $0x40] sm:$0xff] }
  0xc2   :  { %v3960_v62 = vmul.u32.u64.low %v3945_v43, %v1377_v42  ;;  %v3961_v34 = vmul.u32.u64.high %v3945_v43, %v1377_v42, %v3960_v62  ;;  %v825_v21 = vadd.s32 1, %v2737_v40  ;;  %vm259_vm12 = vcmp.lt.f32.partialorder %v3229_v10, 6.0 }
  0xc3   :  { %v683_v5 = vshrl.u32 %v665_v46, %v681_v28  ;;  %v686_v19 = vadd.s32 127, %v685_v35  ;;  %vm1218_vm13 = vcmp.lt.s32.totalorder %v3922_v1, 2  ;;  %vm1222_vm14 = vcmp.eq.s32.totalorder %v3922_v1, 2 }
  0xc4   :  { %vm611_vm15 = vcmp.lt.s32.totalorder %v3762_v48, 0  ;;  %v822_v20 = vand.u32 8388607, %v815_v15  ;;  %vm3979_vm1 = vcmp.le.f32.partialorder %v609_v23, 0.7853982  ;;  %v1385_v7 = vmul.u32 %v3945_v43, %v1369_v39 }
  0xc5   :  { %v684_v53 = vor.u32 %v683_v5, %v682_v0  ;;  %v687_v41 = vshll.u32 %v686_v19, 23  ;;  %vm826_vm0 = vcmp.gt.s32.totalorder %v825_v21, 0  ;;  %v695_v22 = vsub.s32 4, %v3920_v52 }
  0xc6   :  { %v3146_v25 = vpop.eup %3145  ;;  %vm1387_vm2 = vc.u32 %v3961_v34, %v3964_v17  ;;  %v1388_v61 = vadd.s32 1, %v3965_v59  ;;  %v827_v12 = vsel %vm826_vm0, %v825_v21, 0  ;;  %vm1219_vm3 = vcmp.eq.s32.totalorder %v3922_v1, 0 }
  0xc7   :  { %v3148_v33 = vpop.eup %3147  ;;  %v1223_v23 = vxor.u32 2147483648, %v3146_v25  ;;  %v688_v27 = vor.u32 4788187, %v687_v41  ;;  %v691_v36 = vcvt.s32.f32 %v684_v53  ;;  %v823_v43 = vor.u32 8388608, %v822_v20 }
  0xc8   :  { %v1220_v38 = vxor.u32 2147483648, %v3148_v33  ;;  %v1389_v45 = vsel %vm1387_vm2, %v1388_v61, %v3965_v59  ;;  %v829_v11 = vand.u32 31, %v827_v12  ;;  %v3992_v44 = vshrl.u32 %v827_v12, 5 }
  0xc9   :  { %v1224_v13 = vsel %vm1222_vm14, %v1223_v23, %v3148_v33  ;;  %v689_v6 = vand.u32 2147483647, %v688_v27  ;;  %v1390_v16 = vadd.s32 %v1389_v45, %v1385_v7  ;;  %v696_v9 = vsel %vm611_vm15, %v695_v22, %v3920_v52 }
  0xca   :  { %v1221_v47 = vsel %vm1219_vm3, %v3146_v25, %v1220_v38  ;;  %v830_v51 = vsub.s32 32, %v829_v11  ;;  %v280_v14 = vmul.f32 0.16666667, %v4000_v49  ;;  %v832_v3 = vshll.u32 %v3239_v56, %v829_v11 }
  0xcb   :  { %v1225_v29 = vsel %vm1218_vm13, %v1221_v47, %v1224_v13  ;;  %v692_v24 = vmul.f32 %v691_v36, %v689_v6  ;;  %v1391_v31 = vadd.s32 536870912, %v1390_v16  ;;  %v835_v4 = vshll.u32 %v3240_v58, %v829_v11 }
  0xcc   :  { %v1226_v40 = vsel %vm1216_vm11, nan, %v1225_v29  ;;  %v833_v52 = vshrl.u32 %v3240_v58, %v830_v51  ;;  %v836_v39 = vshrl.u32 %v3241_v60, %v830_v51  ;;  %vm847_vm4 = vcmp.lt.s32.totalorder %v3992_v44, 1 }
  0xcd   :  { %v1956_v37 = vmul.f32 %v1226_v40, %v1226_v40  ;;  %v693_v57 = vxor.u32 2147483648, %v692_v24  ;;  %v4011_v28 = vshrl.u32 %v1391_v31, 30  ;;  %v838_v1 = vshll.u32 %v3241_v60, %v829_v11 }
  0xce   :  { %v839_v0 = vshrl.u32 %v3242_v63, %v830_v51  ;;  %v841_v35 = vshll.u32 %v3242_v63, %v829_v11  ;;  %v842_v55 = vshrl.u32 %v3243_v2, %v830_v51  ;;  %v834_v5 = vor.u32 %v833_v52, %v832_v3 }
  0xcf   :  { %v1972_v42 = vsel %vm259_vm12, %v1956_v37, 0.0  ;;  %v694_v62 = vsel %vm611_vm15, %v693_v57, %v692_v24  ;;  %v1393_v59 = vshll.u32 %v4011_v28, 30  ;;  %v837_v21 = vor.u32 %v836_v39, %v835_v4 }
  0xd0   :  { %2054 = vperm.xlu0 %3091, %v1972_v42   ;;  %v697_v19 = vsel %vm3979_vm1, %v3762_v48, %v694_v62  ;;  %v843_v20 = vor.u32 %v842_v55, %v841_v35  ;;  %v844_v53 = vshll.u32 %v3243_v2, %v829_v11  ;;  %v831_v10 = vshrl.u32 %v3239_v56, %v830_v51 }
  0xd1   :  { %3149 = vcosq.f32 %v697_v19  ;;  %v4026_v41 = vsub.s32 %v1390_v16, %v1393_v59  ;;  %v845_v7 = vshrl.u32 %v3244_v18, %v830_v51  ;;  %v698_v25 = vsel %vm3979_vm1, 0, %v696_v9 }
  0xd2   :  { %3151 = vsinq.f32 %v697_v19  ;;  %v840_v22 = vor.u32 %v839_v0, %v838_v1  ;;  %v863_v61 = vshll.u32 %v823_v43, 8  ;;  %vm849_vm5 = vcmp.lt.s32.totalorder %v3992_v44, 3 }
  0xd3   :  { %v1396_v12 = vsub.s32 0, %v4026_v41  ;;  %v846_v33 = vor.u32 %v845_v7, %v844_v53  ;;  %vm850_vm6 = vcmp.lt.s32.totalorder %v3992_v44, 4  ;;  %vm848_vm7 = vcmp.lt.s32.totalorder %v3992_v44, 2  ;;  %v4079_v44 = vld [vmem:[%s5081_s0 + $0x38] sm:$0xff] }
  0xd4   :  { %v852_v23 = vsel %vm850_vm6, %v840_v22, 2102212464  ;;  %v855_v27 = vsel %vm847_vm4, %v834_v5, %v837_v21  ;;  %v856_v36 = vsel %vm850_vm6, %v843_v20, 920167782  ;;  %v702_v38 = vand.u32 3, %v698_v25 }
  0xd5   :  { %v2758_v46 = vmin.u32 %v1396_v12, %v4026_v41  ;;  %v851_v45 = vsel %vm847_vm4, %v831_v10, %v834_v5  ;;  %v4041_v43 = vmul.f32 1.5707964, %v280_v14  ;;  %v853_v11 = vsel %vm849_vm5, %v837_v21, %v852_v23 }
  0xd6   :  { %v857_v13 = vsel %vm849_vm5, %v840_v22, %v856_v36  ;;  %v859_v6 = vsel %vm847_vm4, %v837_v21, %v840_v22  ;;  %v860_v16 = vsel %vm850_vm6, %v846_v33, 1326507024  ;;  %v1416_v14 = vsub.s32 4, %v4011_v28 }
  0xd7   :  { %v1398_v47 = vclz %v2758_v46  ;;  %v858_v9 = vsel %vm848_vm7, %v855_v27, %v857_v13  ;;  %v861_v51 = vsel %vm849_vm5, %v843_v20, %v860_v16  ;;  %vm701_vm8 = vweird.f32 %v3762_v48 }
  0xd8   :  { %v862_v29 = vsel %vm848_vm7, %v859_v6, %v861_v51  ;;  %v4056_v24 = vmul.u32.u64.low %v863_v61, %v858_v9  ;;  %v4057_v31 = vmul.u32.u64.high %v863_v61, %v858_v9, %v4056_v24  ;;  %v854_v40 = vsel %vm848_vm7, %v851_v45, %v853_v11 }
  0xd9   :  { %v2759_v3 = vadd.s32 4294967294, %v1398_v47  ;;  %v4063_v52 = vmul.u32.u64.low %v863_v61, %v862_v29  ;;  %v4064_v4 = vmul.u32.u64.high %v863_v61, %v862_v29, %v4063_v52  ;;  %vm703_vm9 = vcmp.lt.s32.totalorder %v702_v38, 2 }
  0xda   :  { %vm4068_vm10 = vcmp.le.f32.partialorder %v1330_v30, 0.7853982  ;;  %vm1332_vm11 = vcmp.lt.s32.totalorder %v3864_v8, 0  ;;  %v1539_v37 = vand.u32 2139095040, %v4041_v43  ;;  %vm704_vm12 = vcmp.eq.s32.totalorder %v702_v38, 0 }
  0xdb   :  { %v1386_v57 = vadd.s32 %v3964_v17, %v3961_v34  ;;  %vm2760_vm13 = vcmp.lt.s32.totalorder %v2759_v3, 0  ;;  %v275_v1 = vmul.f32 0.16666667, %v4079_v44  ;;  %v870_v0 = vmul.u32 %v863_v61, %v854_v40 }
  0xdc   :  { %v1401_v30 = vsel %vm2760_vm13, 0, %v2759_v3  ;;  %v873_v35 = vadd.s32 1, %v4057_v31  ;;  %v1540_v55 = vshrl.u32 %v1539_v37, 23  ;;  %v1417_v34 = vsel %vm1332_vm11, %v1416_v14, %v4011_v28 }
  0xdd   :  { %v1402_v42 = vsub.s32 32, %v1401_v30  ;;  %v1403_v62 = vshll.u32 %v4026_v41, %v1401_v30  ;;  %v1406_v59 = vsub.s32 4294967266, %v1401_v30  ;;  %vm707_vm14 = vcmp.eq.s32.totalorder %v702_v38, 2 }
  0xde   :  { %v3150_v17 = vpop.eup %3149  ;;  %vm872_vm15 = vc.u32 %v4064_v4, %v4056_v24  ;;  %v1536_v5 = vand.u32 2147483647, %v4041_v43  ;;  %v2765_v19 = vadd.s32 4294967169, %v1540_v55  ;;  %v1419_v25 = vsel %vm4068_vm10, 0, %v1417_v34 }
  0xdf   :  { %v3152_v21 = vpop.eup %3151  ;;  %v708_v20 = vxor.u32 2147483648, %v3150_v17  ;;  %v1404_v53 = vshrl.u32 %v1386_v57, %v1402_v42  ;;  %v1407_v10 = vadd.s32 127, %v1406_v59  ;;  %v874_v7 = vsel %vm872_vm15, %v873_v35, %v4057_v31 }
  0xe0   :  { %v705_v41 = vxor.u32 2147483648, %v3152_v21  ;;  %v875_v22 = vadd.s32 %v874_v7, %v870_v0  ;;  %v1546_v28 = vadd.s32 1, %v2765_v19  ;;  %v4093_v23 = vmul.f32 1.5707964, %v275_v1 }
  0xe1   :  { %v709_v61 = vsel %vm707_vm14, %v708_v20, %v3152_v21  ;;  %v1405_v12 = vor.u32 %v1404_v53, %v1403_v62  ;;  %v1408_v33 = vshll.u32 %v1407_v10, 23  ;;  %v1543_v46 = vand.u32 8388607, %v1536_v5 }
  0xe2   :  { %v706_v27 = vsel %vm704_vm12, %v3150_v17, %v705_v41  ;;  %v876_v36 = vadd.s32 536870912, %v875_v22  ;;  %vm1547_vm1 = vcmp.gt.s32.totalorder %v1546_v28, 0  ;;  %vm254_vm0 = vcmp.lt.f32.partialorder %v3746_v54, 6.0 }
  0xe3   :  { %v710_v45 = vsel %vm703_vm9, %v706_v27, %v709_v61  ;;  %v1409_v11 = vor.u32 4788187, %v1408_v33  ;;  %v1412_v13 = vcvt.s32.f32 %v1405_v12  ;;  %v1548_v6 = vsel %vm1547_vm1, %v1546_v28, 0 }
  0xe4   :  { %v711_v16 = vsel %vm701_vm8, nan, %v710_v45  ;;  %v4102_v47 = vshrl.u32 %v876_v36, 30  ;;  %v1550_v9 = vand.u32 31, %v1548_v6  ;;  %v4104_v29 = vand.u32 3, %v1419_v25 }
  0xe5   :  { %v1951_v51 = vmul.f32 %v711_v16, %v711_v16  ;;  %v1410_v14 = vand.u32 2147483647, %v1409_v11  ;;  %v1544_v3 = vor.u32 8388608, %v1543_v46  ;;  %v1021_v40 = vand.u32 2147483647, %v4093_v23 }
  0xe6   :  { %v878_v31 = vshll.u32 %v4102_v47, 30  ;;  %v1551_v38 = vsub.s32 32, %v1550_v9  ;;  %v871_v54 = vadd.s32 %v4056_v24, %v4064_v4  ;;  %v1024_v48 = vand.u32 2139095040, %v4093_v23 }
  0xe7   :  { %v1967_v52 = vsel %vm254_vm0, %v1951_v51, 0.0  ;;  %v1413_v37 = vmul.f32 %v1412_v13, %v1410_v14  ;;  %v1553_v1 = vshll.u32 %v3239_v56, %v1550_v9  ;;  %v1556_v0 = vshll.u32 %v3240_v58, %v1550_v9 }
  0xe8   :  { %2029 = vperm.xlu1 %3092, %v1967_v52   ;;  %v4111_v57 = vsub.s32 %v875_v22, %v878_v31  ;;  %v1554_v30 = vshrl.u32 %v3240_v58, %v1551_v38  ;;  %v1557_v55 = vshrl.u32 %v3241_v60, %v1551_v38  ;;  %v1559_v42 = vshll.u32 %v3241_v60, %v1550_v9 }
  0xe9   :  { %v1414_v35 = vxor.u32 2147483648, %v1413_v37  ;;  %v1560_v62 = vshrl.u32 %v3242_v63, %v1551_v38  ;;  %v1549_v4 = vshrl.u32 %v1548_v6, 5  ;;  %v1562_v59 = vshll.u32 %v3242_v63, %v1550_v9 }
  0xea   :  { %v881_v24 = vsub.s32 0, %v4111_v57  ;;  %v4121_v34 = vshll.u32 %v1544_v3, 8  ;;  %v1552_v19 = vshrl.u32 %v3239_v56, %v1551_v38  ;;  %v1563_v21 = vshrl.u32 %v3243_v2, %v1551_v38 }
  0xeb   :  { %v1415_v17 = vsel %vm1332_vm11, %v1414_v35, %v1413_v37  ;;  %v1025_v20 = vshrl.u32 %v1024_v48, 23  ;;  %v1555_v7 = vor.u32 %v1554_v30, %v1553_v1  ;;  %v1558_v41 = vor.u32 %v1557_v55, %v1556_v0 }
  0xec   :  { %v1418_v53 = vsel %vm4068_vm10, %v3864_v8, %v1415_v17  ;;  %v2738_v10 = vmin.u32 %v881_v24, %v4111_v57  ;;  %v1561_v25 = vor.u32 %v1560_v62, %v1559_v42  ;;  %v1564_v22 = vor.u32 %v1563_v21, %v1562_v59 }
  0xed   :  { %3153 = vcosq.f32 %v1418_v53  ;;  %v1565_v28 = vshll.u32 %v3243_v2, %v1550_v9  ;;  %v1566_v12 = vshrl.u32 %v3244_v18, %v1551_v38  ;;  %vm1568_vm2 = vcmp.lt.s32.totalorder %v1549_v4, 1 }
  0xee   :  { %3155 = vsinq.f32 %v1418_v53  ;;  %v883_v61 = vclz %v2738_v10  ;;  %vm1569_vm3 = vcmp.lt.s32.totalorder %v1549_v4, 2  ;;  %vm1570_vm4 = vcmp.lt.s32.totalorder %v1549_v4, 3 }
  0xef   :  { %vm1571_vm5 = vcmp.lt.s32.totalorder %v1549_v4, 4  ;;  %v1572_v33 = vsel %vm1568_vm2, %v1552_v19, %v1555_v7  ;;  %v1567_v27 = vor.u32 %v1566_v12, %v1565_v28  ;;  %v1576_v46 = vsel %vm1568_vm2, %v1555_v7, %v1558_v41 }
  0xf0   :  { %v2739_v39 = vadd.s32 4294967294, %v883_v61  ;;  %v1573_v36 = vsel %vm1571_vm5, %v1561_v25, 2102212464  ;;  %v901_v45 = vsub.s32 4, %v4102_v47  ;;  %v1577_v13 = vsel %vm1571_vm5, %v1564_v22, 920167782 }
  0xf1   :  { %v1574_v11 = vsel %vm1570_vm4, %v1558_v41, %v1573_v36  ;;  %v1580_v6 = vsel %vm1568_vm2, %v1558_v41, %v1561_v25  ;;  %v1578_v16 = vsel %vm1570_vm4, %v1561_v25, %v1577_v13  ;;  %v1581_v9 = vsel %vm1571_vm5, %v1567_v27, 1326507024  ;;  %v4181_v36 = vld [vmem:[%s5081_s0 + $0x70] sm:$0xff] }
  0xf2   :  { %vm2740_vm6 = vcmp.lt.s32.totalorder %v2739_v39, 0  ;;  %v2745_v51 = vadd.s32 4294967169, %v1025_v20  ;;  %v1575_v31 = vsel %vm1569_vm3, %v1572_v33, %v1574_v11  ;;  %v1579_v3 = vsel %vm1569_vm3, %v1576_v46, %v1578_v16 }
  0xf3   :  { %v886_v14 = vsel %vm2740_vm6, 0, %v2739_v39  ;;  %v1582_v38 = vsel %vm1570_vm4, %v1564_v22, %v1581_v9  ;;  %v4146_v35 = vmul.u32.u64.low %v4121_v34, %v1579_v3  ;;  %v4147_v55 = vmul.u32.u64.high %v4121_v34, %v1579_v3, %v4146_v35 }
  0xf4   :  { %v887_v52 = vsub.s32 32, %v886_v14  ;;  %v888_v37 = vshll.u32 %v4111_v57, %v886_v14  ;;  %v891_v48 = vsub.s32 4294967266, %v886_v14  ;;  %v1583_v1 = vsel %vm1569_vm3, %v1580_v6, %v1582_v38 }
  0xf5   :  { %v4142_v30 = vmul.u32.u64.low %v4121_v34, %v1583_v1  ;;  %v4143_v0 = vmul.u32.u64.high %v4121_v34, %v1583_v1, %v4142_v30  ;;  %vm817_vm7 = vcmp.lt.s32.totalorder %v3916_v32, 0  ;;  %v1031_v24 = vadd.s32 1, %v2745_v51 }
  0xf6   :  { %v889_v42 = vshrl.u32 %v871_v54, %v887_v52  ;;  %v892_v62 = vadd.s32 127, %v891_v48  ;;  %vm1422_vm8 = vweird.f32 %v3864_v8  ;;  %vm1424_vm9 = vcmp.lt.s32.totalorder %v4104_v29, 2 }
  0xf7   :  { %vm4155_vm10 = vcmp.le.f32.partialorder %v815_v15, 0.7853982  ;;  %v4162_v4 = vsel %vm817_vm7, %v901_v45, %v4102_v47  ;;  %vm261_vm11 = vcmp.lt.f32.partialorder %v3848_v26, 6.0  ;;  %v1591_v17 = vmul.u32 %v4121_v34, %v1575_v31 }
  0xf8   :  { %v890_v54 = vor.u32 %v889_v42, %v888_v37  ;;  %v893_v59 = vshll.u32 %v892_v62, 23  ;;  %vm1032_vm12 = vcmp.gt.s32.totalorder %v1031_v24, 0  ;;  %vm1593_vm13 = vc.u32 %v4143_v0, %v4146_v35 }
  0xf9   :  { %v1594_v15 = vadd.s32 1, %v4147_v55  ;;  %v1028_v19 = vand.u32 8388607, %v1021_v40  ;;  %v1033_v21 = vsel %vm1032_vm12, %v1031_v24, 0  ;;  %vm1428_vm14 = vcmp.eq.s32.totalorder %v4104_v29, 2 }
  0xfa   :  { %v3154_v20 = vpop.eup %3153  ;;  %v894_v47 = vor.u32 4788187, %v893_v59  ;;  %v897_v53 = vcvt.s32.f32 %v890_v54  ;;  %v1035_v10 = vand.u32 31, %v1033_v21  ;;  %vm1425_vm15 = vcmp.eq.s32.totalorder %v4104_v29, 0 }
  0xfb   :  { %v3156_v7 = vpop.eup %3155  ;;  %v1429_v34 = vxor.u32 2147483648, %v3154_v20  ;;  %v904_v41 = vsel %vm4155_vm10, 0, %v4162_v4  ;;  %v1595_v25 = vsel %vm1593_vm13, %v1594_v15, %v4147_v55  ;;  %v1029_v39 = vor.u32 8388608, %v1028_v19 }
  0xfc   :  { %v1426_v22 = vxor.u32 2147483648, %v3156_v7  ;;  %v895_v28 = vand.u32 2147483647, %v894_v47  ;;  %v1596_v61 = vadd.s32 %v1595_v25, %v1591_v17  ;;  %v1036_v12 = vsub.s32 32, %v1035_v10 }
  0xfd   :  { %v1430_v33 = vsel %vm1428_vm14, %v1429_v34, %v3156_v7  ;;  %v1038_v27 = vshll.u32 %v3239_v56, %v1035_v10  ;;  %v282_v46 = vmul.f32 0.16666667, %v4181_v36  ;;  %v1041_v6 = vshll.u32 %v3240_v58, %v1035_v10 }
  0xfe   :  { %v1427_v45 = vsel %vm1425_vm15, %v3154_v20, %v1426_v22  ;;  %v898_v11 = vmul.f32 %v897_v53, %v895_v28  ;;  %v1597_v13 = vadd.s32 536870912, %v1596_v61  ;;  %v1039_v9 = vshrl.u32 %v3240_v58, %v1036_v12 }
  0xff   :  { %v1431_v16 = vsel %vm1424_vm9, %v1427_v45, %v1430_v33  ;;  %v1042_v51 = vshrl.u32 %v3241_v60, %v1036_v12  ;;  %v1044_v14 = vshll.u32 %v3241_v60, %v1035_v10  ;;  %v1045_v52 = vshrl.u32 %v3242_v63, %v1036_v12 }
 0x100   :  { %v1432_v31 = vsel %vm1422_vm8, nan, %v1431_v16  ;;  %v899_v3 = vxor.u32 2147483648, %v898_v11  ;;  %v4192_v38 = vshrl.u32 %v1597_v13, 30  ;;  %v1034_v48 = vshrl.u32 %v1033_v21, 5 }
 0x101   :  { %v1958_v37 = vmul.f32 %v1432_v31, %v1432_v31  ;;  %v1037_v1 = vshrl.u32 %v3239_v56, %v1036_v12  ;;  %v1047_v29 = vshll.u32 %v3242_v63, %v1035_v10  ;;  %v1040_v42 = vor.u32 %v1039_v9, %v1038_v27 }
 0x102   :  { %v900_v30 = vsel %vm817_vm7, %v899_v3, %v898_v11  ;;  %v1599_v55 = vshll.u32 %v4192_v38, 30  ;;  %v1048_v8 = vshrl.u32 %v3243_v2, %v1036_v12  ;;  %v1050_v4 = vshll.u32 %v3243_v2, %v1035_v10 }
 0x103   :  { %v1974_v62 = vsel %vm261_vm11, %v1958_v37, 0.0  ;;  %v903_v24 = vsel %vm4155_vm10, %v3916_v32, %v900_v30  ;;  %v1051_v54 = vshrl.u32 %v3244_v18, %v1036_v12  ;;  %v1043_v17 = vor.u32 %v1042_v51, %v1041_v6 }
 0x104   :  { %2064 = vperm.xlu0 %3091, %v1974_v62   ;;  %3157 = vcosq.f32 %v903_v24  ;;  %v4208_v59 = vsub.s32 %v1596_v61, %v1599_v55  ;;  %v1046_v15 = vor.u32 %v1045_v52, %v1044_v14  ;;  %v1049_v19 = vor.u32 %v1048_v8, %v1047_v29 }
 0x105   :  { %3159 = vsinq.f32 %v903_v24  ;;  %v1052_v21 = vor.u32 %v1051_v54, %v1050_v4  ;;  %vm1053_vm1 = vcmp.lt.s32.totalorder %v1034_v48, 1  ;;  %v4210_v26 = vand.u32 3, %v904_v41 }
 0x106   :  { %v1602_v20 = vsub.s32 0, %v4208_v59  ;;  %vm1055_vm0 = vcmp.lt.s32.totalorder %v1034_v48, 3  ;;  %vm1056_vm2 = vcmp.lt.s32.totalorder %v1034_v48, 4  ;;  %v1069_v57 = vshll.u32 %v1029_v39, 8 }
 0x107   :  { %v4213_v47 = vmul.f32 1.5707964, %v282_v46  ;;  %vm1054_vm3 = vcmp.lt.s32.totalorder %v1034_v48, 2  ;;  %v1061_v10 = vsel %vm1053_vm1, %v1040_v42, %v1043_v17  ;;  %v1065_v7 = vsel %vm1053_vm1, %v1043_v17, %v1046_v15  ;;  %v4222_v46 = vld [vmem:[%s5081_s0 + $0x48] sm:$0xff] }
 0x108   :  { %v2766_v53 = vmin.u32 %v1602_v20, %v4208_v59  ;;  %v1057_v34 = vsel %vm1053_vm1, %v1037_v1, %v1040_v42  ;;  %v1058_v25 = vsel %vm1056_vm2, %v1046_v15, 2102212464  ;;  %v1062_v22 = vsel %vm1056_vm2, %v1049_v19, 920167782 }
 0x109   :  { %v1066_v28 = vsel %vm1056_vm2, %v1052_v21, 1326507024  ;;  %v1059_v12 = vsel %vm1055_vm0, %v1043_v17, %v1058_v25  ;;  %v1063_v41 = vsel %vm1055_vm0, %v1046_v15, %v1062_v22  ;;  %vm1538_vm4 = vcmp.lt.s32.totalorder %v4041_v43, 0 }
 0x10a   :  { %v1604_v61 = vclz %v2766_v53  ;;  %v1067_v33 = vsel %vm1055_vm0, %v1049_v19, %v1066_v28  ;;  %v1064_v27 = vsel %vm1054_vm3, %v1061_v10, %v1063_v41  ;;  %v277_v45 = vmul.f32 0.16666667, %v4222_v46 }
 0x10b   :  { %v1068_v39 = vsel %vm1054_vm3, %v1065_v7, %v1067_v33  ;;  %vm907_vm5 = vweird.f32 %v3916_v32  ;;  %vm909_vm6 = vcmp.lt.s32.totalorder %v4210_v26, 2  ;;  %vm4229_vm7 = vcmp.le.f32.partialorder %v1536_v5, 0.7853982 }
 0x10c   :  { %v2767_v13 = vadd.s32 4294967294, %v1604_v61  ;;  %v4233_v6 = vmul.u32.u64.low %v1069_v57, %v1068_v39  ;;  %v4234_v16 = vmul.u32.u64.high %v1069_v57, %v1068_v39, %v4233_v6  ;;  %v1622_v9 = vsub.s32 4, %v4192_v38 }
 0x10d   :  { %v1060_v51 = vsel %vm1054_vm3, %v1057_v34, %v1059_v12  ;;  %v4238_v14 = vmul.u32.u64.low %v1069_v57, %v1064_v27  ;;  %v4239_v31 = vmul.u32.u64.high %v1069_v57, %v1064_v27, %v4238_v14  ;;  %v1592_v3 = vadd.s32 %v4146_v35, %v4143_v0 }
 0x10e   :  { %vm2768_vm8 = vcmp.lt.s32.totalorder %v2767_v13, 0  ;;  %v1742_v5 = vand.u32 2147483647, %v4213_v47  ;;  %v1745_v52 = vand.u32 2139095040, %v4213_v47  ;;  %vm910_vm9 = vcmp.eq.s32.totalorder %v4210_v26, 0 }
 0x10f   :  { %vm913_vm10 = vcmp.eq.s32.totalorder %v4210_v26, 2  ;;  %v1607_v37 = vsel %vm2768_vm8, 0, %v2767_v13  ;;  %v4247_v1 = vmul.f32 1.5707964, %v277_v45  ;;  %v1076_v55 = vmul.u32 %v1069_v57, %v1060_v51 }
 0x110   :  { %v1608_v48 = vsub.s32 32, %v1607_v37  ;;  %v1609_v29 = vshll.u32 %v4208_v59, %v1607_v37  ;;  %v1612_v30 = vsub.s32 4294967266, %v1607_v37  ;;  %v1623_v0 = vsel %vm1538_vm4, %v1622_v9, %v4192_v38 }
 0x111   :  { %v3158_v42 = vpop.eup %3157  ;;  %vm1078_vm11 = vc.u32 %v4234_v16, %v4238_v14  ;;  %v1079_v35 = vadd.s32 1, %v4239_v31  ;;  %v1746_v8 = vshrl.u32 %v1745_v52, 23  ;;  %v1749_v17 = vand.u32 8388607, %v1742_v5 }
 0x112   :  { %v3160_v62 = vpop.eup %3159  ;;  %v914_v24 = vxor.u32 2147483648, %v3158_v42  ;;  %v1610_v4 = vshrl.u32 %v1592_v3, %v1608_v48  ;;  %v1613_v54 = vadd.s32 127, %v1612_v30  ;;  %v1230_v21 = vand.u32 2139095040, %v4247_v1 }
 0x113   :  { %v911_v59 = vxor.u32 2147483648, %v3160_v62  ;;  %v1080_v15 = vsel %vm1078_vm11, %v1079_v35, %v4239_v31  ;;  %v2773_v19 = vadd.s32 4294967169, %v1746_v8  ;;  %vm256_vm12 = vcmp.lt.f32.partialorder %v3896_v50, 6.0 }
 0x114   :  { %v915_v38 = vsel %vm913_vm10, %v914_v24, %v3160_v62  ;;  %v1611_v20 = vor.u32 %v1610_v4, %v1609_v29  ;;  %v1614_v57 = vshll.u32 %v1613_v54, 23  ;;  %v1081_v53 = vadd.s32 %v1080_v15, %v1076_v55 }
 0x115   :  { %v912_v10 = vsel %vm910_vm9, %v3158_v42, %v911_v59  ;;  %v1625_v7 = vsel %vm4229_vm7, 0, %v1623_v0  ;;  %v1752_v34 = vadd.s32 1, %v2773_v19  ;;  %v1750_v41 = vor.u32 8388608, %v1749_v17 }
 0x116   :  { %v916_v25 = vsel %vm909_vm6, %v912_v10, %v915_v38  ;;  %v1615_v22 = vor.u32 4788187, %v1614_v57  ;;  %v1618_v28 = vcvt.s32.f32 %v1611_v20  ;;  %v1082_v61 = vadd.s32 536870912, %v1081_v53 }
 0x117   :  { %v917_v12 = vsel %vm907_vm5, nan, %v916_v25  ;;  %vm1753_vm13 = vcmp.gt.s32.totalorder %v1752_v34, 0  ;;  %v1231_v33 = vshrl.u32 %v1230_v21, 23  ;;  %v4272_v6 = vand.u32 3, %v1625_v7 }
 0x118   :  { %v1953_v27 = vmul.f32 %v917_v12, %v917_v12  ;;  %v1616_v39 = vand.u32 2147483647, %v1615_v22  ;;  %v4270_v45 = vshrl.u32 %v1082_v61, 30  ;;  %v1754_v13 = vsel %vm1753_vm13, %v1752_v34, 0 }
 0x119   :  { %v1756_v9 = vand.u32 31, %v1754_v13  ;;  %v1227_v32 = vand.u32 2147483647, %v4247_v1  ;;  %v1077_v3 = vadd.s32 %v4238_v14, %v4234_v16  ;;  %v4279_v37 = vshll.u32 %v1750_v41, 8 }
 0x11a   :  { %v1969_v26 = vsel %vm256_vm12, %v1953_v27, 0.0  ;;  %v1619_v51 = vmul.f32 %v1618_v28, %v1616_v39  ;;  %v1084_v31 = vshll.u32 %v4270_v45, 30  ;;  %v2753_v48 = vadd.s32 4294967169, %v1231_v33 }
 0x11b   :  { %2039 = vperm.xlu1 %3092, %v1969_v26   ;;  %v1757_v52 = vsub.s32 32, %v1756_v9  ;;  %v1759_v55 = vshll.u32 %v3239_v56, %v1756_v9  ;;  %v1762_v50 = vshll.u32 %v3240_v58, %v1756_v9  ;;  %v1765_v35 = vshll.u32 %v3241_v60, %v1756_v9 }
 0x11c   :  { %v1620_v29 = vxor.u32 2147483648, %v1619_v51  ;;  %v4281_v30 = vsub.s32 %v1081_v53, %v1084_v31  ;;  %v1768_v8 = vshll.u32 %v3242_v63, %v1756_v9  ;;  %v1755_v62 = vshrl.u32 %v1754_v13, 5 }
 0x11d   :  { %v1760_v42 = vshrl.u32 %v3240_v58, %v1757_v52  ;;  %v1763_v0 = vshrl.u32 %v3241_v60, %v1757_v52  ;;  %v1766_v24 = vshrl.u32 %v3242_v63, %v1757_v52  ;;  %v1758_v54 = vshrl.u32 %v3239_v56, %v1757_v52 }
 0x11e   :  { %v1621_v16 = vsel %vm1538_vm4, %v1620_v29, %v1619_v51  ;;  %v1087_v14 = vsub.s32 0, %v4281_v30  ;;  %v1769_v17 = vshrl.u32 %v3243_v2, %v1757_v52  ;;  %v4300_v59 = vand.u32 8388607, %v1227_v32 }
 0x11f   :  { %v1624_v4 = vsel %vm4229_vm7, %v4041_v43, %v1621_v16  ;;  %v1761_v19 = vor.u32 %v1760_v42, %v1759_v55  ;;  %v1764_v21 = vor.u32 %v1763_v0, %v1762_v50  ;;  %v1767_v38 = vor.u32 %v1766_v24, %v1765_v35 }
 0x120   :  { %3161 = vcosq.f32 %v1624_v4  ;;  %v2746_v15 = vmin.u32 %v1087_v14, %v4281_v30  ;;  %v1770_v20 = vor.u32 %v1769_v17, %v1768_v8  ;;  %v1237_v57 = vadd.s32 1, %v2753_v48 }
 0x121   :  { %3163 = vsinq.f32 %v1624_v4  ;;  %v1771_v11 = vshll.u32 %v3243_v2, %v1756_v9  ;;  %v1772_v10 = vshrl.u32 %v3244_v18, %v1757_v52  ;;  %vm1774_vm14 = vcmp.lt.s32.totalorder %v1755_v62, 1 }
 0x122   :  { %v1089_v53 = vclz %v2746_v15  ;;  %vm1775_vm15 = vcmp.lt.s32.totalorder %v1755_v62, 2  ;;  %vm1776_vm1 = vcmp.lt.s32.totalorder %v1755_v62, 3  ;;  %vm1777_vm0 = vcmp.lt.s32.totalorder %v1755_v62, 4 }
 0x123   :  { %v1778_v7 = vsel %vm1774_vm14, %v1758_v54, %v1761_v19  ;;  %v1773_v25 = vor.u32 %v1772_v10, %v1771_v11  ;;  %v1779_v22 = vsel %vm1777_vm0, %v1767_v38, 2102212464  ;;  %v1782_v28 = vsel %vm1774_vm14, %v1761_v19, %v1764_v21 }
 0x124   :  { %v2747_v34 = vadd.s32 4294967294, %v1089_v53  ;;  %v1107_v61 = vsub.s32 4, %v4270_v45  ;;  %v1780_v12 = vsel %vm1776_vm1, %v1764_v21, %v1779_v22  ;;  %v1783_v41 = vsel %vm1777_vm0, %v1770_v20, 920167782 }
 0x125   :  { %v1786_v33 = vsel %vm1774_vm14, %v1764_v21, %v1767_v38  ;;  %vm4309_vm2 = vcmp.le.f32.partialorder %v1021_v40, 0.7853982  ;;  %v1784_v39 = vsel %vm1776_vm1, %v1767_v38, %v1783_v41  ;;  %v1787_v13 = vsel %vm1777_vm0, %v1773_v25, 1326507024 }
 0x126   :  { %vm2748_vm3 = vcmp.lt.s32.totalorder %v2747_v34, 0  ;;  %vm1238_vm4 = vcmp.gt.s32.totalorder %v1237_v57, 0  ;;  %v1781_v26 = vsel %vm1775_vm15, %v1778_v7, %v1780_v12  ;;  %v1785_v51 = vsel %vm1775_vm15, %v1782_v28, %v1784_v39 }
 0x127   :  { %v1092_v9 = vsel %vm2748_vm3, 0, %v2747_v34  ;;  %v1788_v31 = vsel %vm1776_vm1, %v1770_v20, %v1787_v13  ;;  %vm1628_vm5 = vweird.f32 %v4041_v43  ;;  %v1235_v16 = vor.u32 8388608, %v4300_v59 }
 0x128   :  { %v1093_v52 = vsub.s32 32, %v1092_v9  ;;  %v1094_v40 = vshll.u32 %v4281_v30, %v1092_v9  ;;  %v1097_v48 = vsub.s32 4294967266, %v1092_v9  ;;  %v1789_v29 = vsel %vm1775_vm15, %v1786_v33, %v1788_v31 }
 0x129   :  { %v4321_v55 = vmul.u32.u64.low %v4279_v37, %v1789_v29  ;;  %v4322_v50 = vmul.u32.u64.high %v4279_v37, %v1789_v29, %v4321_v55  ;;  %v4325_v42 = vmul.u32.u64.low %v4279_v37, %v1785_v51  ;;  %v4326_v0 = vmul.u32.u64.high %v4279_v37, %v1785_v51, %v4325_v42 }
 0x12a   :  { %v1095_v35 = vshrl.u32 %v1077_v3, %v1093_v52  ;;  %v1098_v8 = vadd.s32 127, %v1097_v48  ;;  %v1239_v14 = vsel %vm1238_vm4, %v1237_v57, 0  ;;  %vm263_vm6 = vcmp.lt.f32.partialorder %v4000_v49, 6.0 }
 0x12b   :  { %vm1630_vm7 = vcmp.lt.s32.totalorder %v4272_v6, 2  ;;  %vm1631_vm8 = vcmp.eq.s32.totalorder %v4272_v6, 0  ;;  %vm1023_vm9 = vcmp.lt.s32.totalorder %v4093_v23, 0  ;;  %v1241_v30 = vand.u32 31, %v1239_v14 }
 0x12c   :  { %v1096_v62 = vor.u32 %v1095_v35, %v1094_v40  ;;  %v1099_v24 = vshll.u32 %v1098_v8, 23  ;;  %v4337_v4 = vsel %vm1023_vm9, %v1107_v61, %v4270_v45  ;;  %v1797_v3 = vmul.u32 %v4279_v37, %v1781_v26 }
 0x12d   :  { %v3162_v54 = vpop.eup %3161  ;;  %vm1634_vm10 = vcmp.eq.s32.totalorder %v4272_v6, 2  ;;  %vm1799_vm11 = vc.u32 %v4322_v50, %v4325_v42  ;;  %v1800_v17 = vadd.s32 1, %v4326_v0  ;;  %v1242_v59 = vsub.s32 32, %v1241_v30  ;;  %v4369_v6 = vld [vmem:[%s5081_s0 + $0x58] sm:$0xff] }
 0x12e   :  { %v3164_v15 = vpop.eup %3163  ;;  %v1635_v19 = vxor.u32 2147483648, %v3162_v54  ;;  %v1100_v21 = vor.u32 4788187, %v1099_v24  ;;  %v1103_v38 = vcvt.s32.f32 %v1096_v62  ;;  %v4344_v20 = vshll.u32 %v1235_v16, 8 }
 0x12f   :  { %v1632_v57 = vxor.u32 2147483648, %v3164_v15  ;;  %v1110_v45 = vsel %vm4309_vm2, 0, %v4337_v4  ;;  %v1801_v37 = vsel %vm1799_vm11, %v1800_v17, %v4326_v0  ;;  %v1240_v53 = vshrl.u32 %v1239_v14, 5 }
 0x130   :  { %v1636_v11 = vsel %vm1634_vm10, %v1635_v19, %v3164_v15  ;;  %v1101_v10 = vand.u32 2147483647, %v1100_v21  ;;  %v1802_v7 = vadd.s32 %v1801_v37, %v1797_v3  ;;  %v1244_v34 = vshll.u32 %v3239_v56, %v1241_v30 }
 0x131   :  { %v1633_v25 = vsel %vm1631_vm8, %v3162_v54, %v1632_v57  ;;  %v1245_v22 = vshrl.u32 %v3240_v58, %v1242_v59  ;;  %v1247_v28 = vshll.u32 %v3240_v58, %v1241_v30  ;;  %v1248_v61 = vshrl.u32 %v3241_v60, %v1242_v59  ;;  %v4388_v54 = vld [vmem:[%s5081_s0 + $0x68] sm:$0xff] }
 0x132   :  { %v1637_v12 = vsel %vm1630_vm7, %v1633_v25, %v1636_v11  ;;  %v1104_v41 = vmul.f32 %v1103_v38, %v1101_v10  ;;  %v1803_v33 = vadd.s32 536870912, %v1802_v7  ;;  %v1250_v39 = vshll.u32 %v3241_v60, %v1241_v30 }
 0x133   :  { %v1638_v13 = vsel %vm1628_vm5, nan, %v1637_v12  ;;  %v1251_v9 = vshrl.u32 %v3242_v63, %v1242_v59  ;;  %v1253_v26 = vshll.u32 %v3242_v63, %v1241_v30  ;;  %v1254_v51 = vshrl.u32 %v3243_v2, %v1242_v59 }
 0x134   :  { %v1960_v31 = vmul.f32 %v1638_v13, %v1638_v13  ;;  %v1105_v52 = vxor.u32 2147483648, %v1104_v41  ;;  %v4364_v40 = vshrl.u32 %v1803_v33, 30  ;;  %v279_v48 = vmul.f32 0.16666667, %v4369_v6 }
 0x135   :  { %v1243_v43 = vshrl.u32 %v3239_v56, %v1242_v59  ;;  %v1246_v29 = vor.u32 %v1245_v22, %v1244_v34  ;;  %v1256_v55 = vshll.u32 %v3243_v2, %v1241_v30  ;;  %v1257_v0 = vshrl.u32 %v3244_v18, %v1242_v59 }
 0x136   :  { %v1976_v35 = vsel %vm263_vm6, %v1960_v31, 0.0  ;;  %v1106_v8 = vsel %vm1023_vm9, %v1105_v52, %v1104_v41  ;;  %v1805_v16 = vshll.u32 %v4364_v40, 30  ;;  %v1249_v14 = vor.u32 %v1248_v61, %v1247_v28 }
 0x137   :  { %2074 = vperm.xlu0 %3091, %v1976_v35   ;;  %v1109_v62 = vsel %vm4309_vm2, %v4093_v23, %v1106_v8  ;;  %v1252_v24 = vor.u32 %v1251_v9, %v1250_v39  ;;  %v1255_v4 = vor.u32 %v1254_v51, %v1253_v26  ;;  %v1258_v3 = vor.u32 %v1257_v0, %v1256_v55 }
 0x138   :  { %3165 = vcosq.f32 %v1109_v62  ;;  %v4383_v30 = vsub.s32 %v1802_v7, %v1805_v16  ;;  %vm1259_vm12 = vcmp.lt.s32.totalorder %v1240_v53, 1  ;;  %vm1262_vm13 = vcmp.lt.s32.totalorder %v1240_v53, 4 }
 0x139   :  { %3167 = vsinq.f32 %v1109_v62  ;;  %vm1261_vm14 = vcmp.lt.s32.totalorder %v1240_v53, 3  ;;  %v1264_v49 = vsel %vm1262_vm13, %v1252_v24, 2102212464  ;;  %v281_v17 = vmul.f32 0.16666667, %v4388_v54 }
 0x13a   :  { %v1808_v27 = vsub.s32 0, %v4383_v30  ;;  %vm1260_vm15 = vcmp.lt.s32.totalorder %v1240_v53, 2  ;;  %v1263_v59 = vsel %vm1259_vm12, %v1243_v43, %v1246_v29  ;;  %v1265_v15 = vsel %vm1261_vm14, %v1249_v14, %v1264_v49 }
 0x13b   :  { %v1267_v19 = vsel %vm1259_vm12, %v1246_v29, %v1249_v14  ;;  %v1268_v21 = vsel %vm1262_vm13, %v1255_v4, 920167782  ;;  %v1271_v38 = vsel %vm1259_vm12, %v1249_v14, %v1252_v24  ;;  %v1272_v57 = vsel %vm1262_vm13, %v1258_v3, 1326507024 }
 0x13c   :  { %v1114_v37 = vand.u32 3, %v1110_v45  ;;  %v2774_v11 = vmin.u32 %v1808_v27, %v4383_v30  ;;  %v1266_v10 = vsel %vm1260_vm15, %v1263_v59, %v1265_v15  ;;  %v1269_v7 = vsel %vm1261_vm14, %v1252_v24, %v1268_v21 }
 0x13d   :  { %v1273_v34 = vsel %vm1261_vm14, %v1255_v4, %v1272_v57  ;;  %v4396_v25 = vmul.f32 1.5707964, %v279_v48  ;;  %v1270_v28 = vsel %vm1260_vm15, %v1267_v19, %v1269_v7  ;;  %v4398_v12 = vmul.f32 1.5707964, %v281_v17 }
 0x13e   :  { %v1810_v22 = vclz %v2774_v11  ;;  %v1274_v61 = vsel %vm1260_vm15, %v1271_v38, %v1273_v34  ;;  %v4405_v45 = vmul.u32.u64.low %v4344_v20, %v1270_v28  ;;  %v4406_v39 = vmul.u32.u64.high %v4344_v20, %v1270_v28, %v4405_v45 }
 0x13f   :  { %v4401_v41 = vmul.u32.u64.low %v4344_v20, %v1274_v61  ;;  %v4402_v33 = vmul.u32.u64.high %v4344_v20, %v1274_v61, %v4401_v41  ;;  %vm1113_vm1 = vweird.f32 %v4093_v23  ;;  %vm4412_vm0 = vcmp.le.f32.partialorder %v1742_v5, 0.7853982 }
 0x140   :  { %v2775_v13 = vadd.s32 4294967294, %v1810_v22  ;;  %v1436_v9 = vand.u32 2139095040, %v4396_v25  ;;  %vm1116_vm2 = vcmp.eq.s32.totalorder %v1114_v37, 0  ;;  %vm1744_vm3 = vcmp.lt.s32.totalorder %v4213_v47, 0 }
 0x141   :  { %v1828_v26 = vsub.s32 4, %v4364_v40  ;;  %v1642_v51 = vand.u32 2139095040, %v4398_v12  ;;  %v1798_v31 = vadd.s32 %v4325_v42, %v4322_v50  ;;  %v1282_v52 = vmul.u32 %v4344_v20, %v1266_v10 }
 0x142   :  { %vm2776_vm4 = vcmp.lt.s32.totalorder %v2775_v13, 0  ;;  %v1437_v5 = vshrl.u32 %v1436_v9, 23  ;;  %vm1284_vm5 = vc.u32 %v4402_v33, %v4405_v45  ;;  %v1285_v43 = vadd.s32 1, %v4406_v39 }
 0x143   :  { %v1813_v48 = vsel %vm2776_vm4, 0, %v2775_v13  ;;  %v1433_v29 = vand.u32 2147483647, %v4396_v25  ;;  %vm1119_vm6 = vcmp.eq.s32.totalorder %v1114_v37, 2  ;;  %v1829_v50 = vsel %vm1744_vm3, %v1828_v26, %v4364_v40 }
 0x144   :  { %v1814_v55 = vsub.s32 32, %v1813_v48  ;;  %v1815_v0 = vshll.u32 %v4383_v30, %v1813_v48  ;;  %v1818_v35 = vsub.s32 4294967266, %v1813_v48  ;;  %v2761_v8 = vadd.s32 4294967169, %v1437_v5 }
 0x145   :  { %v3166_v16 = vpop.eup %3165  ;;  %v1286_v42 = vsel %vm1284_vm5, %v1285_v43, %v4406_v39  ;;  %v1643_v20 = vshrl.u32 %v1642_v51, 23  ;;  %vm1115_vm7 = vcmp.lt.s32.totalorder %v1114_v37, 2  ;;  %v1440_v30 = vand.u32 8388607, %v1433_v29  ;;  %v3236_v51 = vld [vmem:[%s5081_s0 + $0x78] sm:$0xff] }
 0x146   :  { %v3168_v14 = vpop.eup %3167  ;;  %v1120_v62 = vxor.u32 2147483648, %v3166_v16  ;;  %v1816_v24 = vshrl.u32 %v1798_v31, %v1814_v55  ;;  %v1819_v4 = vadd.s32 127, %v1818_v35  ;;  %v1287_v3 = vadd.s32 %v1286_v42, %v1282_v52 }
 0x147   :  { %v1117_v49 = vxor.u32 2147483648, %v3168_v14  ;;  %v1443_v17 = vadd.s32 1, %v2761_v8  ;;  %v1831_v21 = vsel %vm4412_vm0, 0, %v1829_v50  ;;  %v2769_v38 = vadd.s32 4294967169, %v1643_v20 }
 0x148   :  { %v1121_v27 = vsel %vm1119_vm6, %v1120_v62, %v3168_v14  ;;  %v1817_v59 = vor.u32 %v1816_v24, %v1815_v0  ;;  %v1820_v15 = vshll.u32 %v1819_v4, 23  ;;  %v1288_v19 = vadd.s32 536870912, %v1287_v3  ;;  %v2323_v4 = vld [vmem:[%s5082_s5] sm:$0xff] }
 0x149   :  { %v1118_v40 = vsel %vm1116_vm2, %v3166_v16, %v1117_v49  ;;  %vm1444_vm8 = vcmp.gt.s32.totalorder %v1443_v17, 0  ;;  %vm258_vm9 = vcmp.lt.f32.partialorder %v4079_v44, 6.0  ;;  %v1441_v22 = vor.u32 8388608, %v1440_v30  ;;  %2906 = vmatprep.subr.mxu1 %v2323_v4 }
 0x14a   :  { %v1122_v57 = vsel %vm1115_vm7, %v1118_v40, %v1121_v27  ;;  %v1821_v11 = vor.u32 4788187, %v1820_v15  ;;  %v1824_v10 = vcvt.s32.f32 %v1817_v59  ;;  %v4437_v7 = vshrl.u32 %v1288_v19, 30  ;;  %2907 = vmatpush3.msra.mxu1 %v2323_v4 }
 0x14b   :  { %v1123_v34 = vsel %vm1113_vm1, nan, %v1122_v57  ;;  %v1445_v28 = vsel %vm1444_vm8, %v1443_v17, 0  ;;  %v1639_v39 = vand.u32 2147483647, %v4398_v12  ;;  %v4444_v13 = vand.u32 3, %v1831_v21 }
 0x14c   :  { %v1955_v61 = vmul.f32 %v1123_v34, %v1123_v34  ;;  %v1822_v37 = vand.u32 2147483647, %v1821_v11  ;;  %v1290_v41 = vshll.u32 %v4437_v7, 30  ;;  %v1447_v9 = vand.u32 31, %v1445_v28 }
 0x14d   :  { %v1649_v26 = vadd.s32 1, %v2769_v38  ;;  %v4449_v44 = vmul.f32 0.16666667, %v3236_v51  ;;  %v1283_v52 = vadd.s32 %v4405_v45, %v4402_v33  ;;  %v4457_v0 = vshll.u32 %v1441_v22, 8 }
 0x14e   :  { %v1971_v23 = vsel %vm258_vm9, %v1955_v61, 0.0  ;;  %v1825_v31 = vmul.f32 %v1824_v10, %v1822_v37  ;;  %v4453_v5 = vsub.s32 %v1287_v3, %v1290_v41  ;;  %v1448_v48 = vsub.s32 32, %v1447_v9 }
 0x14f   :  { %2049 = vperm.xlu1 %3092, %v1971_v23   ;;  %v1450_v43 = vshll.u32 %v3239_v56, %v1447_v9  ;;  %v1453_v55 = vshll.u32 %v3240_v58, %v1447_v9  ;;  %v1456_v16 = vshll.u32 %v3241_v60, %v1447_v9  ;;  %v4463_v50 = vand.u32 8388607, %v1639_v39 }
 0x150   :  { %v1826_v35 = vxor.u32 2147483648, %v1825_v31  ;;  %v1293_v8 = vsub.s32 0, %v4453_v5  ;;  %v1451_v33 = vshrl.u32 %v3240_v58, %v1448_v48  ;;  %v1454_v45 = vshrl.u32 %v3241_v60, %v1448_v48 }
 0x151   :  { %v1457_v42 = vshrl.u32 %v3242_v63, %v1448_v48  ;;  %vm1650_vm10 = vcmp.gt.s32.totalorder %v1649_v26, 0  ;;  %v1313_v62 = vsub.s32 4, %v4437_v7  ;;  %v1446_v24 = vshrl.u32 %v1445_v28, 5 }
 0x152   :  { %v1827_v20 = vsel %vm1744_vm3, %v1826_v35, %v1825_v31  ;;  %v2754_v14 = vmin.u32 %v1293_v8, %v4453_v5  ;;  %v1449_v49 = vshrl.u32 %v3239_v56, %v1448_v48  ;;  %v1452_v30 = vor.u32 %v1451_v33, %v1450_v43 }
 0x153   :  { %v1830_v3 = vsel %vm4412_vm0, %v4213_v47, %v1827_v20  ;;  %v1455_v17 = vor.u32 %v1454_v45, %v1453_v55  ;;  %v1458_v59 = vor.u32 %v1457_v42, %v1456_v16  ;;  %v1459_v15 = vshll.u32 %v3242_v63, %v1447_v9 }
 0x154   :  { %3169 = vcosq.f32 %v1830_v3  ;;  %v1295_v27 = vclz %v2754_v14  ;;  %v1460_v19 = vshrl.u32 %v3243_v2, %v1448_v48  ;;  %v1462_v40 = vshll.u32 %v3243_v2, %v1447_v9 }
 0x155   :  { %3171 = vsinq.f32 %v1830_v3  ;;  %v1463_v21 = vshrl.u32 %v3244_v18, %v1448_v48  ;;  %vm1229_vm11 = vcmp.lt.s32.totalorder %v4247_v1, 0  ;;  %vm1465_vm12 = vcmp.lt.s32.totalorder %v1446_v24, 1 }
 0x156   :  { %v2755_v53 = vadd.s32 4294967294, %v1295_v27  ;;  %vm1466_vm13 = vcmp.lt.s32.totalorder %v1446_v24, 2  ;;  %vm1467_vm14 = vcmp.lt.s32.totalorder %v1446_v24, 3  ;;  %v1461_v38 = vor.u32 %v1460_v19, %v1459_v15 }
 0x157   :  { %v1464_v57 = vor.u32 %v1463_v21, %v1462_v40  ;;  %vm1468_vm15 = vcmp.lt.s32.totalorder %v1446_v24, 4  ;;  %v1469_v11 = vsel %vm1465_vm12, %v1449_v49, %v1452_v30  ;;  %v1473_v34 = vsel %vm1465_vm12, %v1452_v30, %v1455_v17 }
 0x158   :  { %vm2756_vm1 = vcmp.lt.s32.totalorder %v2755_v53, 0  ;;  %v1470_v10 = vsel %vm1468_vm15, %v1458_v59, 2102212464  ;;  %v1477_v22 = vsel %vm1465_vm12, %v1455_v17, %v1458_v59  ;;  %v1474_v37 = vsel %vm1468_vm15, %v1461_v38, 920167782 }
 0x159   :  { %v1298_v28 = vsel %vm2756_vm1, 0, %v2755_v53  ;;  %v1471_v61 = vsel %vm1467_vm14, %v1455_v17, %v1470_v10  ;;  %v1478_v41 = vsel %vm1468_vm15, %v1464_v57, 1326507024  ;;  %v1651_v31 = vsel %vm1650_vm10, %v1649_v26, 0 }
 0x15a   :  { %v1299_v9 = vsub.s32 32, %v1298_v28  ;;  %v1300_v51 = vshll.u32 %v4453_v5, %v1298_v28  ;;  %v1303_v23 = vsub.s32 4294967266, %v1298_v28  ;;  %vm1836_vm0 = vcmp.lt.s32.totalorder %v4444_v13, 2 }
 0x15b   :  { %v1472_v48 = vsel %vm1466_vm13, %v1469_v11, %v1471_v61  ;;  %v1475_v43 = vsel %vm1467_vm14, %v1458_v59, %v1474_v37  ;;  %v1479_v55 = vsel %vm1467_vm14, %v1461_v38, %v1478_v41  ;;  %v4491_v35 = vshrl.u32 %v1651_v31, 5 }
 0x15c   :  { %vm1834_vm2 = vweird.f32 %v4213_v47  ;;  %v1301_v8 = vshrl.u32 %v1283_v52, %v1299_v9  ;;  %v1304_v16 = vadd.s32 127, %v1303_v23  ;;  %v1476_v33 = vsel %vm1466_vm13, %v1473_v34, %v1475_v43 }
 0x15d   :  { %v1480_v5 = vsel %vm1466_vm13, %v1477_v22, %v1479_v55  ;;  %v4501_v42 = vmul.u32.u64.low %v4457_v0, %v1476_v33  ;;  %v4502_v20 = vmul.u32.u64.high %v4457_v0, %v1476_v33, %v4501_v42  ;;  %vm1837_vm3 = vcmp.eq.s32.totalorder %v4444_v13, 0 }
 0x15e   :  { %v4497_v26 = vmul.u32.u64.low %v4457_v0, %v1480_v5  ;;  %v4498_v45 = vmul.u32.u64.high %v4457_v0, %v1480_v5, %v4497_v26  ;;  %vm4508_vm4 = vcmp.le.f32.partialorder %v1227_v32, 0.7853982  ;;  %v1302_v14 = vor.u32 %v1301_v8, %v1300_v51 }
 0x15f   :  { %v1305_v24 = vshll.u32 %v1304_v16, 23  ;;  %v1653_v4 = vand.u32 31, %v1651_v31  ;;  %vm265_vm5 = vcmp.lt.f32.partialorder %v4181_v36, 6.0  ;;  %vm1840_vm6 = vcmp.eq.s32.totalorder %v4444_v13, 2 }
 0x160   :  { %v4517_v3 = vsel %vm1229_vm11, %v1313_v62, %v4437_v7  ;;  %v1488_v49 = vmul.u32 %v4457_v0, %v1472_v48  ;;  %v1647_v30 = vor.u32 8388608, %v4463_v50  ;;  %v1309_v17 = vcvt.s32.f32 %v1302_v14 }
 0x161   :  { %v1306_v32 = vor.u32 4788187, %v1305_v24  ;;  %v1654_v27 = vsub.s32 32, %v1653_v4  ;;  %v1656_v59 = vshll.u32 %v3239_v56, %v1653_v4  ;;  %vm1671_vm7 = vcmp.lt.s32.totalorder %v4491_v35, 1  ;;  %v3170_v15 = vpop.eup %3169 }
 0x162   :  { %vm1490_vm8 = vc.u32 %v4498_v45, %v4501_v42  ;;  %v1491_v19 = vadd.s32 1, %v4502_v20  ;;  %v1659_v7 = vshll.u32 %v3240_v58, %v1653_v4  ;;  %vm1674_vm9 = vcmp.lt.s32.totalorder %v4491_v35, 4  ;;  %v3172_v0 = vpop.eup %3171 }
 0x163   :  { %v1841_v62 = vxor.u32 2147483648, %v3170_v15  ;;  %v1307_v50 = vand.u32 2147483647, %v1306_v32  ;;  %v1655_v40 = vshrl.u32 %v3239_v56, %v1654_v27  ;;  %v1657_v21 = vshrl.u32 %v3240_v58, %v1654_v27 }
 0x164   :  { %v1838_v53 = vxor.u32 2147483648, %v3172_v0  ;;  %v1492_v38 = vsel %vm1490_vm8, %v1491_v19, %v4502_v20  ;;  %v1660_v57 = vshrl.u32 %v3241_v60, %v1654_v27  ;;  %v1662_v11 = vshll.u32 %v3241_v60, %v1653_v4 }
 0x165   :  { %v1842_v10 = vsel %vm1840_vm6, %v1841_v62, %v3172_v0  ;;  %v1310_v34 = vmul.f32 %v1309_v17, %v1307_v50  ;;  %v1493_v22 = vadd.s32 %v1492_v38, %v1488_v49  ;;  %v1658_v28 = vor.u32 %v1657_v21, %v1656_v59  ;;  %v4581_v62 = vpop.permute.xlu0 %94 }
 0x166   :  { %v1839_v61 = vsel %vm1837_vm3, %v3170_v15, %v1838_v53  ;;  %v1661_v37 = vor.u32 %v1660_v57, %v1659_v7  ;;  %v1663_v41 = vshrl.u32 %v3242_v63, %v1654_v27  ;;  %v1665_v9 = vshll.u32 %v3242_v63, %v1653_v4 }
 0x167   :  { %v1843_v51 = vsel %vm1836_vm0, %v1839_v61, %v1842_v10  ;;  %v1311_v23 = vxor.u32 2147483648, %v1310_v34  ;;  %v1494_v31 = vadd.s32 536870912, %v1493_v22  ;;  %v1666_v48 = vshrl.u32 %v3243_v2, %v1654_v27 }
 0x168   :  { %v1844_v43 = vsel %vm1834_vm2, nan, %v1843_v51  ;;  %v1664_v55 = vor.u32 %v1663_v41, %v1662_v11  ;;  %v1668_v8 = vshll.u32 %v3243_v2, %v1653_v4  ;;  %v1669_v16 = vshrl.u32 %v3244_v18, %v1654_v27 }
 0x169   :  { %v1962_v33 = vmul.f32 %v1844_v43, %v1844_v43  ;;  %v1312_v5 = vsel %vm1229_vm11, %v1311_v23, %v1310_v34  ;;  %v1495_v26 = vshrl.u32 %v1494_v31, 30  ;;  %v1667_v20 = vor.u32 %v1666_v48, %v1665_v9  ;;  %v91_v9 = vld [vmem:[%s5083_s3] sm:$0x1]  ;;  %v100_v51 = vpop.permute.xlu0 %99 }
 0x16a   :  { %v1315_v13 = vsel %vm4508_vm4, %v4247_v1, %v1312_v5  ;;  %v1670_v14 = vor.u32 %v1669_v16, %v1668_v8  ;;  %vm1672_vm10 = vcmp.lt.s32.totalorder %v4491_v35, 2  ;;  %vm1673_vm12 = vcmp.lt.s32.totalorder %v4491_v35, 3 }
 0x16b   :  { %v1978_v47 = vsel %vm265_vm5, %v1962_v33, 0.0  ;;  %3173 = vcosq.f32 %v1315_v13  ;;  %v1496_v24 = vshll.u32 %v1495_v26, 30  ;;  %v1676_v4 = vsel %vm1674_vm9, %v1664_v55, 2102212464 }
 0x16c   :  { %2084 = vperm.xlu0 %3091, %v1978_v47   ;;  %3175 = vsinq.f32 %v1315_v13  ;;  %v1679_v49 = vsel %vm1671_vm7, %v1658_v28, %v1661_v37  ;;  %v1680_v32 = vsel %vm1674_vm9, %v1667_v20, 920167782  ;;  %v1687_v17 = vshll.u32 %v1647_v30, 8 }
 0x16d   :  { %v1316_v27 = vsel %vm4508_vm4, 0, %v4517_v3  ;;  %v4564_v36 = vsub.s32 %v1493_v22, %v1496_v24  ;;  %v1675_v59 = vsel %vm1671_vm7, %v1655_v40, %v1658_v28  ;;  %v1681_v15 = vsel %vm1673_vm12, %v1664_v55, %v1680_v32 }
 0x16e   :  { %v1677_v19 = vsel %vm1673_vm12, %v1661_v37, %v1676_v4  ;;  %v1682_v7 = vsel %vm1672_vm10, %v1679_v49, %v1681_v15  ;;  %v1683_v30 = vsel %vm1671_vm7, %v1661_v37, %v1664_v55  ;;  %v1684_v52 = vsel %vm1674_vm9, %v1670_v14, 1326507024 }
 0x16f   :  { %v1499_v3 = vsub.s32 0, %v4564_v36  ;;  %v1685_v0 = vsel %vm1673_vm12, %v1667_v20, %v1684_v52  ;;  %v1519_v50 = vsub.s32 4, %v1495_v26  ;;  %v1320_v38 = vand.u32 3, %v1316_v27 }
 0x170   :  { %v1686_v40 = vsel %vm1672_vm10, %v1683_v30, %v1685_v0  ;;  %v4585_v21 = vmul.u32.u64.low %v1687_v17, %v1682_v7  ;;  %v4586_v53 = vmul.u32.u64.high %v1687_v17, %v1682_v7, %v4585_v21  ;;  %v1678_v11 = vsel %vm1672_vm10, %v1675_v59, %v1677_v19  ;;  %v4626_v19 = vpop.permute.xlu0 %114 }
 0x171   :  { %v2762_v57 = vmin.u32 %v1499_v3, %v4564_v36  ;;  %v4592_v10 = vmul.u32.u64.low %v1687_v17, %v1686_v40  ;;  %v4593_v34 = vmul.u32.u64.high %v1687_v17, %v1686_v40, %v4592_v10  ;;  %v4596_v22 = vmul.f32 1.5707964, %v4449_v44  ;;  %v4637_v40 = vld [vmem:[%s5084_s2] ss:$0 sm:$0xff] }
 0x172   :  { %vm1319_vm11 = vweird.f32 %v4247_v1  ;;  %vm4601_vm13 = vcmp.le.f32.partialorder %v1433_v29, 0.7853982  ;;  %vm1435_vm14 = vcmp.lt.s32.totalorder %v4396_v25, 0  ;;  %v1694_v37 = vmul.u32 %v1687_v17, %v1678_v11 }
 0x173   :  { %v1501_v61 = vclz %v2762_v57  ;;  %v1520_v35 = vsel %vm1435_vm14, %v1519_v50, %v1495_v26  ;;  %v1697_v41 = vadd.s32 1, %v4586_v53  ;;  %v1848_v44 = vand.u32 2139095040, %v4596_v22 }
 0x174   :  { %vm1321_vm15 = vcmp.lt.s32.totalorder %v1320_v38, 2  ;;  %vm1322_vm1 = vcmp.eq.s32.totalorder %v1320_v38, 0  ;;  %vm1325_vm0 = vcmp.eq.s32.totalorder %v1320_v38, 2  ;;  %vm260_vm2 = vcmp.lt.f32.partialorder %v4222_v46, 6.0 }
 0x175   :  { %v2763_v29 = vadd.s32 4294967294, %v1501_v61  ;;  %v1489_v23 = vadd.s32 %v4501_v42, %v4498_v45  ;;  %vm1696_vm3 = vc.u32 %v4593_v34, %v4585_v21  ;;  %v1849_v31 = vshrl.u32 %v1848_v44, 23  ;;  %v4642_v61 = vpop.permute.xlu1 %104 }
 0x176   :  { %v229_v48 = vlaneseq  ;;  %v1522_v43 = vsel %vm4601_vm13, 0, %v1520_v35  ;;  %v1698_v55 = vsel %vm1696_vm3, %v1697_v41, %v4586_v53  ;;  %v226_v8 = vmul.f32 2.0, %v91_v9 }
 0x177   :  { %vm2764_vm4 = vcmp.lt.s32.totalorder %v2763_v29, 0  ;;  %v1699_v5 = vadd.s32 %v1698_v55, %v1694_v37  ;;  %v1845_v26 = vand.u32 2147483647, %v4596_v22  ;;  %v2777_v20 = vadd.s32 4294967169, %v1849_v31  ;;  %v4657_v55 = vpop.permute.xlu0 %124 }
 0x178   :  { %v3174_v16 = vpop.eup %3173  ;;  %v1504_v33 = vsel %vm2764_vm4, 0, %v2763_v29  ;;  %v230_v32 = vshrl.u32 %v229_v48, 7  ;;  %v4624_v15 = vand.u32 3, %v1522_v43  ;;  %v227_v11 = vmul.f32 %v226_v8, %v91_v9 }
 0x179   :  { %v3176_v13 = vpop.eup %3175  ;;  %v1326_v45 = vxor.u32 2147483648, %v3174_v16  ;;  %v1505_v42 = vsub.s32 32, %v1504_v33  ;;  %v1506_v14 = vshll.u32 %v4564_v36, %v1504_v33  ;;  %v1509_v47 = vsub.s32 4294967266, %v1504_v33 }
 0x17a   :  { %v1323_v24 = vxor.u32 2147483648, %v3176_v13  ;;  %v1700_v4 = vadd.s32 536870912, %v1699_v5  ;;  %v1855_v49 = vadd.s32 1, %v2777_v20  ;;  %v1852_v36 = vand.u32 8388607, %v1845_v26 }
 0x17b   :  { %v1327_v17 = vsel %vm1325_vm0, %v1326_v45, %v3176_v13  ;;  %v1507_v27 = vshrl.u32 %v1489_v23, %v1505_v42  ;;  %v1510_v59 = vadd.s32 127, %v1509_v47  ;;  %v231_v10 = vsub.s32 0, %v230_v32 }
 0x17c   :  { %v1324_v7 = vsel %vm1322_vm1, %v3174_v16, %v1323_v24  ;;  %v4629_v30 = vshrl.u32 %v1700_v4, 30  ;;  %vm1856_vm5 = vcmp.gt.s32.totalorder %v1855_v49, 0  ;;  %v1853_v29 = vor.u32 8388608, %v1852_v36 }
 0x17d   :  { %v1328_v52 = vsel %vm1321_vm15, %v1324_v7, %v1327_v17  ;;  %v1508_v3 = vor.u32 %v1507_v27, %v1506_v14  ;;  %v1511_v0 = vshll.u32 %v1510_v59, 23  ;;  %v1857_v50 = vsel %vm1856_vm5, %v1855_v49, 0  ;;  %v4682_v7 = vpop.permute.xlu0 %134 }
 0x17e   :  { %v1329_v53 = vsel %vm1319_vm11, nan, %v1328_v52  ;;  %v1702_v57 = vshll.u32 %v4629_v30, 30  ;;  %v1859_v41 = vand.u32 31, %v1857_v50  ;;  %v4646_v23 = vshrl.u32 %v1857_v50, 5 }
 0x17f   :  { %v1957_v35 = vmul.f32 %v1329_v53, %v1329_v53  ;;  %v1512_v38 = vor.u32 4788187, %v1511_v0  ;;  %v1515_v37 = vcvt.s32.f32 %v1508_v3  ;;  %v4650_v31 = vsub.f32 %v4581_v62, %v4637_v40 }
 0x180   :  { %v4644_v44 = vsub.s32 %v1699_v5, %v1702_v57  ;;  %v1860_v48 = vsub.s32 32, %v1859_v41  ;;  %v4655_v43 = vsub.f32 %v100_v51, %v4637_v40  ;;  %v1695_v8 = vadd.s32 %v4585_v21, %v4593_v34  ;;  %v4671_v21 = vpop.permute.xlu1 %109 }
 0x181   :  { %v1973_v1 = vsel %vm260_vm2, %v1957_v35, 0.0  ;;  %v1513_v9 = vand.u32 2147483647, %v1512_v38  ;;  %v1862_v33 = vshll.u32 %v3239_v56, %v1859_v41  ;;  %v232_v62 = vrot.slane %v227_v11, %v231_v10 }
 0x182   :  { %2059 = vperm.xlu1 %3092, %v1973_v1   ;;  %v1705_v16 = vsub.s32 0, %v4644_v44  ;;  %v1863_v46 = vshrl.u32 %v3240_v58, %v1860_v48  ;;  %v1865_v20 = vshll.u32 %v3240_v58, %v1859_v41  ;;  %v1866_v13 = vshrl.u32 %v3241_v60, %v1860_v48 }
 0x183   :  { %v1516_v5 = vmul.f32 %v1515_v37, %v1513_v9  ;;  %vm1877_vm6 = vcmp.lt.s32.totalorder %v4646_v23, 1  ;;  %vm1878_vm7 = vcmp.lt.s32.totalorder %v4646_v23, 2  ;;  %v4669_v45 = vshll.u32 %v1853_v29, 8  ;;  %v145_v29 = vpop.permute.xlu0 %144 }
 0x184   :  { %v2770_v51 = vmin.u32 %v1705_v16, %v4644_v44  ;;  %v1861_v42 = vshrl.u32 %v3239_v56, %v1860_v48  ;;  %v1864_v14 = vor.u32 %v1863_v46, %v1862_v33  ;;  %v1868_v47 = vshll.u32 %v3241_v60, %v1859_v41  ;;  %v4693_v3 = vpop.permute.xlu1 %119 }
 0x185   :  { %v1517_v34 = vxor.u32 2147483648, %v1516_v5  ;;  %v1869_v58 = vshrl.u32 %v3242_v63, %v1860_v48  ;;  %v1871_v4 = vshll.u32 %v3242_v63, %v1859_v41  ;;  %v1872_v49 = vshrl.u32 %v3243_v2, %v1860_v48 }
 0x186   :  { %v1707_v24 = vclz %v2770_v51  ;;  %v1867_v17 = vor.u32 %v1866_v13, %v1865_v20  ;;  %v1874_v27 = vshll.u32 %v3243_v2, %v1859_v41  ;;  %v1875_v59 = vshrl.u32 %v3244_v18, %v1860_v48 }
 0x187   :  { %v1518_v32 = vsel %vm1435_vm14, %v1517_v34, %v1516_v5  ;;  %v1870_v36 = vor.u32 %v1869_v58, %v1868_v47  ;;  %v1873_v52 = vor.u32 %v1872_v49, %v1871_v4  ;;  %vm1879_vm8 = vcmp.lt.s32.totalorder %v4646_v23, 3  ;;  %v155_v49 = vpop.permute.xlu0 %154 }
 0x188   :  { %v1521_v56 = vsel %vm4601_vm13, %v4396_v25, %v1518_v32  ;;  %v2771_v60 = vadd.s32 4294967294, %v1707_v24  ;;  %v1876_v63 = vor.u32 %v1875_v59, %v1874_v27  ;;  %vm1880_vm9 = vcmp.lt.s32.totalorder %v4646_v23, 4  ;;  %v4726_v51 = vpop.permute.xlu1 %129 }
 0x189   :  { %3177 = vcosq.f32 %v1521_v56  ;;  %v1881_v2 = vsel %vm1877_vm6, %v1861_v42, %v1864_v14  ;;  %v1882_v18 = vsel %vm1880_vm9, %v1870_v36, 2102212464  ;;  %v1885_v50 = vsel %vm1877_vm6, %v1864_v14, %v1867_v17 }
 0x18a   :  { %3179 = vsinq.f32 %v1521_v56  ;;  %vm2772_vm10 = vcmp.lt.s32.totalorder %v2771_v60, 0  ;;  %v1883_v0 = vsel %vm1879_vm8, %v1867_v17, %v1882_v18  ;;  %v1886_v53 = vsel %vm1880_vm9, %v1873_v52, 920167782 }
 0x18b   :  { %v1710_v28 = vsel %vm2772_vm10, 0, %v2771_v60  ;;  %v1889_v35 = vsel %vm1877_vm6, %v1867_v17, %v1870_v36  ;;  %v1725_v38 = vsub.s32 4, %v4629_v30  ;;  %v1887_v37 = vsel %vm1879_vm8, %v1870_v36, %v1886_v53 }
 0x18c   :  { %v1711_v57 = vsub.s32 32, %v1710_v28  ;;  %v1712_v11 = vshll.u32 %v4644_v44, %v1710_v28  ;;  %v1715_v10 = vsub.s32 4294967266, %v1710_v28  ;;  %v1890_v41 = vsel %vm1880_vm9, %v1876_v63, 1326507024  ;;  %v4759_v60 = vpop.permute.xlu1 %139 }
 0x18d   :  { %3181 = vrcp.f32 %v232_v62  ;;  %v1888_v48 = vsel %vm1878_vm7, %v1885_v50, %v1887_v37  ;;  %v1891_v44 = vsel %vm1879_vm8, %v1873_v52, %v1890_v41  ;;  %v1884_v16 = vsel %vm1878_vm7, %v1881_v2, %v1883_v0 }
 0x18e   :  { %v1713_v1 = vshrl.u32 %v1695_v8, %v1711_v57  ;;  %v1716_v9 = vadd.s32 127, %v1715_v10  ;;  %v1892_v33 = vsel %vm1878_vm7, %v1889_v35, %v1891_v44  ;;  %vm1525_vm12 = vweird.f32 %v4396_v25  ;;  %v160_v10 = vpop.permute.xlu0 %159 }
 0x18f   :  { %v4718_v5 = vmul.u32.u64.low %v4669_v45, %v1888_v48  ;;  %v4719_v46 = vmul.u32.u64.high %v4669_v45, %v1888_v48, %v4718_v5  ;;  %v4723_v20 = vmul.u32.u64.low %v4669_v45, %v1892_v33  ;;  %v4724_v13 = vmul.u32.u64.high %v4669_v45, %v1892_v33, %v4723_v20 }
 0x190   :  { %v1714_v62 = vor.u32 %v1713_v1, %v1712_v11  ;;  %v1717_v8 = vshll.u32 %v1716_v9, 23  ;;  %vm1641_vm11 = vcmp.lt.s32.totalorder %v4398_v12, 0  ;;  %v182_v23 = vsub.f32 %v4626_v19, %v4637_v40 }
 0x191   :  { %v1900_v14 = vmul.u32 %v4669_v45, %v1884_v16  ;;  %v188_v47 = vsub.f32 %v145_v29, %v4637_v40  ;;  %vm4736_vm13 = vcmp.le.f32.partialorder %v1639_v39, 0.7853982  ;;  %v1726_v58 = vsel %vm1641_vm11, %v1725_v38, %v4629_v30 }
 0x192   :  { %v1718_v34 = vor.u32 4788187, %v1717_v8  ;;  %v1721_v42 = vcvt.s32.f32 %v1714_v62  ;;  %v1903_v4 = vadd.s32 1, %v4719_v46  ;;  %v194_v19 = vmul.f32 %v4650_v31, %v4650_v31 }
 0x193   :  { %vm262_vm14 = vcmp.lt.f32.partialorder %v4369_v6, 6.0  ;;  %vm1527_vm15 = vcmp.lt.s32.totalorder %v4624_v15, 2  ;;  %vm1902_vm1 = vc.u32 %v4724_v13, %v4718_v5  ;;  %v195_v39 = vmul.f32 %v4655_v43, %v4655_v43 }
 0x194   :  { %v1719_v45 = vand.u32 2147483647, %v1718_v34  ;;  %vm1528_vm0 = vcmp.eq.s32.totalorder %v4624_v15, 0  ;;  %v1904_v30 = vsel %vm1902_vm1, %v1903_v4, %v4719_v46  ;;  %v198_v32 = vmul.f32 %v182_v23, %v182_v23  ;;  %v4784_v46 = vpop.permute.xlu1 %149 }
 0x195   :  { %v180_v31 = vsub.f32 %v4642_v61, %v4637_v40  ;;  %vm1531_vm2 = vcmp.eq.s32.totalorder %v4624_v15, 2  ;;  %v1728_v59 = vsel %vm4736_vm13, 0, %v1726_v58  ;;  %v1905_v56 = vadd.s32 %v1904_v30, %v1900_v14 }
 0x196   :  { %v3178_v17 = vpop.eup %3177  ;;  %v1722_v27 = vmul.f32 %v1721_v42, %v1719_v45  ;;  %v210_v52 = vsub.f32 0.0, %v194_v19  ;;  %v184_v63 = vsub.f32 %v4657_v55, %v4637_v40  ;;  %v190_v2 = vsub.f32 %v155_v49, %v4637_v40 }
 0x197   :  { %v3180_v36 = vpop.eup %3179  ;;  %v1532_v43 = vxor.u32 2147483648, %v3178_v17  ;;  %v1906_v28 = vadd.s32 536870912, %v1905_v56  ;;  %v211_v0 = vsub.f32 0.0, %v195_v39  ;;  %v214_v53 = vsub.f32 0.0, %v198_v32 }
 0x198   :  { %v1529_v18 = vxor.u32 2147483648, %v3180_v36  ;;  %v1723_v61 = vxor.u32 2147483648, %v1722_v27  ;;  %v196_v57 = vmul.f32 %v180_v31, %v180_v31  ;;  %v204_v11 = vmul.f32 %v188_v47, %v188_v47  ;;  %v4797_v4 = vpop.permute.xlu1 %2014 }
 0x199   :  { %v1533_v50 = vsel %vm1531_vm2, %v1532_v43, %v3180_v36  ;;  %v4770_v55 = vshrl.u32 %v1906_v28, 30  ;;  %v191_v41 = vsub.f32 %v160_v10, %v4637_v40  ;;  %v181_v48 = vsub.f32 %v4671_v21, %v4637_v40 }
 0x19a   :  { %v4764_v35 = vpop.eup %3181  ;;  %v1530_v38 = vsel %vm1528_vm0, %v3178_v17, %v1529_v18  ;;  %v1724_v37 = vsel %vm1641_vm11, %v1723_v61, %v1722_v27  ;;  %v200_v33 = vmul.f32 %v184_v63, %v184_v63  ;;  %v212_v62 = vsub.f32 0.0, %v196_v57 }
 0x19b   :  { %v1534_v29 = vsel %vm1527_vm15, %v1530_v38, %v1533_v50  ;;  %v1727_v1 = vsel %vm4736_vm13, %v4398_v12, %v1724_v37  ;;  %v235_v9 = vmul.f32 %v4764_v35, %v210_v52  ;;  %v1908_v16 = vshll.u32 %v4770_v55, 30 }
 0x19c   :  { %v1535_v44 = vsel %vm1525_vm12, nan, %v1534_v29  ;;  %3183 = vcosq.f32 %v1727_v1  ;;  %v220_v8 = vsub.f32 0.0, %v204_v11  ;;  %v236_v34 = vmul.f32 %v4764_v35, %v211_v0  ;;  %v4814_v18 = vpop.permute.xlu1 %2019 }
 0x19d   :  { %v1959_v15 = vmul.f32 %v1535_v44, %v1535_v44  ;;  %3185 = vsinq.f32 %v1727_v1  ;;  %v4786_v20 = vsub.s32 %v1905_v56, %v1908_v16  ;;  %v1980_v23 = vmul.f32 1.442695, %v235_v9 }
 0x19e   :  { %v4791_v25 = vand.u32 3, %v1728_v59  ;;  %v239_v42 = vmul.f32 %v4764_v35, %v214_v53  ;;  %v197_v14 = vmul.f32 %v181_v48, %v181_v48  ;;  %v206_v24 = vmul.f32 %v190_v2, %v190_v2 }
 0x19f   :  { %v1975_v21 = vsel %vm262_vm14, %v1959_v15, 0.0  ;;  %v1911_v47 = vsub.s32 0, %v4786_v20  ;;  %v183_v58 = vsub.f32 %v4693_v3, %v4637_v40  ;;  %v216_v19 = vsub.f32 0.0, %v200_v33 }
 0x1a0   :  { %2069 = vperm.xlu1 %3092, %v1975_v21   ;;  %v237_v49 = vmul.f32 %v4764_v35, %v212_v62  ;;  %v4801_v6 = vmul.f32 %v4764_v35, %v220_v8  ;;  %3187 = vpow2.f32 %v1980_v23  ;;  %v1982_v39 = vmul.f32 1.442695, %v236_v34  ;;  %v2025_v15 = vpop.permute.xlu1 %2024 }
 0x1a1   :  { %v2778_v45 = vmin.u32 %v1911_v47, %v4786_v20  ;;  %vm1734_vm3 = vcmp.eq.s32.totalorder %v4791_v25, 0  ;;  %vm1737_vm4 = vcmp.eq.s32.totalorder %v4791_v25, 2  ;;  %v1988_v30 = vmul.f32 1.442695, %v239_v42 }
 0x1a2   :  { %v213_v32 = vsub.f32 0.0, %v197_v14  ;;  %vm1731_vm5 = vweird.f32 %v4398_v12  ;;  %v1984_v31 = vmul.f32 1.442695, %v237_v49  ;;  %v222_v17 = vsub.f32 0.0, %v206_v24 }
 0x1a3   :  { %v1913_v3 = vclz %v2778_v45  ;;  %v199_v27 = vmul.f32 %v183_v58, %v183_v58  ;;  %v1901_v59 = vadd.s32 %v4718_v5, %v4724_v13  ;;  %v241_v56 = vmul.f32 %v4764_v35, %v216_v19  ;;  %v165_v13 = vpop.permute.xlu0 %164 }
 0x1a4   :  { %v238_v36 = vmul.f32 %v4764_v35, %v213_v32  ;;  %v207_v43 = vmul.f32 %v191_v41, %v191_v41  ;;  %3189 = vpow2.f32 %v1982_v39  ;;  %v4812_v63 = vmul.f32 %v4764_v35, %v222_v17 }
 0x1a5   :  { %v2779_v52 = vadd.s32 4294967294, %v1913_v3  ;;  %v215_v2 = vsub.f32 0.0, %v199_v27  ;;  %vm264_vm6 = vcmp.lt.f32.partialorder %v4388_v54, 6.0  ;;  %3191 = vpow2.f32 %v1988_v30 }
 0x1a6   :  { %v1986_v61 = vmul.f32 1.442695, %v238_v36  ;;  %v223_v28 = vsub.f32 0.0, %v207_v43  ;;  %v185_v5 = vsub.f32 %v4726_v51, %v4637_v40  ;;  %3193 = vpow2.f32 %v1984_v31 }
 0x1a7   :  { %vm2780_vm7 = vcmp.lt.s32.totalorder %v2779_v52, 0  ;;  %v240_v0 = vmul.f32 %v4764_v35, %v215_v2  ;;  %v192_v50 = vsub.f32 %v165_v13, %v4637_v40  ;;  %v186_v11 = vsub.f32 %v4682_v7, %v4637_v40  ;;  %v170_v23 = vpop.permute.xlu0 %169  ;;  %v2547_v13 = vld [vmem:[%s5087_s6 + $0x68] sm:$0xff] }
 0x1a8   :  { %v1916_v57 = vsel %vm2780_vm7, 0, %v2779_v52  ;;  %3195 = vpow2.f32 %v1986_v61  ;;  %v4824_v10 = vmul.f32 %v4764_v35, %v223_v28  ;;  %vm1733_vm8 = vcmp.lt.s32.totalorder %v4791_v25, 2 }
 0x1a9   :  { %v3184_v53 = vpop.eup %3183  ;;  %v1917_v41 = vsub.s32 32, %v1916_v57  ;;  %v1918_v51 = vshll.u32 %v4786_v20, %v1916_v57  ;;  %v1921_v29 = vsub.s32 4294967266, %v1916_v57  ;;  %v1992_v9 = vmul.f32 1.442695, %v241_v56 }
 0x1aa   :  { %v3186_v38 = vpop.eup %3185  ;;  %v1738_v37 = vxor.u32 2147483648, %v3184_v53  ;;  %v1990_v48 = vmul.f32 1.442695, %v240_v0  ;;  %v201_v33 = vmul.f32 %v185_v5, %v185_v5  ;;  %v208_v8 = vmul.f32 %v192_v50, %v192_v50 }
 0x1ab   :  { %v1735_v1 = vxor.u32 2147483648, %v3186_v38  ;;  %v1919_v16 = vshrl.u32 %v1901_v59, %v1917_v41  ;;  %v1922_v7 = vadd.s32 127, %v1921_v29  ;;  %v187_v20 = vsub.f32 %v4759_v60, %v4637_v40  ;;  %v2030_v59 = vpop.permute.xlu1 %2029  ;;  %v2035_v5 = vpop.permute.xlu0 %2034  ;;  %v2110_v41 = vld [vmem:[%s5086_s1 + $0x10] sm:$0xff] }
 0x1ac   :  { %v1739_v44 = vsel %vm1737_vm4, %v1738_v37, %v3186_v38  ;;  %3197 = vpow2.f32 %v1990_v48  ;;  %v202_v14 = vmul.f32 %v186_v11, %v186_v11  ;;  %v224_v58 = vsub.f32 0.0, %v208_v8 }
 0x1ad   :  { %v1736_v62 = vsel %vm1734_vm3, %v3184_v53, %v1735_v1  ;;  %v1920_v21 = vor.u32 %v1919_v16, %v1918_v51  ;;  %v1923_v42 = vshll.u32 %v1922_v7, 23  ;;  %v3188_v47 = vpop.eup %3187  ;;  %3199 = vpow2.f32 %v1992_v9 }
 0x1ae   :  { %v1740_v34 = vsel %vm1733_vm8, %v1736_v62, %v1739_v44  ;;  %v203_v19 = vmul.f32 %v187_v20, %v187_v20  ;;  %v193_v39 = vsub.f32 %v170_v23, %v4637_v40  ;;  %v217_v30 = vsub.f32 0.0, %v201_v33  ;;  %v2111_v33 = vld [vmem:[%s5086_s1 + $0x18] sm:$0xff]  ;;  %v2112_v62 = vld [vmem:[%s5086_s1 + $0x20] sm:$0xff] }
 0x1af   :  { %v1741_v24 = vsel %vm1731_vm5, nan, %v1740_v34  ;;  %v1924_v25 = vor.u32 4788187, %v1923_v42  ;;  %v1927_v45 = vcvt.s32.f32 %v1920_v21  ;;  %v4838_v60 = vmul.f32 %v4764_v35, %v224_v58  ;;  %v2040_v1 = vpop.permute.xlu1 %2039  ;;  %v2045_v7 = vpop.permute.xlu0 %2044  ;;  %v2113_v21 = vld [vmem:[%s5086_s1 + $0x28] sm:$0xff]  ;;  %v2114_v42 = vld [vmem:[%s5086_s1 + $0x30] sm:$0xff] }
 0x1b0   :  { %v1961_v49 = vmul.f32 %v1741_v24, %v1741_v24  ;;  %v219_v32 = vsub.f32 0.0, %v203_v19  ;;  %v189_v3 = vsub.f32 %v4784_v46, %v4637_v40  ;;  %v209_v17 = vmul.f32 %v193_v39, %v193_v39  ;;  %v2124_v40 = vld [vmem:[%s5085_s4] sm:$0xf]  ;;  %v2117_v58 = vld [vmem:[%s5086_s1 + $0x48] sm:$0xff] }
 0x1b1   :  { %v1925_v31 = vand.u32 2147483647, %v1924_v25  ;;  %v2092_v27 = vmul.f32 %v3188_v47, %v4797_v4  ;;  %v3190_v56 = vpop.eup %3189  ;;  %v218_v36 = vsub.f32 0.0, %v202_v14  ;;  %vm2324_vm9 = vcmask 64512   ;;  %v2108_v46 = vld [vmem:[%s5086_s1] sm:$0xff]  ;;  %v2115_v14 = vld [vmem:[%s5086_s1 + $0x38] sm:$0xff] }
 0x1b2   :  { %v1977_v12 = vsel %vm264_vm6, %v1961_v49, 0.0  ;;  %v4846_v43 = vmul.f32 %v4764_v35, %v219_v32  ;;  %v205_v52 = vmul.f32 %v189_v3, %v189_v3  ;;  %v3192_v2 = vpop.eup %3191  ;;  %v225_v28 = vsub.f32 0.0, %v209_v17  ;;  %v2116_v24 = vld [vmem:[%s5086_s1 + $0x40] sm:$0xff]  ;;  %v2118_v49 = vld [vmem:[%s5086_s1 + $0x50] sm:$0xff]  ;;  %v2119_v3 = vld [vmem:[%s5086_s1 + $0x58] sm:$0xff] }
 0x1b3   :  { %2079 = vperm.xlu1 %3092, %v1977_v12   ;;  %v1928_v61 = vmul.f32 %v1927_v45, %v1925_v31  ;;  %v2093_v54 = vmul.f32 %v3190_v56, %v4814_v18  ;;  %v3194_v4 = vpop.eup %3193  ;;  %vm4857_vm10 = vcmp.le.f32.partialorder %v1845_v26, 0.7853982  ;;  %vm1847_vm12 = vcmp.lt.s32.totalorder %v4596_v22, 0  ;;  %2908 = vmatprep.mubr.msk.f32.mxu1 %vm2324_vm9, %v2092_v27  ;;  %v2109_v26 = vld [vmem:[%s5086_s1 + $0x8] sm:$0xff]  ;;  %v2055_v32 = vpop.permute.xlu0 %2054  ;;  %v2120_v27 = vld [vmem:[%s5086_s1 + $0x60] sm:$0xff] }
 0x1b4   :  { %v242_v0 = vmul.f32 %v4764_v35, %v217_v30  ;;  %v221_v18 = vsub.f32 0.0, %v205_v52  ;;  %v4865_v57 = vmul.f32 %v4764_v35, %v225_v28  ;;  %vm2174_vm11 = vcmask 1043456   ;;  %v2121_v28 = vld [vmem:[%s5086_s1 + $0x68] sm:$0xff] }
 0x1b5   :  { %v3196_v50 = vpop.eup %3195  ;;  %v1929_v53 = vxor.u32 2147483648, %v1928_v61  ;;  %vm2125_vm13 = vcmask 31744   ;;  %2909 = vmatmul.mubr.msk.f32.vlgmr.msra.gmra.mxu1 %vm2324_vm9, %v2093_v54  ;;  %v243_v11 = vmul.f32 %v4764_v35, %v218_v36  ;;  %2880 = vmatprep.subr.msk.mxu0 %vm2174_vm11, %v2124_v40  ;;  %v2094_v37 = vmul.f32 %v3194_v4, %v2025_v15  ;;  %v2123_v4 = vld [vmem:[%s5086_s1 + $0x78] sm:$0xff] }
 0x1b6   :  { %v4873_v38 = vmul.f32 %v4764_v35, %v221_v18  ;;  %2882 = vmatprep.mubr.msk.f32.mxu0 %vm2125_vm13, %v2108_v46  ;;  %2881 = vmatpush3.msk.msra.mxu0 %vm2174_vm11, %v2124_v40  ;;  %v2095_v29 = vmul.f32 %v3196_v50, %v2030_v59  ;;  %v1931_v9 = vsub.s32 4, %v4770_v55  ;;  %v2096_v48 = vmul.f32 %v3192_v2, %v2035_v5  ;;  %v2122_v5 = vld [vmem:[%s5086_s1 + $0x70] sm:$0xff]  ;;  %v2549_v40 = vld [vmem:[%s5087_s6 + $0x78] sm:$0xff] }
 0x1b7   :  { %v1930_v51 = vsel %vm1847_vm12, %v1929_v53, %v1928_v61  ;;  %2883 = vmatmul.mubr.msk.f32.vlgmr.msra.gmra.mxu0 %vm2125_vm13, %v2109_v26  ;;  %2911 = vmatprep.mubr.msk.f32.mxu1 %vm2324_vm9, %v2094_v37  ;;  %v1994_v16 = vmul.f32 1.442695, %v242_v0  ;;  %v1996_v15 = vmul.f32 1.442695, %v243_v11  ;;  %vm1937_vm0 = vweird.f32 %v4596_v22  ;;  %v2548_v46 = vld [vmem:[%s5087_s6 + $0x70] sm:$0xff]  ;;  %v2546_v0 = vld [vmem:[%s5087_s6 + $0x60] sm:$0xff] }
 0x1b8   :  { %v1933_v35 = vsel %vm4857_vm10, %v4596_v22, %v1930_v51  ;;  %2885 = vmatprep.mubr.msk.f32.mxu0 %vm2125_vm13, %v2110_v41  ;;  %v1932_v23 = vsel %vm1847_vm12, %v1931_v9, %v4770_v55  ;;  %v3237_v22 = vld [vmem:[%s5081_s0 + $0x78] sm:$0xff]  ;;  %2932 = vmatprep.subr.mxu0 %v2549_v40  ;;  %v2544_v50 = vld [vmem:[%s5087_s6 + $0x50] sm:$0xff]  ;;  %v2543_v53 = vld [vmem:[%s5087_s6 + $0x48] sm:$0xff]  ;;  %v2000_v9 = vmul.f32 1.442695, %v4801_v6  ;;  %vm2695_vm3 = vcmask 130048  }
 0x1b9   :  { %v3198_v44 = vpop.eup %3197  ;;  %3201 = vcosq.f32 %v1933_v35  ;;  %2912 = vmatmul.mubr.msk.f32.gmra.mxu1 %vm2324_vm9, %v2095_v29  ;;  %v1934_v55 = vsel %vm4857_vm10, 0, %v1932_v23  ;;  %vm266_vm2 = vcmp.lt.f32.partialorder %v3237_v22, 6.0  ;;  %2933 = vmatpush3.msra.mxu0 %v2549_v40  ;;  %v2545_v18 = vld [vmem:[%s5087_s6 + $0x58] sm:$0xff]  ;;  %v2542_v26 = vld [vmem:[%s5087_s6 + $0x40] sm:$0xff]  ;;  %v2540_v37 = vld [vmem:[%s5087_s6 + $0x30] sm:$0xff] }
 0x1ba   :  { %3203 = vsinq.f32 %v1933_v35  ;;  %v2097_v8 = vmul.f32 %v3198_v44, %v2040_v1  ;;  %2914 = vmatprep.mubr.msk.f32.mxu1 %vm2324_vm9, %v2096_v48  ;;  %v3200_v20 = vpop.eup %3199  ;;  %v1938_v47 = vand.u32 3, %v1934_v55  ;;  %2988 = vmatprep.subr.mxu1 %v2549_v40  ;;  %v2541_v11 = vld [vmem:[%s5087_s6 + $0x38] sm:$0xff]  ;;  %v2539_v41 = vld [vmem:[%s5087_s6 + $0x28] sm:$0xff]  ;;  %v2538_v51 = vld [vmem:[%s5087_s6 + $0x20] sm:$0xff]  ;;  %v1998_v1 = vmul.f32 1.442695, %v4846_v43  ;;  %v2065_v48 = vpop.permute.xlu0 %2064 }
 0x1bb   :  { %v2098_v34 = vmul.f32 %v3200_v20, %v2045_v7  ;;  %2886 = vmatmul.mubr.msk.f32.gmra.mxu0 %vm2125_vm13, %v2111_v33  ;;  %3205 = vpow2.f32 %v1994_v16  ;;  %2934 = vmatprep.subr.mxu0 %v2548_v46  ;;  %v2537_v29 = vld [vmem:[%s5087_s6 + $0x18] sm:$0xff]  ;;  %v2536_v35 = vld [vmem:[%s5087_s6 + $0x10] sm:$0xff]  ;;  %v2535_v44 = vld [vmem:[%s5087_s6 + $0x8] sm:$0xff]  ;;  %v2006_v55 = vmul.f32 1.442695, %v4824_v10 }
 0x1bc   :  { %2888 = vmatprep.mubr.msk.f32.mxu0 %vm2125_vm13, %v2112_v62  ;;  %3207 = vpow2.f32 %v1996_v15  ;;  %vm1943_vm14 = vcmp.eq.s32.totalorder %v1938_v47, 2  ;;  %vm1940_vm15 = vcmp.eq.s32.totalorder %v1938_v47, 0  ;;  %vm1939_vm1 = vcmp.lt.s32.totalorder %v1938_v47, 2  ;;  %3004 = vmatpush3.msra.mxu1 %v2549_v40  ;;  %v2534_v43 = vld [vmem:[%s5087_s6] sm:$0xff] }
 0x1bd   :  { %2915 = vmatmul.mubr.msk.f32.gmra.mxu1 %vm2324_vm9, %v2097_v8  ;;  %2989 = vmatprep.subr.mxu1 %v2548_v46  ;;  %3209 = vpow2.f32 %v1998_v1  ;;  %v2002_v62 = vmul.f32 1.442695, %v4873_v38  ;;  %v2004_v8 = vmul.f32 1.442695, %v4812_v63  ;;  %v2008_v47 = vmul.f32 1.442695, %v4838_v60 }
 0x1be   :  { %2917 = vmatprep.mubr.msk.f32.mxu1 %vm2324_vm9, %v2098_v34  ;;  %2935 = vmatpush3.msra.mxu0 %v2548_v46  ;;  %3211 = vpow2.f32 %v2000_v9  ;;  %v2075_v20 = vpop.permute.xlu0 %2074  ;;  %v2010_v10 = vmul.f32 1.442695, %v4865_v57 }
 0x1bf   :  { %2889 = vmatmul.mubr.msk.f32.gmra.mxu0 %vm2125_vm13, %v2113_v21  ;;  %3005 = vmatpush3.msra.mxu1 %v2548_v46  ;;  %3213 = vpow2.f32 %v2002_v62 }
 0x1c0   :  { %2891 = vmatprep.mubr.msk.f32.mxu0 %vm2125_vm13, %v2114_v42  ;;  %2936 = vmatprep.subr.mxu0 %v2547_v13  ;;  %3215 = vpow2.f32 %v2004_v8 }
 0x1c1   :  { %2990 = vmatprep.subr.mxu1 %v2547_v13  ;;  %2937 = vmatpush3.msra.mxu0 %v2547_v13  ;;  %3217 = vpow2.f32 %v2006_v55 }
 0x1c2   :  { %3006 = vmatpush3.msra.mxu1 %v2547_v13  ;;  %2938 = vmatprep.subr.mxu0 %v2546_v0  ;;  %3219 = vpow2.f32 %v2008_v47 }
 0x1c3   :  { %2892 = vmatmul.mubr.msk.f32.gmra.mxu0 %vm2125_vm13, %v2115_v14  ;;  %2991 = vmatprep.subr.mxu1 %v2546_v0  ;;  %3221 = vpow2.f32 %v2010_v10 }
 0x1c4   :  { %2894 = vmatprep.mubr.msk.f32.mxu0 %vm2125_vm13, %v2116_v24  ;;  %2939 = vmatpush3.msra.mxu0 %v2546_v0 }
 0x1c5   :  { %3007 = vmatpush3.msra.mxu1 %v2546_v0  ;;  %2940 = vmatprep.subr.mxu0 %v2545_v18 }
 0x1c6   :  { %v3202_v19 = vpop.eup %3201  ;;  %2992 = vmatprep.subr.mxu1 %v2545_v18  ;;  %2941 = vmatpush3.msra.mxu0 %v2545_v18 }
 0x1c7   :  { %v3204_v25 = vpop.eup %3203  ;;  %v1944_v45 = vxor.u32 2147483648, %v3202_v19  ;;  %2895 = vmatmul.mubr.msk.f32.gmra.mxu0 %vm2125_vm13, %v2117_v58  ;;  %3008 = vmatpush3.msra.mxu1 %v2545_v18 }
 0x1c8   :  { %v1941_v39 = vxor.u32 2147483648, %v3204_v25  ;;  %2897 = vmatprep.mubr.msk.f32.mxu0 %vm2125_vm13, %v2118_v49  ;;  %v3206_v12 = vpop.eup %3205  ;;  %2942 = vmatprep.subr.mxu0 %v2544_v50 }
 0x1c9   :  { %v1945_v30 = vsel %vm1943_vm14, %v1944_v45, %v3204_v25  ;;  %v3208_v59 = vpop.eup %3207  ;;  %2993 = vmatprep.subr.mxu1 %v2544_v50  ;;  %2943 = vmatpush3.msra.mxu0 %v2544_v50 }
 0x1ca   :  { %v1942_v31 = vsel %vm1940_vm15, %v3202_v19, %v1941_v39  ;;  %v2050_v17 = vpop.permute.xlu1 %2049  ;;  %v2100_v2 = vmul.f32 %v3208_v59, %v2055_v32  ;;  %3009 = vmatpush3.msra.mxu1 %v2544_v50  ;;  %2944 = vmatprep.subr.mxu0 %v2543_v53  ;;  %v3210_v6 = vpop.eup %3209 }
 0x1cb   :  { %v1946_v56 = vsel %vm1939_vm1, %v1942_v31, %v1945_v30  ;;  %v2099_v36 = vmul.f32 %v3206_v12, %v2050_v17  ;;  %2898 = vmatmul.mubr.msk.f32.gmra.mxu0 %vm2125_vm13, %v2119_v3  ;;  %2994 = vmatprep.subr.mxu1 %v2543_v53  ;;  %v3212_v7 = vpop.eup %3211 }
 0x1cc   :  { %v1947_v52 = vsel %vm1937_vm0, nan, %v1946_v56  ;;  %2900 = vmatprep.mubr.msk.f32.mxu0 %vm2125_vm13, %v2120_v27  ;;  %2945 = vmatpush3.msra.mxu0 %v2543_v53  ;;  %v2102_v15 = vmul.f32 %v3212_v7, %v2065_v48  ;;  %v3214_v23 = vpop.eup %3213 }
 0x1cd   :  { %v1963_v61 = vmul.f32 %v1947_v52, %v1947_v52  ;;  %2918 = vmatmul.mubr.msk.f32.gmra.mxu1 %vm2324_vm9, %v2099_v36  ;;  %2946 = vmatprep.subr.mxu0 %v2542_v26  ;;  %v3216_v21 = vpop.eup %3215 }
 0x1ce   :  { %2920 = vmatprep.mubr.msk.f32.mxu1 %vm2324_vm9, %v2100_v2  ;;  %3010 = vmatpush3.msra.mxu1 %v2543_v53  ;;  %v2104_v14 = vmul.f32 %v3216_v21, %v2075_v20  ;;  %v3218_v63 = vpop.eup %3217 }
 0x1cf   :  { %v1979_v54 = vsel %vm266_vm2, %v1963_v61, 0.0  ;;  %2901 = vmatmul.mubr.msk.f32.gmra.mxu0 %vm2125_vm13, %v2121_v28  ;;  %2995 = vmatprep.subr.mxu1 %v2542_v26  ;;  %v3220_v58 = vpop.eup %3219 }
 0x1d0   :  { %2089 = vperm.xlu1 %3092, %v1979_v54   ;;  %2903 = vmatprep.mubr.msk.f32.mxu0 %vm2125_vm13, %v2122_v5  ;;  %v3222_v60 = vpop.eup %3221 }
 0x1d1   :  { %2947 = vmatpush3.msra.mxu0 %v2542_v26  ;;  %3011 = vmatpush3.msra.mxu1 %v2542_v26 }
 0x1d2   :  { %2948 = vmatprep.subr.mxu0 %v2541_v11  ;;  %2996 = vmatprep.subr.mxu1 %v2541_v11 }
 0x1d3   :  { %2904 = vmatmul.mubr.msk.f32.gmra.mxu0 %vm2125_vm13, %v2123_v4  ;;  %3012 = vmatpush3.msra.mxu1 %v2541_v11 }
 0x1d4   :  { %2949 = vmatpush3.msra.mxu0 %v2541_v11  ;;  %2997 = vmatprep.subr.mxu1 %v2540_v37 }
 0x1d5   :  { %2950 = vmatprep.subr.mxu0 %v2540_v37  ;;  %3013 = vmatpush3.msra.mxu1 %v2540_v37 }
 0x1d6   :  { %2951 = vmatpush3.msra.mxu0 %v2540_v37  ;;  %2998 = vmatprep.subr.mxu1 %v2539_v41 }
 0x1d7   :  { %2952 = vmatprep.subr.mxu0 %v2539_v41  ;;  %3014 = vmatpush3.msra.mxu1 %v2539_v41 }
 0x1d8   :  { %2953 = vmatpush3.msra.mxu0 %v2539_v41  ;;  %2999 = vmatprep.subr.mxu1 %v2538_v51 }
 0x1d9   :  { %2954 = vmatprep.subr.mxu0 %v2538_v51  ;;  %3015 = vmatpush3.msra.mxu1 %v2538_v51 }
 0x1da   :  { %2955 = vmatpush3.msra.mxu0 %v2538_v51  ;;  %3000 = vmatprep.subr.mxu1 %v2537_v29 }
 0x1db   :  { %2956 = vmatprep.subr.mxu0 %v2537_v29  ;;  %3016 = vmatpush3.msra.mxu1 %v2537_v29 }
 0x1dc   :  { %2957 = vmatpush3.msra.mxu0 %v2537_v29  ;;  %3001 = vmatprep.subr.mxu1 %v2536_v35 }
 0x1dd   :  { %2958 = vmatprep.subr.mxu0 %v2536_v35  ;;  %3017 = vmatpush3.msra.mxu1 %v2536_v35 }
 0x1de   :  { %2959 = vmatpush3.msra.mxu0 %v2536_v35  ;;  %3002 = vmatprep.subr.mxu1 %v2535_v44 }
 0x1df   :  { %2960 = vmatprep.subr.mxu0 %v2535_v44  ;;  %3018 = vmatpush3.msra.mxu1 %v2535_v44 }
 0x1e0   :  { %2961 = vmatpush3.msra.mxu0 %v2535_v44  ;;  %3003 = vmatprep.subr.mxu1 %v2534_v43 }
 0x1e1   :  { %2962 = vmatprep.subr.mxu0 %v2534_v43  ;;  %3019 = vmatpush3.msra.mxu1 %v2534_v43 }
 0x1e2   :  { %2963 = vmatpush3.msra.mxu0 %v2534_v43 }
 0x1e7   :  { %v2085_v38 = vpop.permute.xlu0 %2084 }
 0x1e8   :  { %v2106_v49 = vmul.f32 %v3220_v58, %v2085_v38 }
 0x1fd   :  { %v2060_v16 = vpop.permute.xlu1 %2059 }
 0x1fe   :  { %v2101_v33 = vmul.f32 %v3210_v6, %v2060_v16 }
 0x200   :  { %2921 = vmatmul.mubr.msk.f32.gmra.mxu1 %vm2324_vm9, %v2101_v33 }
 0x201   :  { %2923 = vmatprep.mubr.msk.f32.mxu1 %vm2324_vm9, %v2102_v15 }
 0x21b   :  { %v2070_v34 = vpop.permute.xlu1 %2069 }
 0x21c   :  { %v2103_v42 = vmul.f32 %v3214_v23, %v2070_v34 }
 0x21e   :  { %2924 = vmatmul.mubr.msk.f32.gmra.mxu1 %vm2324_vm9, %v2103_v42 }
 0x21f   :  { %2926 = vmatprep.mubr.msk.f32.mxu1 %vm2324_vm9, %v2104_v14 }
 0x22e   :  { %v2080_v24 = vpop.permute.xlu1 %2079 }
 0x22f   :  { %v2105_v19 = vmul.f32 %v3218_v63, %v2080_v24 }
 0x231   :  { %2927 = vmatmul.mubr.msk.f32.gmra.mxu1 %vm2324_vm9, %v2105_v19 }
 0x232   :  { %2929 = vmatprep.mubr.msk.f32.mxu1 %vm2324_vm9, %v2106_v49 }
 0x24b   :  { %v2090_v25 = vpop.permute.xlu1 %2089 }
 0x24c   :  { %v2107_v45 = vmul.f32 %v3222_v60, %v2090_v25 }
 0x24e   :  { %2930 = vmatmul.mubr.msk.f32.gmra.mxu1 %vm2324_vm9, %v2107_v45 }
 0x275   :  { %v2910_v39 = vpop.f32.mrf.mxu1 }
 0x277   :  { %v2439_v30 = vpop.f32.mrf.mxu1  ;;  %v2884_v32 = vpop.f32.mrf.mxu0 }
 0x278   :  { %v2519_v27 = vmul.f32 %v2910_v39, %v2884_v32 }
 0x279   :  { %v2913_v3 = vpop.f32.mrf.mxu1  ;;  %v2244_v12 = vpop.f32.mrf.mxu0 }
 0x27a   :  { %v2518_v31 = vmul.f32 %v2439_v30, %v2244_v12 }
 0x27b   :  { %v2449_v17 = vpop.f32.mrf.mxu1  ;;  %v2887_v59 = vpop.f32.mrf.mxu0 }
 0x27c   :  { %2964 = vmatprep.mubr.f32.mxu0 %v2518_v31  ;;  %v2521_v22 = vmul.f32 %v2913_v3, %v2887_v59 }
 0x27d   :  { %v2916_v56 = vpop.f32.mrf.mxu1  ;;  %2965 = vmatmul.mubr.f32.vlgmr.msra.gmra.mxu0 %v2519_v27  ;;  %v2254_v36 = vpop.f32.mrf.mxu0 }
 0x27e   :  { %v2520_v57 = vmul.f32 %v2449_v17, %v2254_v36 }
 0x27f   :  { %v2890_v52 = vpop.f32.mrf.mxu0  ;;  %v2459_v2 = vpop.f32.mrf.mxu1 }
 0x280   :  { %2967 = vmatprep.mubr.f32.mxu0 %v2520_v57  ;;  %v2523_v5 = vmul.f32 %v2916_v56, %v2890_v52 }
 0x281   :  { %v2264_v61 = vpop.f32.mrf.mxu0  ;;  %2968 = vmatmul.mubr.f32.gmra.mxu0 %v2521_v22 }
 0x282   :  { %v2522_v28 = vmul.f32 %v2459_v2, %v2264_v61 }
 0x283   :  { %v2893_v54 = vpop.f32.mrf.mxu0 }
 0x284   :  { %2970 = vmatprep.mubr.f32.mxu0 %v2522_v28 }
 0x285   :  { %2971 = vmatmul.mubr.f32.gmra.mxu0 %v2523_v5  ;;  %v2274_v46 = vpop.f32.mrf.mxu0 }
 0x287   :  { %v2896_v18 = vpop.f32.mrf.mxu0 }
 0x289   :  { %v2284_v53 = vpop.f32.mrf.mxu0 }
 0x28b   :  { %v2899_v41 = vpop.f32.mrf.mxu0 }
 0x28d   :  { %v2919_v40 = vpop.f32.mrf.mxu1  ;;  %v2294_v29 = vpop.f32.mrf.mxu0 }
 0x28e   :  { %v2525_v0 = vmul.f32 %v2919_v40, %v2893_v54 }
 0x28f   :  { %v2469_v4 = vpop.f32.mrf.mxu1  ;;  %v2902_v48 = vpop.f32.mrf.mxu0 }
 0x290   :  { %v2524_v13 = vmul.f32 %v2469_v4, %v2274_v46 }
 0x291   :  { %v2304_v43 = vpop.f32.mrf.mxu0 }
 0x292   :  { %2973 = vmatprep.mubr.f32.mxu0 %v2524_v13 }
 0x293   :  { %2974 = vmatmul.mubr.f32.gmra.mxu0 %v2525_v0  ;;  %v2905_v33 = vpop.f32.mrf.mxu0 }
 0x295   :  { %v2314_v62 = vpop.f32.mrf.mxu0 }
 0x2c0   :  { %v2922_v50 = vpop.f32.mrf.mxu1 }
 0x2c1   :  { %v2527_v37 = vmul.f32 %v2922_v50, %v2896_v18 }
 0x2c2   :  { %v2479_v26 = vpop.f32.mrf.mxu1 }
 0x2c3   :  { %v2526_v11 = vmul.f32 %v2479_v26, %v2284_v53 }
 0x2c5   :  { %2976 = vmatprep.mubr.f32.mxu1 %v2526_v11 }
 0x2c6   :  { %2977 = vmatmul.mubr.f32.vlgmr.msra.gmra.mxu1 %v2527_v37 }
 0x2de   :  { %v2925_v51 = vpop.f32.mrf.mxu1 }
 0x2df   :  { %v2529_v35 = vmul.f32 %v2925_v51, %v2899_v41 }
 0x2e0   :  { %v2489_v1 = vpop.f32.mrf.mxu1 }
 0x2e1   :  { %v2528_v9 = vmul.f32 %v2489_v1, %v2294_v29 }
 0x2e3   :  { %2979 = vmatprep.mubr.f32.mxu1 %v2528_v9 }
 0x2e4   :  { %2980 = vmatmul.mubr.f32.gmra.mxu1 %v2529_v35 }
 0x2f1   :  { %v2928_v44 = vpop.f32.mrf.mxu1 }
 0x2f2   :  { %v2531_v7 = vmul.f32 %v2928_v44, %v2902_v48 }
 0x2f3   :  { %v2499_v6 = vpop.f32.mrf.mxu1 }
 0x2f4   :  { %v2530_v16 = vmul.f32 %v2499_v6, %v2304_v43 }
 0x2f6   :  { %2982 = vmatprep.mubr.f32.mxu1 %v2530_v16 }
 0x2f7   :  { %2983 = vmatmul.mubr.f32.gmra.mxu1 %v2531_v7 }
 0x30e   :  { %v2931_v15 = vpop.f32.mrf.mxu1 }
 0x30f   :  { %v2533_v23 = vmul.f32 %v2931_v15, %v2905_v33 }
 0x310   :  { %v2509_v8 = vpop.f32.mrf.mxu1 }
 0x311   :  { %v2532_v20 = vmul.f32 %v2509_v8, %v2314_v62 }
 0x313   :  { %2985 = vmatprep.mubr.f32.mxu1 %v2532_v20 }
 0x314   :  { %2986 = vmatmul.mubr.f32.gmra.mxu1 %v2533_v23 }
 0x33d   :  { %v2966_v34 = vpop.f32.mrf.mxu0 }
 0x33e   :  { %2697 = vst.msk [vmem:[%s5088_s7 + $0x8] sm:$0xff] %vm2695_vm3, %v2966_v34 }
 0x33f   :  { %v2616_v21 = vpop.f32.mrf.mxu0 }
 0x340   :  { %2696 = vst.msk [vmem:[%s5088_s7] sm:$0xff] %vm2695_vm3, %v2616_v21 }
 0x341   :  { %v2969_v42 = vpop.f32.mrf.mxu0 }
 0x342   :  { %2699 = vst.msk [vmem:[%s5088_s7 + $0x18] sm:$0xff] %vm2695_vm3, %v2969_v42 }
 0x343   :  { %v2626_v55 = vpop.f32.mrf.mxu0 }
 0x344   :  { %2698 = vst.msk [vmem:[%s5088_s7 + $0x10] sm:$0xff] %vm2695_vm3, %v2626_v55 }
 0x345   :  { %v2972_v14 = vpop.f32.mrf.mxu0 }
 0x346   :  { %2701 = vst.msk [vmem:[%s5088_s7 + $0x28] sm:$0xff] %vm2695_vm3, %v2972_v14 }
 0x347   :  { %v2636_v47 = vpop.f32.mrf.mxu0 }
 0x348   :  { %2700 = vst.msk [vmem:[%s5088_s7 + $0x20] sm:$0xff] %vm2695_vm3, %v2636_v47 }
 0x353   :  { %v2975_v38 = vpop.f32.mrf.mxu0 }
 0x354   :  { %2703 = vst.msk [vmem:[%s5088_s7 + $0x38] sm:$0xff] %vm2695_vm3, %v2975_v38 }
 0x355   :  { %v2646_v63 = vpop.f32.mrf.mxu0 }
 0x356   :  { %2702 = vst.msk [vmem:[%s5088_s7 + $0x30] sm:$0xff] %vm2695_vm3, %v2646_v63 }
 0x386   :  { %v2978_v24 = vpop.f32.mrf.mxu1 }
 0x387   :  { %2705 = vst.msk [vmem:[%s5088_s7 + $0x48] sm:$0xff] %vm2695_vm3, %v2978_v24 }
 0x388   :  { %v2656_v58 = vpop.f32.mrf.mxu1 }
 0x389   :  { %2704 = vst.msk [vmem:[%s5088_s7 + $0x40] sm:$0xff] %vm2695_vm3, %v2656_v58 }
 0x3a4   :  { %v2981_v19 = vpop.f32.mrf.mxu1 }
 0x3a5   :  { %2707 = vst.msk [vmem:[%s5088_s7 + $0x58] sm:$0xff] %vm2695_vm3, %v2981_v19 }
 0x3a6   :  { %v2666_v49 = vpop.f32.mrf.mxu1 }
 0x3a7   :  { %2706 = vst.msk [vmem:[%s5088_s7 + $0x50] sm:$0xff] %vm2695_vm3, %v2666_v49 }
 0x3b7   :  { %v2984_v10 = vpop.f32.mrf.mxu1 }
 0x3b8   :  { %2709 = vst.msk [vmem:[%s5088_s7 + $0x68] sm:$0xff] %vm2695_vm3, %v2984_v10 }
 0x3b9   :  { %v2676_v60 = vpop.f32.mrf.mxu1 }
 0x3ba   :  { %2708 = vst.msk [vmem:[%s5088_s7 + $0x60] sm:$0xff] %vm2695_vm3, %v2676_v60 }
 0x3d4   :  { %v2987_v25 = vpop.f32.mrf.mxu1 }
 0x3d5   :  { %2711 = vst.msk [vmem:[%s5088_s7 + $0x78] sm:$0xff] %vm2695_vm3, %v2987_v25 }
 0x3d6   :  { %v2686_v45 = vpop.f32.mrf.mxu1 }
 0x3d7   :  { %2710 = vst.msk [vmem:[%s5088_s7 + $0x70] sm:$0xff] %vm2695_vm3, %v2686_v45 }

</bundles_post_ra>
